<compile_context>
chip_gen: v7x
topology: tpu7x:2x2x1
jax: 0.10.0
libtpu: 0.0.40
codegen_flags: <defaults>
</compile_context>

<pallas_src>
import jax
import jax.numpy as jnp
from jax import lax
from jax.experimental import pallas as pl
from jax.experimental.pallas import tpu as pltpu


def _round_up(x, m):
    return (x + m - 1) // m * m


# ----------------------------- Pallas kernel -------------------------------

def make_residual_block_kernel(H, W, Wp, halo, hwp):
    """Kernel closed over static geometry (H, W, padded width Wp, halo, HWp)."""

    def kernel(x_ref,
               w1_ref, b1_ref,
               w2_ref, b2_ref,
               w3_ref, b3_ref,
               wi_ref, bi_ref,
               out_ref, h1_scr):
        # x_ref: (1, HWp, Cin) bf16 on the zero-padded (Hp, Wp) grid.
        x = x_ref[0]                                            # [HWp, Cin] bf16

        # ---- conv1 (1x1): BN scale folded into weights; bias-add + ReLU ----
        h1 = jnp.dot(x, w1_ref[...], preferred_element_type=jnp.float32)
        h1 = jnp.maximum(h1 + b1_ref[...], 0.0)

        # Interior mask generated in-kernel (no mask input / DMA).  Wp is a
        # power of two, so column = idx & (Wp-1); row range is a plain compare.
        idx = lax.broadcasted_iota(jnp.int32, (hwp, 1), 0)
        col = jnp.bitwise_and(idx, Wp - 1)
        interior = ((idx >= Wp) & (idx < (H + 1) * Wp)
                    & (col >= 1) & (col <= W))
        mask = jnp.where(interior, jnp.float32(1.0), jnp.float32(0.0))
        h1 = h1 * mask             # padding ring must read as zeros for conv2

        # ---- stage h1 in the halo'd bf16 scratch ----
        # Only the halo rows need zeroing each step; the interior rows are
        # fully overwritten.  (Zeroed every step, so megacore/v7x per-core
        # "first iteration" semantics are irrelevant.)
        cmid = h1_scr.shape[1]
        bot = h1_scr.shape[0] - halo - hwp
        h1_scr[pl.ds(0, halo), :] = jnp.zeros((halo, cmid), h1_scr.dtype)
        h1_scr[pl.ds(halo + hwp, bot), :] = jnp.zeros((bot, cmid), h1_scr.dtype)
        h1_scr[pl.ds(halo, hwp), :] = h1.astype(h1_scr.dtype)

        # ---- conv2 (3x3, pad=1) as 9 shifted bf16 views + ONE matmul ----
        taps = []
        for dy in (-1, 0, 1):
            for dx in (-1, 0, 1):
                off = halo + dy * Wp + dx                       # static offset
                taps.append(h1_scr[pl.ds(off, hwp), :])
        cat = jnp.concatenate(taps, axis=1)                     # [HWp, 9*Cmid] bf16
        h2 = jnp.dot(cat, w2_ref[...], preferred_element_type=jnp.float32)
        h2 = jnp.maximum(h2 + b2_ref[...], 0.0)

        # ---- conv3 (1x1) + bias + ReLU ----
        h3 = jnp.dot(h2.astype(jnp.bfloat16), w3_ref[...],
                     preferred_element_type=jnp.float32)
        h3 = jnp.maximum(h3 + b3_ref[...], 0.0)

        # ---- identity branch: 1x1 conv + bias (no ReLU) ----
        iden = jnp.dot(x, wi_ref[...], preferred_element_type=jnp.float32)
        iden = iden + bi_ref[...]

        # Residual add, bf16 writeback (ring rows are cropped by the wrapper).
        out_ref[0] = (iden + h3).astype(out_ref.dtype)

    return kernel


# ----------------------------- helpers (glue) -------------------------------

def fold_bn(gamma, beta, mean, var, conv_bias, eps=1e-5):
    scale = gamma / jnp.sqrt(var + eps)
    bias = beta + (conv_bias - mean) * scale
    return (scale.reshape(1, -1).astype(jnp.float32),
            bias.reshape(1, -1).astype(jnp.float32))


def residual_block_pallas(x_nchw, p, stride=1):
    N, Cin, H, W = x_nchw.shape
    Cmid = p['w1'].shape[0]
    Cout = p['w3'].shape[0]
    Hp = H + 2
    # Pow2 padded width: tap row-shifts stay tile aligned and the in-kernel
    # mask needs no vector integer division.
    Wp = max(int(pl.next_power_of_2(W + 2)), 8)
    HWp = Hp * Wp
    Ho = (H - 1) // stride + 1
    Wo = (W - 1) // stride + 1
    halo = _round_up(Wp + 1, 16)                     # bf16 packs 16 sublanes/vreg
    scr_rows = _round_up(halo + HWp + Wp + 1, 16)    # top halo + image + bottom

    # Folded-BN scale/bias; scales are baked into the bf16 weight columns.
    s1, b1 = fold_bn(p['bn1_g'], p['bn1_b'], p['bn1_m'], p['bn1_v'], p['cb1'])
    s2, b2 = fold_bn(p['bn2_g'], p['bn2_b'], p['bn2_m'], p['bn2_v'], p['cb2'])
    s3, b3 = fold_bn(p['bn3_g'], p['bn3_b'], p['bn3_m'], p['bn3_v'], p['cb3'])
    si, bi = fold_bn(p['bni_g'], p['bni_b'], p['bni_m'], p['bni_v'], p['cbi'])

    # conv weights (PyTorch OIHW) -> matmul form [K, Cout], scaled, bf16.
    w1 = (p['w1'][:, :, 0, 0].T * s1).astype(jnp.bfloat16)           # [Cin, Cmid]
    w2 = (jnp.concatenate(
        [p['w2'][:, :, ky, kx].T for ky in range(3) for kx in range(3)],
        axis=0) * s2).astype(jnp.bfloat16)                           # [9*Cmid, Cmid]
    w3 = (p['w3'][:, :, 0, 0].T * s3).astype(jnp.bfloat16)           # [Cmid, Cout]
    wi = (p['wi'][:, :, 0, 0].T * si).astype(jnp.bfloat16)           # [Cin, Cout]

    # NCHW -> NHWC, zero-pad spatially (1-pixel ring + right pad to Wp),
    # flatten HW.  XLA fuses this into a single copy pass.
    x_nhwc = jnp.transpose(x_nchw, (0, 2, 3, 1))
    x_pad = jnp.pad(x_nhwc, ((0, 0), (1, 1), (1, Wp - W - 1), (0, 0)))
    x_flat = x_pad.reshape(N, HWp, Cin).astype(jnp.bfloat16)

    kernel = make_residual_block_kernel(H, W, Wp, halo, HWp)

    def full(shape):
        zeros = (0,) * len(shape)
        return pl.BlockSpec(shape, lambda n: zeros)   # resident across steps

    grid_spec = pltpu.PrefetchScalarGridSpec(
        num_scalar_prefetch=0,
        grid=(N,),
        in_specs=[
            pl.BlockSpec((1, HWp, Cin), lambda n: (n, 0, 0)),
            full(w1.shape), full(b1.shape),
            full(w2.shape), full(b2.shape),
            full(w3.shape), full(b3.shape),
            full(wi.shape), full(bi.shape),
        ],
        out_specs=pl.BlockSpec((1, HWp, Cout), lambda n: (n, 0, 0)),
        scratch_shapes=[pltpu.VMEM((scr_rows, Cmid), jnp.bfloat16)],
    )

    out_flat = pl.pallas_call(
        kernel,
        out_shape=jax.ShapeDtypeStruct((N, HWp, Cout), jnp.bfloat16),
        grid_spec=grid_spec,
        compiler_params=pltpu.CompilerParams(
            dimension_semantics=("parallel",),
            # 32 MiB is v7x-safe (64 MiB/TC); raise toward 64 MiB on v6e for
            # real stage-1 sizes.
            vmem_limit_bytes=32 * 1024 * 1024),
    )(x_flat, w1, b1, w2, b2, w3, b3, wi, bi)

    # Crop the padding ring and apply the stride (one fused XLA slice pass).
    out = out_flat.reshape(N, Hp, Wp, Cout)
    out = out[:, 1:1 + (Ho - 1) * stride + 1:stride,
              1:1 + (Wo - 1) * stride + 1:stride, :]
    return jnp.transpose(out, (0, 3, 1, 2))           # back to NCHW (bf16)


# ----------------------------- params & reference ---------------------------

def init_params(key, indim, middim, outdim):
    keys = iter(jax.random.split(key, 24))

    def nrm(shape, s=0.1):
        return s * jax.random.normal(next(keys), shape, jnp.float32)

    def unif(shape, lo, hi):
        return jax.random.uniform(next(keys), shape, jnp.float32, lo, hi)

    p = {}
    p['w1'] = nrm((middim, indim, 1, 1)); p['cb1'] = nrm((middim,), 0.05)
    p['bn1_g'] = unif((middim,), 0.8, 1.2); p['bn1_b'] = nrm((middim,), 0.05)
    p['bn1_m'] = nrm((middim,), 0.05); p['bn1_v'] = unif((middim,), 0.5, 1.5)
    p['w2'] = nrm((middim, middim, 3, 3)); p['cb2'] = nrm((middim,), 0.05)
    p['bn2_g'] = unif((middim,), 0.8, 1.2); p['bn2_b'] = nrm((middim,), 0.05)
    p['bn2_m'] = nrm((middim,), 0.05); p['bn2_v'] = unif((middim,), 0.5, 1.5)
    p['w3'] = nrm((outdim, middim, 1, 1)); p['cb3'] = nrm((outdim,), 0.05)
    p['bn3_g'] = unif((outdim,), 0.8, 1.2); p['bn3_b'] = nrm((outdim,), 0.05)
    p['bn3_m'] = nrm((outdim,), 0.05); p['bn3_v'] = unif((outdim,), 0.5, 1.5)
    p['wi'] = nrm((outdim, indim, 1, 1)); p['cbi'] = nrm((outdim,), 0.05)
    p['bni_g'] = unif((outdim,), 0.8, 1.2); p['bni_b'] = nrm((outdim,), 0.05)
    p['bni_m'] = nrm((outdim,), 0.05); p['bni_v'] = unif((outdim,), 0.5, 1.5)
    return p


def ref_forward(x, p, stride=1, eps=1e-5):
    """Pure-JAX f32 reference of the PyTorch forward (eval-mode BatchNorm)."""
    def conv(x, w, b, s, pad):
        y = lax.conv_general_dilated(x, w, (s, s), [(pad, pad), (pad, pad)],
                                     dimension_numbers=('NCHW', 'OIHW', 'NCHW'))
        return y + b[None, :, None, None]

    def bn(x, g, be, m, v):
        sc = (g / jnp.sqrt(v + eps))[None, :, None, None]
        return (x - m[None, :, None, None]) * sc + be[None, :, None, None]

    h = jax.nn.relu(bn(conv(x, p['w1'], p['cb1'], 1, 0),
                       p['bn1_g'], p['bn1_b'], p['bn1_m'], p['bn1_v']))
    h = jax.nn.relu(bn(conv(h, p['w2'], p['cb2'], stride, 1),
                       p['bn2_g'], p['bn2_b'], p['bn2_m'], p['bn2_v']))
    h = jax.nn.relu(bn(conv(h, p['w3'], p['cb3'], 1, 0),
                       p['bn3_g'], p['bn3_b'], p['bn3_m'], p['bn3_v']))
    iden = bn(conv(x, p['wi'], p['cbi'], stride, 0),
              p['bni_g'], p['bni_b'], p['bni_m'], p['bni_v'])
    return iden + h


# --------------------------------- main --------------------------------------

if __name__ == "__main__":
    N, indim, middim, outdim, H, W, stride = 2, 4, 8, 16, 16, 16, 1
    key = jax.random.PRNGKey(0)
    kx, kp = jax.random.split(key)
    x = jax.random.normal(kx, (N, indim, H, W), jnp.float32)
    params = init_params(kp, indim, middim, outdim)

    out = residual_block_pallas(x, params, stride=stride)
    out = jax.block_until_ready(out)

    ref = ref_forward(x, params, stride=stride)
    assert out.shape == ref.shape, (out.shape, ref.shape)
    # bf16 MXU operands / bf16 output (f32 accumulate) vs. an all-f32
    # reference -> tolerance is dtype-driven, not algorithm-driven.
    err = float(jnp.max(jnp.abs(out.astype(jnp.float32) - ref)))
    assert err < 5e-2, f"max abs err {err}"
    print("KERNEL_OK")
</pallas_src>

<mosaic_0001>
module attributes {stable_mosaic.version = 11 : i64} {
  func.func @kernel(%arg0: i32, %arg1: memref<1x576x4xbf16, #tpu.memory_space<vmem>>, %arg2: memref<4x8xbf16, #tpu.memory_space<vmem>>, %arg3: memref<1x8xf32, #tpu.memory_space<vmem>>, %arg4: memref<72x8xbf16, #tpu.memory_space<vmem>>, %arg5: memref<1x8xf32, #tpu.memory_space<vmem>>, %arg6: memref<8x16xbf16, #tpu.memory_space<vmem>>, %arg7: memref<1x16xf32, #tpu.memory_space<vmem>>, %arg8: memref<4x16xbf16, #tpu.memory_space<vmem>>, %arg9: memref<1x16xf32, #tpu.memory_space<vmem>>, %arg10: memref<1x576x16xbf16, #tpu.memory_space<vmem>>, %arg11: memref<672x8xbf16, #tpu.memory_space<vmem>>) attributes {dimension_semantics = [#tpu.dimension_semantics<parallel>], iteration_bounds = array<i64: 2>, scalar_prefetch = 0 : i64, scratch_operands = 1 : i64, tpu.core_type = #tpu.core_type<tc>, window_params = [{transform_indices = @transform_0, window_bounds = array<i64: 1, 576, 4>}, {pipeline_mode = #tpu.pipeline_mode<synchronous>, transform_indices = @transform_1, window_bounds = array<i64: 4, 8>}, {pipeline_mode = #tpu.pipeline_mode<synchronous>, transform_indices = @transform_2, window_bounds = array<i64: 1, 8>}, {pipeline_mode = #tpu.pipeline_mode<synchronous>, transform_indices = @transform_3, window_bounds = array<i64: 72, 8>}, {pipeline_mode = #tpu.pipeline_mode<synchronous>, transform_indices = @transform_4, window_bounds = array<i64: 1, 8>}, {pipeline_mode = #tpu.pipeline_mode<synchronous>, transform_indices = @transform_5, window_bounds = array<i64: 8, 16>}, {pipeline_mode = #tpu.pipeline_mode<synchronous>, transform_indices = @transform_6, window_bounds = array<i64: 1, 16>}, {pipeline_mode = #tpu.pipeline_mode<synchronous>, transform_indices = @transform_7, window_bounds = array<i64: 4, 16>}, {pipeline_mode = #tpu.pipeline_mode<synchronous>, transform_indices = @transform_8, window_bounds = array<i64: 1, 16>}, {transform_indices = @transform_9, window_bounds = array<i64: 1, 576, 16>}]} {
    %c0 = arith.constant 0 : index
    %c0_0 = arith.constant 0 : index
    %c0_1 = arith.constant 0 : index
    %0 = vector.load %arg1[%c0, %c0_0, %c0_1] : memref<1x576x4xbf16, #tpu.memory_space<vmem>>, vector<1x576x4xbf16>
    %1 = vector.shape_cast %0 : vector<1x576x4xbf16> to vector<576x4xbf16>
    %c0_2 = arith.constant 0 : index
    %c0_3 = arith.constant 0 : index
    %2 = vector.load %arg2[%c0_2, %c0_3] : memref<4x8xbf16, #tpu.memory_space<vmem>>, vector<4x8xbf16>
    %cst = arith.constant dense<0.000000e+00> : vector<576x8xf32>
    %3 = tpu.matmul %1, %2, %cst {dimension_numbers = #tpu.dot_dimension_numbers<[1], [0], [0], [1], [0, 0, 1, 1], [], []>} : vector<576x4xbf16>, vector<4x8xbf16>, vector<576x8xf32> -> vector<576x8xf32>
    %c0_4 = arith.constant 0 : index
    %c0_5 = arith.constant 0 : index
    %4 = vector.load %arg3[%c0_4, %c0_5] : memref<1x8xf32, #tpu.memory_space<vmem>>, vector<1x8xf32>
    %5 = vector.broadcast %4 : vector<1x8xf32> to vector<576x8xf32>
    %6 = arith.addf %3, %5 : vector<576x8xf32>
    %cst_6 = arith.constant 0.000000e+00 : f32
    %7 = vector.broadcast %cst_6 : f32 to vector<576x8xf32>
    %8 = arith.maximumf %6, %7 : vector<576x8xf32>
    %9 = tpu.iota {dimensions = array<i32: 0>} : vector<576x1xi32>
    %c31_i32 = arith.constant 31 : i32
    %10 = vector.broadcast %c31_i32 : i32 to vector<576x1xi32>
    %11 = arith.andi %9, %10 : vector<576x1xi32>
    %c32_i32 = arith.constant 32 : i32
    %12 = vector.broadcast %c32_i32 : i32 to vector<576x1xi32>
    %13 = arith.cmpi sge, %9, %12 : vector<576x1xi32>
    %c544_i32 = arith.constant 544 : i32
    %14 = vector.broadcast %c544_i32 : i32 to vector<576x1xi32>
    %15 = arith.cmpi slt, %9, %14 : vector<576x1xi32>
    %16 = arith.andi %13, %15 : vector<576x1xi1>
    %c1_i32 = arith.constant 1 : i32
    %17 = vector.broadcast %c1_i32 : i32 to vector<576x1xi32>
    %18 = arith.cmpi sge, %11, %17 : vector<576x1xi32>
    %19 = arith.andi %16, %18 : vector<576x1xi1>
    %c16_i32 = arith.constant 16 : i32
    %20 = vector.broadcast %c16_i32 : i32 to vector<576x1xi32>
    %21 = arith.cmpi sle, %11, %20 : vector<576x1xi32>
    %22 = arith.andi %19, %21 : vector<576x1xi1>
    %cst_7 = arith.constant 1.000000e+00 : f32
    %cst_8 = arith.constant 0.000000e+00 : f32
    %23 = vector.broadcast %cst_7 : f32 to vector<576x1xf32>
    %24 = vector.broadcast %cst_8 : f32 to vector<576x1xf32>
    %25 = arith.select %22, %23, %24 : vector<576x1xi1>, vector<576x1xf32>
    %26 = vector.broadcast %25 : vector<576x1xf32> to vector<576x8xf32>
    %27 = arith.mulf %8, %26 : vector<576x8xf32>
    %cst_9 = arith.constant 0.000000e+00 : bf16
    %28 = vector.broadcast %cst_9 : bf16 to vector<48x8xbf16>
    %c0_10 = arith.constant 0 : index
    %c0_11 = arith.constant 0 : index
    %29 = vector.load %arg11[%c0_10, %c0_11] : memref<672x8xbf16, #tpu.memory_space<vmem>>, vector<48x8xbf16>
    tpu.vector_store %arg11[%c0_10, %c0_11], %28 {strides = array<i32>} : memref<672x8xbf16, #tpu.memory_space<vmem>>, vector<48x8xbf16>,
    %cst_12 = arith.constant 0.000000e+00 : bf16
    %30 = vector.broadcast %cst_12 : bf16 to vector<48x8xbf16>
    %c624 = arith.constant 624 : index
    %c0_13 = arith.constant 0 : index
    %31 = vector.load %arg11[%c624, %c0_13] : memref<672x8xbf16, #tpu.memory_space<vmem>>, vector<48x8xbf16>
    tpu.vector_store %arg11[%c624, %c0_13], %30 {strides = array<i32>} : memref<672x8xbf16, #tpu.memory_space<vmem>>, vector<48x8xbf16>,
    %32 = arith.truncf %27 : vector<576x8xf32> to vector<576x8xbf16>
    %c48 = arith.constant 48 : index
    %c0_14 = arith.constant 0 : index
    %33 = vector.load %arg11[%c48, %c0_14] : memref<672x8xbf16, #tpu.memory_space<vmem>>, vector<576x8xbf16>
    tpu.vector_store %arg11[%c48, %c0_14], %32 {strides = array<i32>} : memref<672x8xbf16, #tpu.memory_space<vmem>>, vector<576x8xbf16>,
    %c15 = arith.constant 15 : index
    %c0_15 = arith.constant 0 : index
    %34 = vector.load %arg11[%c15, %c0_15] : memref<672x8xbf16, #tpu.memory_space<vmem>>, vector<576x8xbf16>
    %c16 = arith.constant 16 : index
    %c0_16 = arith.constant 0 : index
    %35 = vector.load %arg11[%c16, %c0_16] : memref<672x8xbf16, #tpu.memory_space<vmem>>, vector<576x8xbf16>
    %c17 = arith.constant 17 : index
    %c0_17 = arith.constant 0 : index
    %36 = vector.load %arg11[%c17, %c0_17] : memref<672x8xbf16, #tpu.memory_space<vmem>>, vector<576x8xbf16>
    %c47 = arith.constant 47 : index
    %c0_18 = arith.constant 0 : index
    %37 = vector.load %arg11[%c47, %c0_18] : memref<672x8xbf16, #tpu.memory_space<vmem>>, vector<576x8xbf16>
    %c48_19 = arith.constant 48 : index
    %c0_20 = arith.constant 0 : index
    %38 = vector.load %arg11[%c48_19, %c0_20] : memref<672x8xbf16, #tpu.memory_space<vmem>>, vector<576x8xbf16>
    %c49 = arith.constant 49 : index
    %c0_21 = arith.constant 0 : index
    %39 = vector.load %arg11[%c49, %c0_21] : memref<672x8xbf16, #tpu.memory_space<vmem>>, vector<576x8xbf16>
    %c79 = arith.constant 79 : index
    %c0_22 = arith.constant 0 : index
    %40 = vector.load %arg11[%c79, %c0_22] : memref<672x8xbf16, #tpu.memory_space<vmem>>, vector<576x8xbf16>
    %c80 = arith.constant 80 : index
    %c0_23 = arith.constant 0 : index
    %41 = vector.load %arg11[%c80, %c0_23] : memref<672x8xbf16, #tpu.memory_space<vmem>>, vector<576x8xbf16>
    %c81 = arith.constant 81 : index
    %c0_24 = arith.constant 0 : index
    %42 = vector.load %arg11[%c81, %c0_24] : memref<672x8xbf16, #tpu.memory_space<vmem>>, vector<576x8xbf16>
    %43 = tpu.concatenate %34, %35, %36, %37, %38, %39, %40, %41, %42 in 1 : vector<576x8xbf16>, vector<576x8xbf16>, vector<576x8xbf16>, vector<576x8xbf16>, vector<576x8xbf16>, vector<576x8xbf16>, vector<576x8xbf16>, vector<576x8xbf16>, vector<576x8xbf16> -> vector<576x72xbf16>
    %c0_25 = arith.constant 0 : index
    %c0_26 = arith.constant 0 : index
    %44 = vector.load %arg4[%c0_25, %c0_26] : memref<72x8xbf16, #tpu.memory_space<vmem>>, vector<72x8xbf16>
    %cst_27 = arith.constant dense<0.000000e+00> : vector<576x8xf32>
    %45 = tpu.matmul %43, %44, %cst_27 {dimension_numbers = #tpu.dot_dimension_numbers<[1], [0], [0], [1], [0, 0, 1, 1], [], []>} : vector<576x72xbf16>, vector<72x8xbf16>, vector<576x8xf32> -> vector<576x8xf32>
    %c0_28 = arith.constant 0 : index
    %c0_29 = arith.constant 0 : index
    %46 = vector.load %arg5[%c0_28, %c0_29] : memref<1x8xf32, #tpu.memory_space<vmem>>, vector<1x8xf32>
    %47 = vector.broadcast %46 : vector<1x8xf32> to vector<576x8xf32>
    %48 = arith.addf %45, %47 : vector<576x8xf32>
    %cst_30 = arith.constant 0.000000e+00 : f32
    %49 = vector.broadcast %cst_30 : f32 to vector<576x8xf32>
    %50 = arith.maximumf %48, %49 : vector<576x8xf32>
    %51 = arith.truncf %50 : vector<576x8xf32> to vector<576x8xbf16>
    %c0_31 = arith.constant 0 : index
    %c0_32 = arith.constant 0 : index
    %52 = vector.load %arg6[%c0_31, %c0_32] : memref<8x16xbf16, #tpu.memory_space<vmem>>, vector<8x16xbf16>
    %cst_33 = arith.constant dense<0.000000e+00> : vector<576x16xf32>
    %53 = tpu.matmul %51, %52, %cst_33 {dimension_numbers = #tpu.dot_dimension_numbers<[1], [0], [0], [1], [0, 0, 1, 1], [], []>} : vector<576x8xbf16>, vector<8x16xbf16>, vector<576x16xf32> -> vector<576x16xf32>
    %c0_34 = arith.constant 0 : index
    %c0_35 = arith.constant 0 : index
    %54 = vector.load %arg7[%c0_34, %c0_35] : memref<1x16xf32, #tpu.memory_space<vmem>>, vector<1x16xf32>
    %55 = vector.broadcast %54 : vector<1x16xf32> to vector<576x16xf32>
    %56 = arith.addf %53, %55 : vector<576x16xf32>
    %cst_36 = arith.constant 0.000000e+00 : f32
    %57 = vector.broadcast %cst_36 : f32 to vector<576x16xf32>
    %58 = arith.maximumf %56, %57 : vector<576x16xf32>
    %c0_37 = arith.constant 0 : index
    %c0_38 = arith.constant 0 : index
    %59 = vector.load %arg8[%c0_37, %c0_38] : memref<4x16xbf16, #tpu.memory_space<vmem>>, vector<4x16xbf16>
    %cst_39 = arith.constant dense<0.000000e+00> : vector<576x16xf32>
    %60 = tpu.matmul %1, %59, %cst_39 {dimension_numbers = #tpu.dot_dimension_numbers<[1], [0], [0], [1], [0, 0, 1, 1], [], []>} : vector<576x4xbf16>, vector<4x16xbf16>, vector<576x16xf32> -> vector<576x16xf32>
    %c0_40 = arith.constant 0 : index
    %c0_41 = arith.constant 0 : index
    %61 = vector.load %arg9[%c0_40, %c0_41] : memref<1x16xf32, #tpu.memory_space<vmem>>, vector<1x16xf32>
    %62 = vector.broadcast %61 : vector<1x16xf32> to vector<576x16xf32>
    %63 = arith.addf %60, %62 : vector<576x16xf32>
    %64 = arith.addf %63, %58 : vector<576x16xf32>
    %65 = arith.truncf %64 : vector<576x16xf32> to vector<576x16xbf16>
    %c0_42 = arith.constant 0 : index
    %c0_43 = arith.constant 0 : index
    %c0_44 = arith.constant 0 : index
    %66 = vector.load %arg10[%c0_42, %c0_43, %c0_44] : memref<1x576x16xbf16, #tpu.memory_space<vmem>>, vector<1x576x16xbf16>
    %67 = vector.shape_cast %66 : vector<1x576x16xbf16> to vector<576x16xbf16>
    %68 = vector.shape_cast %65 : vector<576x16xbf16> to vector<1x576x16xbf16>
    tpu.vector_store %arg10[%c0_42, %c0_43, %c0_44], %68 {strides = array<i32>} : memref<1x576x16xbf16, #tpu.memory_space<vmem>>, vector<1x576x16xbf16>,
    return
  }
  func.func @transform_0(%arg0: i32) -> (i32, i32, i32) {
    %c0_i32 = arith.constant 0 : i32
    %c0_i32_0 = arith.constant 0 : i32
    %c0_i32_1 = arith.constant 0 : i32
    return %arg0, %c0_i32, %c0_i32_0 : i32, i32, i32
  }
  func.func @transform_1(%arg0: i32) -> (i32, i32) {
    %c0_i32 = arith.constant 0 : i32
    %c0_i32_0 = arith.constant 0 : i32
    %c0_i32_1 = arith.constant 0 : i32
    return %c0_i32, %c0_i32_0 : i32, i32
  }
  func.func @transform_2(%arg0: i32) -> (i32, i32) {
    %c0_i32 = arith.constant 0 : i32
    %c0_i32_0 = arith.constant 0 : i32
    %c0_i32_1 = arith.constant 0 : i32
    return %c0_i32, %c0_i32_0 : i32, i32
  }
  func.func @transform_3(%arg0: i32) -> (i32, i32) {
    %c0_i32 = arith.constant 0 : i32
    %c0_i32_0 = arith.constant 0 : i32
    %c0_i32_1 = arith.constant 0 : i32
    return %c0_i32, %c0_i32_0 : i32, i32
  }
  func.func @transform_4(%arg0: i32) -> (i32, i32) {
    %c0_i32 = arith.constant 0 : i32
    %c0_i32_0 = arith.constant 0 : i32
    %c0_i32_1 = arith.constant 0 : i32
    return %c0_i32, %c0_i32_0 : i32, i32
  }
  func.func @transform_5(%arg0: i32) -> (i32, i32) {
    %c0_i32 = arith.constant 0 : i32
    %c0_i32_0 = arith.constant 0 : i32
    %c0_i32_1 = arith.constant 0 : i32
    return %c0_i32, %c0_i32_0 : i32, i32
  }
  func.func @transform_6(%arg0: i32) -> (i32, i32) {
    %c0_i32 = arith.constant 0 : i32
    %c0_i32_0 = arith.constant 0 : i32
    %c0_i32_1 = arith.constant 0 : i32
    return %c0_i32, %c0_i32_0 : i32, i32
  }
  func.func @transform_7(%arg0: i32) -> (i32, i32) {
    %c0_i32 = arith.constant 0 : i32
    %c0_i32_0 = arith.constant 0 : i32
    %c0_i32_1 = arith.constant 0 : i32
    return %c0_i32, %c0_i32_0 : i32, i32
  }
  func.func @transform_8(%arg0: i32) -> (i32, i32) {
    %c0_i32 = arith.constant 0 : i32
    %c0_i32_0 = arith.constant 0 : i32
    %c0_i32_1 = arith.constant 0 : i32
    return %c0_i32, %c0_i32_0 : i32, i32
  }
  func.func @transform_9(%arg0: i32) -> (i32, i32, i32) {
    %c0_i32 = arith.constant 0 : i32
    %c0_i32_0 = arith.constant 0 : i32
    %c0_i32_1 = arith.constant 0 : i32
    return %arg0, %c0_i32, %c0_i32_0 : i32, i32, i32
  }
}

</mosaic_0001>

<bundles_post_ra>
// kernel: tpu_custom_call.1
= control target key start
LH: loop header
LB: loop body
LE: loop exit
PB: predicated region body
PF: predicated region fallthrough
CT: control target
= control target key end

     0   :  { %s6850_s30 = smov 0   ;;  %s9668_s0 = inlined_call_operand.vmem [shape: bf16[2,576,4], index: 0, kind: input, shape index: {}]   ;;  %s9669_s1 = inlined_call_operand.vmem [shape: bf16[4,8], index: 1, kind: input, shape index: {}]   ;;  %s9670_s2 = inlined_call_operand.vmem [shape: f32[1,8], index: 2, kind: input, shape index: {}]   ;;  %s9671_s3 = inlined_call_operand.vmem [shape: bf16[72,8], index: 3, kind: input, shape index: {}]   ;;  %s9672_s4 = inlined_call_operand.vmem [shape: f32[1,8], index: 4, kind: input, shape index: {}]   ;;  %s9673_s5 = inlined_call_operand.vmem [shape: bf16[8,16], index: 5, kind: input, shape index: {}]   ;;  %s9674_s6 = inlined_call_operand.vmem [shape: f32[1,16], index: 6, kind: input, shape index: {}]   ;;  %s9675_s7 = inlined_call_operand.vmem [shape: bf16[4,16], index: 7, kind: input, shape index: {}]   ;;  %s9676_s8 = inlined_call_operand.vmem [shape: f32[1,16], index: 8, kind: input, shape index: {}]   ;;  %s9677_s9 = inlined_call_operand.vmem [shape: bf16[2,576,16], index: 9, kind: output, shape index: {}]  }
   0x1 LB: > { %s5834_s10 = sadd.s32 4294967295, %s6788_s30   ;;  %p5838_p0 = scmp.ge.s32.totalorder %s6788_s30, 1  ;;  %s6788_s30 = sphi %s6850_s30, %s19_s30  }
   0x2   : > { %p287_p1 = scmp.lt.s32.totalorder %s6788_s30, 3 }
   0x4   : > { %p288_p2 = pnand %p5838_p0, %p287_p1 }
   0x5   : > { %v406_v0 = vld [vmem:[%s9669_s1] sm:$0x3] (!%p288_p2)  ;;  %vm703_vm0 = vcmask (!%p288_p2), 1041408   ;;  %p323_p3 = scmp.lt.s32.totalorder (!%p288_p2), %s5834_s10, 1  ;;  %vm9678_vm1 = vcmask (!%p288_p2), 31744   ;;  %vm1893_vm2 = vcmask (!%p288_p2), 64512   ;;  %v1100_v42 = vlaneseq (!%p288_p2) }
   0x6   : > { %291 = sbr.rel (%p288_p2) target bundleno = 1399 (0x577), region = 56  ;;  %6642 = vmatprep.subr.msk.bf16.mxu0 (!%p288_p2), %vm703_vm0, %v406_v0  ;;  %v705_v1 = vsel (!%p288_p2), %vm703_vm0, %v406_v0, 0  ;;  %v6790_v18 = vmov (!%p288_p2), 0   ;;  %s6791_s17 = smov (!%p288_p2), 24   ;;  %vm2417_vm3 = vcmask (!%p288_p2), 1046528  }
   0x7   : > { %6329 = vmatpush3.bf16.msra.mxu0 (!%p288_p2), %v705_v1  ;;  %1896 = vst.msk [vmem:[#allocation2 + $0x10] sm:$0xff] (!%p288_p2), %vm1893_vm2, %v6790_v18  ;;  %1894 = vst.msk [vmem:[#allocation2] sm:$0xff] (!%p288_p2), %vm1893_vm2, %v6790_v18  ;;  %s6792_s18 = smov (!%p288_p2), 16   ;;  %s6793_s19 = smov (!%p288_p2), 8   ;;  %vm2018_vm4 = vsmask.f32 (!%p288_p2), 7424 }
   0x8   : > { %1895 = vst.msk [vmem:[#allocation2 + $0x8] sm:$0xff] (!%p288_p2), %vm1893_vm2, %v6790_v18  ;;  %1897 = vst.msk [vmem:[#allocation2 + $0x138] sm:$0xff] (!%p288_p2), %vm1893_vm2, %v6790_v18  ;;  %v6947_v43 = vshrl.u32 (!%p288_p2), %v1100_v42, 7  ;;  %v6952_v44 = vld [vmem:[%s9670_s2] ss:$0 sm:$0xff] (!%p288_p2)  ;;  %s6795_s22 = smov (!%p288_p2), 48  }
   0x9   : > { %1898 = vst.msk [vmem:[#allocation2 + $0x140] sm:$0xff] (!%p288_p2), %vm1893_vm2, %v6790_v18  ;;  %1899 = vst.msk [vmem:[#allocation2 + $0x148] sm:$0xff] (!%p288_p2), %vm1893_vm2, %v6790_v18  ;;  %s6796_s23 = smov (!%p288_p2), 40   ;;  %s6797_s24 = smov (!%p288_p2), 32  }
   0xa   : > { %v1107_v45 = vadd.s32 (!%p288_p2), 48, %v6947_v43  ;;  %v1105_v47 = vadd.s32 (!%p288_p2), 32, %v6947_v43  ;;  %v1111_v63 = vadd.s32 (!%p288_p2), 80, %v6947_v43  ;;  %s6798_s25 = smov (!%p288_p2), 64   ;;  %s6799_s26 = smov (!%p288_p2), 56  }
   0xc   : > { %v1179_v55 = vand.u32 (!%p288_p2), 31, %v1107_v45  ;;  %v1177_v58 = vand.u32 (!%p288_p2), 31, %v1105_v47  ;;  %v1183_v18 = vand.u32 (!%p288_p2), 31, %v1111_v63  ;;  %v1119_v63 = vadd.s32 (!%p288_p2), 144, %v6947_v43 }
   0xd   : > { %s9724_s10 = smov (!%p323_p3, %s5834_s10), 1 }
   0xe   : > { %s6647_s13 = smul.u32 288, %s9724_s10  ;;  %v2010_v21 = vld [vmem:[#allocation2 + $0x10] sm:$0x80]  ;;  %vm1611_vm5 = vcmp.le.s32.totalorder %v1179_v55, 16  ;;  %vm1465_vm6 = vcmp.ge.s32.totalorder %v1177_v58, 1  ;;  %vm1615_vm7 = vcmp.le.s32.totalorder %v1183_v18, 16 }
   0xf   : > { %2568 = vrot.lane.b32.xlu1 %v2010_v21, %s6791_s17  ;;  %v1973_v22 = vld [vmem:[#allocation2 + $0x8] sm:$0xff]  ;;  %v6916_v23 = vld [vmem:[#allocation2 + $0x10] sm:$0xff] }
  0x10   : > { %s6871_s16 = scalar_lea.vmem %s9668_s0, %s6647_s13  ;;  %v2418_v24 = vrot.slane %v1973_v22, 1  ;;  %v2419_v25 = vrot.slane %v6916_v23, 1  ;;  %v2020_v27 = vshll.u32 %v1973_v22, 16  ;;  %v2023_v29 = vshrl.u32 %v1973_v22, 16 }
  0x11   : > { %v6666_v2 = vld [vmem:[%s6871_s16] sm:$0xff]   ;;  %v6667_v3 = vld [vmem:[%s6871_s16 + $0x8] sm:$0xff]   ;;  %v6668_v4 = vld [vmem:[%s6871_s16 + $0x10] sm:$0xff]   ;;  %v2027_v30 = vshll.u32 %v6916_v23, 16 }
  0x12   : > { %6330 = vmatprep.mubr.msk.bf16.mxu0 %vm9678_vm1, %v6666_v2  ;;  %v6669_v5 = vld [vmem:[%s6871_s16 + $0x18] sm:$0xff]   ;;  %v6670_v6 = vld [vmem:[%s6871_s16 + $0x20] sm:$0xff]   ;;  %v6671_v7 = vld [vmem:[%s6871_s16 + $0x28] sm:$0xff]   ;;  %v2420_v26 = vsel %vm2417_vm3, %v2418_v24, %v2419_v25  ;;  %2491 = vrot.lane.b32.xlu0 %v2418_v24, %s6792_s18  ;;  %v2022_v28 = vrot.slane %v2020_v27, 1 }
  0x13   : > { %6331 = vmatmul.mubr.msk.bf16.vlgmr.msra.gmra.mrb[0].mxu0 %vm9678_vm1, %v6667_v3  ;;  %v6672_v8 = vld [vmem:[%s6871_s16 + $0x30] sm:$0xff]   ;;  %v6673_v9 = vld [vmem:[%s6871_s16 + $0x38] sm:$0xff]   ;;  %v6674_v10 = vld [vmem:[%s6871_s16 + $0x40] sm:$0xff]   ;;  %2493 = vrot.lane.b32.xlu1 %v2420_v26, %s6792_s18  ;;  %v6926_v32 = vrot.slane %v2027_v30, 1  ;;  %v1113_v30 = vadd.s32 96, %v6947_v43 }
  0x14   : > { %6334 = vmatprep.mubr.msk.bf16.mxu0 %vm9678_vm1, %v6668_v4  ;;  %v6675_v11 = vld [vmem:[%s6871_s16 + $0x48] sm:$0xff]   ;;  %v6676_v12 = vld [vmem:[%s6871_s16 + $0x50] sm:$0xff]   ;;  %v6677_v13 = vld [vmem:[%s6871_s16 + $0x58] sm:$0xff]   ;;  %v2025_v31 = vor.u32 %v2023_v29, %v2022_v28 }
  0x15   : > { %v6678_v14 = vld [vmem:[%s6871_s16 + $0x60] sm:$0xff]   ;;  %v6679_v15 = vld [vmem:[%s6871_s16 + $0x68] sm:$0xff]   ;;  %v6680_v16 = vld [vmem:[%s6871_s16 + $0x70] sm:$0xff]  }
  0x16   : > { %v6681_v17 = vld [vmem:[%s6871_s16 + $0x78] sm:$0xff]   ;;  %v6682_v19 = vld [vmem:[%s6871_s16 + $0x80] sm:$0xff]   ;;  %v6683_v20 = vld [vmem:[%s6871_s16 + $0x88] sm:$0xff]   ;;  %v2030_v33 = vsel %vm2018_vm4, %v2025_v31, %v6926_v32 }
  0x17   : > { %2306 = vrot.lane.b32.xlu1 %v2022_v28, %s6793_s19  ;;  %2308 = vrot.lane.b32.xlu0 %v2030_v33, %s6793_s19  ;;  %v6684_v34 = vld [vmem:[%s6871_s16 + $0x90] sm:$0xff]   ;;  %v6685_v35 = vld [vmem:[%s6871_s16 + $0x98] sm:$0xff]   ;;  %v1115_v28 = vadd.s32 112, %v6947_v43 }
  0x18   : > { %v6686_v36 = vld [vmem:[%s6871_s16 + $0xa0] sm:$0xff]   ;;  %v6687_v37 = vld [vmem:[%s6871_s16 + $0xa8] sm:$0xff]   ;;  %v6688_v38 = vld [vmem:[%s6871_s16 + $0xb0] sm:$0xff]  }
  0x19   : > { %v6689_v39 = vld [vmem:[%s6871_s16 + $0xb8] sm:$0xff]   ;;  %v6690_v40 = vld [vmem:[%s6871_s16 + $0xc0] sm:$0xff]   ;;  %v6691_v41 = vld [vmem:[%s6871_s16 + $0xc8] sm:$0xff]   ;;  %v1187_v42 = vand.u32 31, %v1115_v28 }
  0x1a   : > { %v6692_v0 = vld [vmem:[%s6871_s16 + $0xd0] sm:$0xff]   ;;  %v6693_v1 = vld [vmem:[%s6871_s16 + $0xd8] sm:$0xff]   ;;  %v6694_v18 = vld [vmem:[%s6871_s16 + $0xe0] sm:$0xff]  }
  0x1b   : > { %6335 = vmatmul.mubr.msk.bf16.gmra.mrb[4].mxu0 %vm9678_vm1, %v6669_v5  ;;  %v1109_v5 = vadd.s32 64, %v6947_v43  ;;  %vm6997_vm9 = vcmp.le.s32.totalorder %v1187_v42, 16  ;;  %v6696_v42 = vld [vmem:[%s6871_s16 + $0xf0] sm:$0xff]  }
  0x1c   : > { %6338 = vmatprep.mubr.msk.bf16.mxu0 %vm9678_vm1, %v6670_v6 }
  0x1d   : > { %v1181_v21 = vand.u32 31, %v1109_v5 }
  0x1f   : > { %vm1469_vm8 = vcmp.ge.s32.totalorder %v1181_v21, 1 }
  0x23   : > { %6339 = vmatmul.mubr.msk.bf16.gmra.mrb[8].mxu0 %vm9678_vm1, %v6671_v7 }
  0x24   : > { %6342 = vmatprep.mubr.msk.bf16.mxu0 %vm9678_vm1, %v6672_v8 }
  0x2b   : > { %6343 = vmatmul.mubr.msk.bf16.gmra.mrb[12].mxu0 %vm9678_vm1, %v6673_v9 }
  0x2c   : > { %6346 = vmatprep.mubr.msk.bf16.mxu0 %vm9678_vm1, %v6674_v10  ;;  %v6794_v10 = vmov 0.0  }
  0x33   : > { %6347 = vmatmul.mubr.msk.bf16.gmra.mrb[16].mxu0 %vm9678_vm1, %v6675_v11  ;;  %v1755_v11 = vsel %vm1611_vm5, 1.0, %v6794_v10 }
  0x34   : > { %6350 = vmatprep.mubr.msk.bf16.mxu0 %vm9678_vm1, %v6676_v12 }
  0x3b   : > { %6351 = vmatmul.mubr.msk.bf16.gmra.mrb[20].mxu0 %vm9678_vm1, %v6677_v13 }
  0x3c   : > { %6354 = vmatprep.mubr.msk.bf16.mxu0 %vm9678_vm1, %v6678_v14 }
  0x43   : > { %6355 = vmatmul.mubr.msk.bf16.gmra.mrb[24].mxu0 %vm9678_vm1, %v6679_v15  ;;  %v1753_v15 = vsel %vm1465_vm6, 1.0, %v6794_v10 }
  0x44   : > { %6358 = vmatprep.mubr.msk.bf16.mxu0 %vm9678_vm1, %v6680_v16 }
  0x4b   : > { %6359 = vmatmul.mubr.msk.bf16.gmra.mrb[28].mxu0 %vm9678_vm1, %v6681_v17 }
  0x4c   : > { %6362 = vmatprep.mubr.msk.bf16.mxu0 %vm9678_vm1, %v6682_v19 }
  0x53   : > { %6363 = vmatmul.mubr.msk.bf16.gmra.mrb[32].mxu0 %vm9678_vm1, %v6683_v20 }
  0x54   : > { %6366 = vmatprep.mubr.msk.bf16.mxu0 %vm9678_vm1, %v6684_v34 }
  0x5b   : > { %6367 = vmatmul.mubr.msk.bf16.gmra.mrb[36].mxu0 %vm9678_vm1, %v6685_v35 }
  0x5c   : > { %6370 = vmatprep.mubr.msk.bf16.mxu0 %vm9678_vm1, %v6686_v36 }
  0x63   : > { %6371 = vmatmul.mubr.msk.bf16.gmra.mrb[40].mxu0 %vm9678_vm1, %v6687_v37  ;;  %v1759_v37 = vsel %vm1615_vm7, 1.0, %v6794_v10 }
  0x64   : > { %6374 = vmatprep.mubr.msk.bf16.mxu0 %vm9678_vm1, %v6688_v38 }
  0x6b   : > { %6375 = vmatmul.mubr.msk.bf16.gmra.mrb[44].mxu0 %vm9678_vm1, %v6689_v39 }
  0x6c   : > { %6378 = vmatprep.mubr.msk.bf16.mxu0 %vm9678_vm1, %v6690_v40 }
  0x73   : > { %6379 = vmatmul.mubr.msk.bf16.gmra.mrb[48].mxu0 %vm9678_vm1, %v6691_v41 }
  0x74   : > { %6382 = vmatprep.mubr.msk.bf16.mxu0 %vm9678_vm1, %v6692_v0  ;;  %v1117_v0 = vadd.s32 128, %v6947_v43 }
  0x7b   : > { %6383 = vmatmul.mubr.msk.bf16.gmra.mrb[52].mxu0 %vm9678_vm1, %v6693_v1 }
  0x7c   : > { %6386 = vmatprep.mubr.msk.bf16.mxu0 %vm9678_vm1, %v6694_v18 }
  0xe6   : > { %v6332_v46 = vpop.f32.mrb[0].mxu0 }
  0xe7   : > { %v750_v48 = vadd.f32 %v6332_v46, %v6952_v44  ;;  %v741_v49 = vpop.f32.mrb[1].mxu0  ;;  %v1757_v46 = vsel %vm1469_vm8, 1.0, %v6794_v10  ;;  %vm4069_vm8 = vcmask 1043456  }
  0xe8   : > { %v742_v50 = vadd.f32 %v6952_v44, %v741_v49  ;;  %v6333_v51 = vpop.f32.mrb[2].mxu0 }
  0xe9   : > { %v1030_v52 = vmax.f32 %v750_v48, 0.0  ;;  %v753_v53 = vadd.f32 %v6333_v51, %v6952_v44  ;;  %v744_v54 = vpop.f32.mrb[3].mxu0 }
  0xea   : > { %v1028_v56 = vmax.f32 %v742_v50, 0.0  ;;  %v745_v57 = vadd.f32 %v6952_v44, %v744_v54  ;;  %v1185_v50 = vand.u32 31, %v1113_v30 }
  0xeb   : > { %v1031_v59 = vmax.f32 %v753_v53, 0.0  ;;  %v1823_v61 = vmul.f32 0.0, %v1030_v52 }
  0xec   : > { %v1029_v60 = vmax.f32 %v745_v57, 0.0  ;;  %v1821_v2 = vmul.f32 0.0, %v1028_v56  ;;  %v2031_v57 = vshrl.u32 %v6916_v23, 16  ;;  %vm1473_vm10 = vcmp.ge.s32.totalorder %v1185_v50, 1 }
  0xed   : > { %v1824_v62 = vmul.f32 0.0, %v1031_v59 }
  0xee   : > { %v1822_v3 = vmul.f32 0.0, %v1029_v60  ;;  %v6336_v4 = vpop.f32.mrb[4].mxu0 }
  0xef   : > { %v1901_v6 = vpack.c.bf16 %v1824_v62, %v1823_v61  ;;  %v766_v7 = vadd.f32 %v6336_v4, %v6952_v44  ;;  %v757_v8 = vpop.f32.mrb[5].mxu0 }
  0xf0   : > { %v1900_v9 = vpack.c.bf16 %v1822_v3, %v1821_v2  ;;  %v758_v12 = vadd.f32 %v6952_v44, %v757_v8  ;;  %v6337_v13 = vpop.f32.mrb[6].mxu0 }
  0xf1   : > { %1937 = vst.msk [vmem:[#allocation2 + $0x20] sm:$0xff] %vm1893_vm2, %v1901_v6  ;;  %v1034_v14 = vmax.f32 %v766_v7, 0.0  ;;  %v769_v16 = vadd.f32 %v6337_v13, %v6952_v44  ;;  %v760_v17 = vpop.f32.mrb[7].mxu0  ;;  %v1763_v7 = vsel %vm6997_vm9, 1.0, %v6794_v10 }
  0xf2   : > { %1936 = vst.msk [vmem:[#allocation2 + $0x18] sm:$0xff] %vm1893_vm2, %v1900_v9  ;;  %v1032_v19 = vmax.f32 %v758_v12, 0.0  ;;  %v761_v20 = vadd.f32 %v6952_v44, %v760_v17  ;;  %v1761_v9 = vsel %vm1473_vm10, 1.0, %v6794_v10 }
  0xf3   : > { %v1827_v22 = vmul.f32 %v1755_v11, %v1034_v14  ;;  %v1035_v24 = vmax.f32 %v769_v16, 0.0  ;;  %v1191_v14 = vand.u32 31, %v1119_v63 }
  0xf4   : > { %v1825_v26 = vmul.f32 %v1753_v15, %v1032_v19  ;;  %v1033_v27 = vmax.f32 %v761_v20, 0.0  ;;  %v1189_v15 = vand.u32 31, %v1117_v0  ;;  %v6695_v19 = vld [vmem:[%s6871_s16 + $0xe8] sm:$0xff]  }
  0xf5   : > { %v1828_v29 = vmul.f32 0.0, %v1035_v24  ;;  %vm7029_vm11 = vcmp.le.s32.totalorder %v1191_v14, 16  ;;  %6387 = vmatmul.mubr.msk.bf16.gmra.mrb[56].mxu0 %vm9678_vm1, %v6695_v19 }
  0xf6   : > { %v1902_v31 = vpack.c.bf16 %v1033_v27, %v1825_v26  ;;  %v6340_v33 = vpop.f32.mrb[8].mxu0  ;;  %vm7033_vm12 = vcmp.ge.s32.totalorder %v1189_v15, 1  ;;  %6390 = vmatprep.mubr.msk.bf16.mxu0 %vm9678_vm1, %v6696_v42 }
  0xf7   : > { %v1903_v34 = vpack.c.bf16 %v1828_v29, %v1827_v22  ;;  %v782_v35 = vadd.f32 %v6340_v33, %v6952_v44  ;;  %v773_v36 = vpop.f32.mrb[9].mxu0 }
  0xf8   : > { %1938 = vst.msk [vmem:[#allocation2 + $0x28] sm:$0xff] %vm1893_vm2, %v1902_v31  ;;  %v774_v38 = vadd.f32 %v6952_v44, %v773_v36  ;;  %v6341_v39 = vpop.f32.mrb[10].mxu0  ;;  %v2014_v40 = vld [vmem:[#allocation2 + $0x20] sm:$0x80]  ;;  %v1123_v31 = vadd.s32 176, %v6947_v43 }
  0xf9   : > { %v6980_v41 = vld [vmem:[#allocation2 + $0x20] sm:$0xff]  ;;  %1939 = vst.msk [vmem:[#allocation2 + $0x30] sm:$0xff] %vm1893_vm2, %v1903_v34  ;;  %v1038_v45 = vmax.f32 %v782_v35, 0.0  ;;  %v785_v47 = vadd.f32 %v6341_v39, %v6952_v44  ;;  %2816 = vrot.lane.b32.xlu0 %v2014_v40, %s6795_s22  ;;  %v776_v48 = vpop.f32.mrb[11].mxu0  ;;  %v6988_v49 = vld [vmem:[#allocation2 + $0x18] sm:$0xff] }
  0xfa   : > { %2572 = vrot.lane.b32.xlu1 %v6980_v41, %s6791_s17  ;;  %v1036_v51 = vmax.f32 %v774_v38, 0.0  ;;  %v777_v52 = vadd.f32 %v6952_v44, %v776_v48  ;;  %v2421_v53 = vrot.slane %v6988_v49, 1  ;;  %v2035_v56 = vshll.u32 %v6988_v49, 16 }
  0xfb   : > { %v1831_v54 = vmul.f32 %v1759_v37, %v1038_v45  ;;  %v1039_v55 = vmax.f32 %v785_v47, 0.0  ;;  %v2423_v6 = vrot.slane %v6980_v41, 1  ;;  %v2039_v33 = vshrl.u32 %v6988_v49, 16 }
  0xfc   : > { %v1829_v58 = vmul.f32 %v1757_v46, %v1036_v51  ;;  %v1037_v59 = vmax.f32 %v777_v52, 0.0  ;;  %v2422_v60 = vsel %vm2417_vm3, %v2419_v25, %v2421_v53  ;;  %v2037_v3 = vrot.slane %v2035_v56, 1 }
  0xfd   : > { %v1832_v62 = vmul.f32 0.0, %v1039_v55  ;;  %2495 = vrot.lane.b32.xlu0 %v2422_v60, %s6792_s18  ;;  %v2033_v25 = vor.u32 %v2031_v57, %v6926_v32  ;;  %v2424_v22 = vsel %vm2417_vm3, %v2421_v53, %v2423_v6  ;;  %v2043_v34 = vshll.u32 %v6980_v41, 16 }
  0xfe   : > { %2570 = vrot.lane.b32.xlu1 %v6988_v49, %s6791_s17  ;;  %v1904_v1 = vpack.c.bf16 %v1037_v59, %v1829_v58  ;;  %v6344_v2 = vpop.f32.mrb[12].mxu0  ;;  %v1121_v37 = vadd.s32 160, %v6947_v43  ;;  %v2041_v46 = vor.u32 %v2039_v33, %v2037_v3  ;;  %v1767_v47 = vsel %vm7029_vm11, 1.0, %v6794_v10  ;;  %v6697_v59 = vld [vmem:[%s6871_s16 + $0xf8] sm:$0xff]  }
  0xff   : > { %v1905_v23 = vpack.c.bf16 %v1832_v62, %v1831_v54  ;;  %v798_v4 = vadd.f32 %v6344_v2, %v6952_v44  ;;  %v789_v5 = vpop.f32.mrb[13].mxu0  ;;  %v2038_v24 = vsel %vm2018_vm4, %v2033_v25, %v2037_v3  ;;  %v7044_v45 = vld [vmem:[#allocation2 + $0x28] sm:$0xff]  ;;  %v1765_v51 = vsel %vm7033_vm12, 1.0, %v6794_v10  ;;  %6391 = vmatmul.mubr.msk.bf16.gmra.mrb[60].mxu0 %vm9678_vm1, %v6697_v59 }
 0x100   : > { %1940 = vst.msk [vmem:[#allocation2 + $0x38] sm:$0xff] %vm1893_vm2, %v1904_v1  ;;  %v790_v8 = vadd.f32 %v6952_v44, %v789_v5  ;;  %v6345_v11 = vpop.f32.mrb[14].mxu0  ;;  %v1195_v54 = vand.u32 31, %v1123_v31  ;;  %v7059_v55 = vrot.slane %v2043_v34, 1  ;;  %v1193_v58 = vand.u32 31, %v1121_v37  ;;  %v6699_v34 = vld [vmem:[%s6871_s16 + $0x108] sm:$0xff]  }
 0x101   : > { %1941 = vst.msk [vmem:[#allocation2 + $0x40] sm:$0xff] %vm1893_vm2, %v1905_v23  ;;  %2658 = vrot.lane.b32.xlu0 %v2037_v3, %s6797_s24  ;;  %v1042_v32 = vmax.f32 %v798_v4, 0.0  ;;  %v801_v12 = vadd.f32 %v6345_v11, %v6952_v44  ;;  %v792_v13 = vpop.f32.mrb[15].mxu0  ;;  %v1127_v2 = vadd.s32 208, %v6947_v43  ;;  %v1125_v4 = vadd.s32 192, %v6947_v43 }
 0x102   : > { %2739 = vrot.lane.b32.xlu1 %v2421_v53, %s6796_s23  ;;  %v1040_v16 = vmax.f32 %v790_v8, 0.0  ;;  %v793_v17 = vadd.f32 %v6952_v44, %v792_v13  ;;  %v2046_v62 = vsel %vm2018_vm4, %v2041_v46, %v7059_v55  ;;  %vm1627_vm13 = vcmp.le.s32.totalorder %v1195_v54, 16 }
 0x103   : > { %v1835_v20 = vmul.f32 %v1763_v7, %v1042_v32  ;;  %v1043_v21 = vmax.f32 %v801_v12, 0.0  ;;  %vm7070_vm14 = vcmp.ge.s32.totalorder %v1193_v58, 1  ;;  %v7080_v11 = vrot.slane %v7044_v45, 1 }
 0x104   : > { %v1833_v26 = vmul.f32 %v1761_v9, %v1040_v16  ;;  %v1041_v27 = vmax.f32 %v793_v17, 0.0  ;;  %v7077_v9 = vld [vmem:[#allocation2 + $0x30] sm:$0xff]  ;;  %v1771_v32 = vsel %vm1627_vm13, 1.0, %v6794_v10  ;;  %v1769_v15 = vsel %vm7070_vm14, 1.0, %v6794_v10 }
 0x105   : > { %2310 = vrot.lane.b32.xlu0 %v2038_v24, %s6793_s19  ;;  %v1836_v28 = vmul.f32 0.0, %v1043_v21  ;;  %v1199_v18 = vand.u32 31, %v1127_v2  ;;  %v2051_v19 = vshll.u32 %v7044_v45, 16  ;;  %v2059_v24 = vshll.u32 %v7077_v9, 16 }
 0x106   : > { %2741 = vrot.lane.b32.xlu1 %v2424_v22, %s6796_s23  ;;  %v1906_v35 = vpack.c.bf16 %v1041_v27, %v1833_v26  ;;  %v6348_v36 = vpop.f32.mrb[16].mxu0  ;;  %v2426_v29 = vsel %vm2417_vm3, %v2423_v6, %v7080_v11  ;;  %v2055_v30 = vshrl.u32 %v7044_v45, 16 }
 0x107   : > { %v1907_v38 = vpack.c.bf16 %v1836_v28, %v1835_v20  ;;  %v814_v39 = vadd.f32 %v6348_v36, %v6952_v44  ;;  %v805_v40 = vpop.f32.mrb[17].mxu0  ;;  %v6698_v28 = vld [vmem:[%s6871_s16 + $0x100] sm:$0xff]   ;;  %vm1631_vm15 = vcmp.le.s32.totalorder %v1199_v18, 16  ;;  %v7106_v36 = vrot.slane %v2051_v19, 1 }
 0x108   : > { %1942 = vst.msk [vmem:[#allocation2 + $0x48] sm:$0xff] %vm1893_vm2, %v1906_v35  ;;  %v806_v48 = vadd.f32 %v6952_v44, %v805_v40  ;;  %v6349_v49 = vpop.f32.mrb[18].mxu0  ;;  %6394 = vmatprep.mubr.msk.bf16.mxu0 %vm9678_vm1, %v6698_v28  ;;  %v7113_v6 = vrot.slane %v2059_v24, 1  ;;  %v7160_v18 = vld [vmem:[#allocation2 + $0x40] sm:$0xff] }
 0x109   : > { %2818 = vrot.lane.b32.xlu0 %v7044_v45, %s6795_s22  ;;  %1943 = vst.msk [vmem:[#allocation2 + $0x50] sm:$0xff] %vm1893_vm2, %v1907_v38  ;;  %v1046_v50 = vmax.f32 %v814_v39, 0.0  ;;  %v817_v52 = vadd.f32 %v6349_v49, %v6952_v44  ;;  %v808_v53 = vpop.f32.mrb[19].mxu0  ;;  %6395 = vmatmul.mubr.msk.bf16.gmra.mrb[64].mxu0 %vm9678_vm1, %v6699_v34  ;;  %v2057_v46 = vor.u32 %v2055_v30, %v7106_v36 }
 0x10a   : > { %2497 = vrot.lane.b32.xlu1 %v2424_v22, %s6792_s18  ;;  %v1044_v56 = vmax.f32 %v806_v48, 0.0  ;;  %v809_v57 = vadd.f32 %v6952_v44, %v808_v53  ;;  %v1197_v22 = vand.u32 31, %v1125_v4  ;;  %v1775_v48 = vsel %vm1631_vm15, 1.0, %v6794_v10 }
 0x10b   : > { %v1839_v60 = vmul.f32 %v1767_v47, %v1046_v50  ;;  %v1047_v61 = vmax.f32 %v817_v52, 0.0  ;;  %v2427_v47 = vrot.slane %v7077_v9, 1  ;;  %vm3136_vm15 = vcmask 130048  }
 0x10c   : > { %v1837_v63 = vmul.f32 %v1765_v51, %v1044_v56  ;;  %v1045_v0 = vmax.f32 %v809_v57, 0.0  ;;  %vm7108_vm5 = vcmp.ge.s32.totalorder %v1197_v22, 1  ;;  %v6700_v51 = vld [vmem:[%s6871_s16 + $0x110] sm:$0xff]  }
 0x10d   : > { %2574 = vrot.lane.b32.xlu0 %v7044_v45, %s6791_s17  ;;  %v1840_v1 = vmul.f32 0.0, %v1047_v61  ;;  %v1773_v53 = vsel %vm7108_vm5, 1.0, %v6794_v10  ;;  %6398 = vmatprep.mubr.msk.bf16.mxu0 %vm9678_vm1, %v6700_v51  ;;  %v6701_v61 = vld [vmem:[%s6871_s16 + $0x118] sm:$0xff]   ;;  %v2431_v51 = vrot.slane %v7160_v18, 1  ;;  %vm3211_vm5 = vcmask 195584  }
 0x10e   : > { %2312 = vrot.lane.b32.xlu1 %v2046_v62, %s6793_s19  ;;  %v1908_v23 = vpack.c.bf16 %v1045_v0, %v1837_v63  ;;  %v6352_v3 = vpop.f32.mrb[20].mxu0  ;;  %v2428_v63 = vsel %vm2417_vm3, %v7080_v11, %v2427_v47 }
 0x10f   : > { %v1909_v5 = vpack.c.bf16 %v1840_v1, %v1839_v60  ;;  %v830_v7 = vadd.f32 %v6352_v3, %v6952_v44  ;;  %v821_v8 = vpop.f32.mrb[21].mxu0  ;;  %v1129_v3 = vadd.s32 224, %v6947_v43 }
 0x110   : > { %1944 = vst.msk [vmem:[#allocation2 + $0x58] sm:$0xff] %vm1893_vm2, %v1908_v23  ;;  %v822_v12 = vadd.f32 %v6952_v44, %v821_v8  ;;  %v6353_v13 = vpop.f32.mrb[22].mxu0  ;;  %v1131_v23 = vadd.s32 240, %v6947_v43 }
 0x111   : > { %2660 = vrot.lane.b32.xlu0 %v2046_v62, %s6797_s24  ;;  %1945 = vst.msk [vmem:[#allocation2 + $0x60] sm:$0xff] %vm1893_vm2, %v1909_v5  ;;  %v1050_v14 = vmax.f32 %v830_v7, 0.0  ;;  %v833_v16 = vadd.f32 %v6353_v13, %v6952_v44  ;;  %v824_v17 = vpop.f32.mrb[23].mxu0  ;;  %v7136_v62 = vsel %vm2018_vm4, %v2057_v46, %v7113_v6  ;;  %6399 = vmatmul.mubr.msk.bf16.gmra.mrb[68].mxu0 %vm9678_vm1, %v6701_v61 }
 0x112   : > { %2576 = vrot.lane.b32.xlu1 %v7077_v9, %s6791_s17  ;;  %v1048_v20 = vmax.f32 %v822_v12, 0.0  ;;  %v825_v21 = vadd.f32 %v6952_v44, %v824_v17  ;;  %v1203_v8 = vand.u32 31, %v1131_v23  ;;  %v1201_v12 = vand.u32 31, %v1129_v3  ;;  %v6702_v17 = vld [vmem:[%s9671_s3] sm:$0xff]  }
 0x113   : > { %v1843_v26 = vmul.f32 %v1771_v32, %v1050_v14  ;;  %v1051_v27 = vmax.f32 %v833_v16, 0.0  ;;  %6402 = vmatprep.subr.bf16.mxu0 %v6702_v17  ;;  %6632 = vmatprep.subr.bf16.mxu1 %v6702_v17 }
 0x114   : > { %v1841_v31 = vmul.f32 %v1769_v15, %v1048_v20  ;;  %v1049_v33 = vmax.f32 %v825_v21, 0.0  ;;  %vm1635_vm6 = vcmp.le.s32.totalorder %v1203_v8, 16  ;;  %vm1489_vm7 = vcmp.ge.s32.totalorder %v1201_v12, 1  ;;  %6403 = vmatpush3.bf16.msra.mxu0 %v6702_v17  ;;  %6637 = vmatpush3.bf16.msra.mxu1 %v6702_v17 }
 0x115   : > { %2820 = vrot.lane.b32.xlu0 %v7077_v9, %s6795_s22  ;;  %v1844_v35 = vmul.f32 0.0, %v1051_v27  ;;  %v1779_v19 = vsel %vm1635_vm6, 1.0, %v6794_v10  ;;  %v7168_v27 = vld [vmem:[#allocation2 + $0x38] sm:$0xff]  ;;  %vm3286_vm6 = vcmask 261120  }
 0x116   : > { %2743 = vrot.lane.b32.xlu1 %v2426_v29, %s6796_s23  ;;  %v1910_v37 = vpack.c.bf16 %v1049_v33, %v1841_v31  ;;  %v6356_v38 = vpop.f32.mrb[24].mxu0  ;;  %v6703_v31 = vld [vmem:[%s9671_s3 + $0x8] sm:$0xff]  }
 0x117   : > { %v1911_v40 = vpack.c.bf16 %v1844_v35, %v1843_v26  ;;  %v846_v42 = vadd.f32 %v6356_v38, %v6952_v44  ;;  %v837_v45 = vpop.f32.mrb[25].mxu0  ;;  %v1777_v26 = vsel %vm1489_vm7, 1.0, %v6794_v10  ;;  %6404 = vmatprep.subr.bf16.mxu0 %v6703_v31  ;;  %6633 = vmatprep.subr.bf16.mxu1 %v6703_v31  ;;  %v2429_v35 = vrot.slane %v7168_v27, 1  ;;  %v6704_v38 = vld [vmem:[%s9671_s3 + $0x10] sm:$0xff]  }
 0x118   : > { %1946 = vst.msk [vmem:[#allocation2 + $0x68] sm:$0xff] %vm1893_vm2, %v1910_v37  ;;  %v838_v49 = vadd.f32 %v6952_v44, %v837_v45  ;;  %v6357_v50 = vpop.f32.mrb[26].mxu0  ;;  %v2047_v37 = vshrl.u32 %v6980_v41, 16  ;;  %6405 = vmatpush3.bf16.msra.mxu0 %v6703_v31  ;;  %6638 = vmatpush3.bf16.msra.mxu1 %v6703_v31  ;;  %v2067_v45 = vshll.u32 %v7168_v27, 16  ;;  %vm3361_vm7 = vcmask 326656  }
 0x119   : > { %2987 = vrot.lane.b32.xlu0 %v7080_v11, %s6798_s25  ;;  %1947 = vst.msk [vmem:[#allocation2 + $0x70] sm:$0xff] %vm1893_vm2, %v1911_v40  ;;  %v1054_v52 = vmax.f32 %v846_v42, 0.0  ;;  %v849_v54 = vadd.f32 %v6357_v50, %v6952_v44  ;;  %v840_v56 = vpop.f32.mrb[27].mxu0  ;;  %6406 = vmatprep.subr.bf16.mxu0 %v6704_v38  ;;  %v2430_v41 = vsel %vm2417_vm3, %v2427_v47, %v2429_v35  ;;  %v2063_v42 = vshrl.u32 %v7077_v9, 16 }
 0x11a   : > { %2499 = vrot.lane.b32.xlu1 %v2426_v29, %s6792_s18  ;;  %v1052_v57 = vmax.f32 %v838_v49, 0.0  ;;  %v841_v58 = vadd.f32 %v6952_v44, %v840_v56  ;;  %v2049_v39 = vor.u32 %v2047_v37, %v7059_v55  ;;  %6634 = vmatprep.subr.bf16.mxu1 %v6704_v38  ;;  %v6705_v55 = vld [vmem:[%s9671_s3 + $0x18] sm:$0xff]   ;;  %v2069_v47 = vrot.slane %v2067_v45, 1 }
 0x11b   : > { %v1847_v59 = vmul.f32 %v1775_v48, %v1054_v52  ;;  %v1055_v60 = vmax.f32 %v849_v54, 0.0  ;;  %v2065_v46 = vor.u32 %v2063_v42, %v7113_v6  ;;  %v1135_v6 = vadd.s32 272, %v6947_v43 }
 0x11c   : > { %v1845_v0 = vmul.f32 %v1773_v53, %v1052_v57  ;;  %v1053_v1 = vmax.f32 %v841_v58, 0.0  ;;  %v2054_v40 = vsel %vm2018_vm4, %v2049_v39, %v7106_v36  ;;  %6407 = vmatpush3.bf16.msra.mxu0 %v6704_v38  ;;  %6639 = vmatpush3.bf16.msra.mxu1 %v6704_v38  ;;  %v1133_v49 = vadd.s32 256, %v6947_v43 }
 0x11d   : > { %2989 = vrot.lane.b32.xlu0 %v2428_v63, %s6798_s25  ;;  %v1848_v2 = vmul.f32 0.0, %v1055_v60  ;;  %6408 = vmatprep.subr.bf16.mxu0 %v6705_v55  ;;  %v2070_v48 = vsel %vm2018_vm4, %v2065_v46, %v2069_v47  ;;  %v1207_v53 = vand.u32 31, %v1135_v6  ;;  %v2071_v57 = vshrl.u32 %v7168_v27, 16 }
 0x11e   : > { %2908 = vrot.lane.b32.xlu1 %v7136_v62, %s6799_s26  ;;  %v1912_v25 = vpack.c.bf16 %v1053_v1, %v1845_v0  ;;  %v6360_v4 = vpop.f32.mrb[28].mxu0  ;;  %6635 = vmatprep.subr.bf16.mxu1 %v6705_v55  ;;  %v1205_v56 = vand.u32 31, %v1133_v49  ;;  %v2075_v58 = vshll.u32 %v7160_v18, 16  ;;  %v2432_v3 = vsel %vm2417_vm3, %v2429_v35, %v2431_v51 }
 0x11f   : > { %v1913_v5 = vpack.c.bf16 %v1848_v2, %v1847_v59  ;;  %v862_v7 = vadd.f32 %v6360_v4, %v6952_v44  ;;  %v853_v11 = vpop.f32.mrb[29].mxu0  ;;  %vm1639_vm9 = vcmp.le.s32.totalorder %v1207_v53, 16 }
 0x120   : > { %1948 = vst.msk [vmem:[#allocation2 + $0x78] sm:$0xff] %vm1893_vm2, %v1912_v25  ;;  %v854_v32 = vadd.f32 %v6952_v44, %v853_v11  ;;  %v6361_v13 = vpop.f32.mrb[30].mxu0  ;;  %6409 = vmatpush3.bf16.msra.mxu0 %v6705_v55  ;;  %6640 = vmatpush3.bf16.msra.mxu1 %v6705_v55  ;;  %vm1493_vm10 = vcmp.ge.s32.totalorder %v1205_v56, 1  ;;  %v1783_v0 = vsel %vm1639_vm9, 1.0, %v6794_v10  ;;  %vm3511_vm9 = vcmask 457728  }
 0x121   : > { %2906 = vrot.lane.b32.xlu0 %v7106_v36, %s6799_s26  ;;  %1949 = vst.msk [vmem:[#allocation2 + $0x80] sm:$0xff] %vm1893_vm2, %v1913_v5  ;;  %v1058_v14 = vmax.f32 %v862_v7, 0.0  ;;  %v865_v15 = vadd.f32 %v6361_v13, %v6952_v44  ;;  %v856_v16 = vpop.f32.mrb[31].mxu0  ;;  %v6706_v36 = vld [vmem:[%s9671_s3 + $0x20] ss:$0 sps:$4 sm:$0xff]   ;;  %v1781_v2 = vsel %vm1493_vm10, 1.0, %v6794_v10  ;;  %v2073_v5 = vor.u32 %v2071_v57, %v2069_v47  ;;  %v7269_v47 = vpop.permute.xlu0 %2491 }
 0x122   : > { %2316 = vrot.lane.b32.xlu1 %v7136_v62, %s6793_s19  ;;  %v1056_v20 = vmax.f32 %v854_v32, 0.0  ;;  %v857_v24 = vadd.f32 %v6952_v44, %v856_v16  ;;  %6643 = vmatprep.subr.msk.bf16.mxu0 %vm4069_vm8, %v6706_v36  ;;  %v4071_v9 = vsel %vm4069_vm8, %v6706_v36, 0  ;;  %v2077_v7 = vrot.slane %v2075_v58, 1  ;;  %v1981_v16 = vld [vmem:[#allocation2 + $0x48] sm:$0xff] }
 0x123   : > { %v1851_v21 = vmul.f32 %v1779_v19, %v1058_v14  ;;  %v1059_v22 = vmax.f32 %v865_v15, 0.0  ;;  %6644 = vmatprep.subr.msk.bf16.mxu1 %vm4069_vm8, %v6706_v36  ;;  %v7238_v15 = vld [vmem:[#allocation2 + $0x50] sm:$0xff]  ;;  %v2433_v17 = vrot.slane %v1981_v16, 1  ;;  %vm3436_vm10 = vcmask 392192  }
 0x124   : > { %v1849_v28 = vmul.f32 %v1777_v26, %v1056_v20  ;;  %v1057_v30 = vmax.f32 %v857_v24, 0.0  ;;  %6411 = vmatpush3.bf16.msra.mxu0 %v4071_v9  ;;  %6641 = vmatpush3.bf16.msra.mxu1 %v4071_v9  ;;  %v2078_v14 = vsel %vm2018_vm4, %v2073_v5, %v2077_v7  ;;  %v2079_v20 = vshrl.u32 %v7160_v18, 16 }
 0x125   : > { %2745 = vrot.lane.b32.xlu0 %v2428_v63, %s6796_s23  ;;  %v1852_v29 = vmul.f32 0.0, %v1059_v22  ;;  %v2434_v19 = vsel %vm2417_vm3, %v2431_v51, %v2433_v17  ;;  %v2091_v35 = vshll.u32 %v7238_v15, 16 }
 0x126   : > { %2824 = vrot.lane.b32.xlu1 %v7160_v18, %s6795_s22  ;;  %v1914_v34 = vpack.c.bf16 %v1057_v30, %v1849_v28  ;;  %v6364_v50 = vpop.f32.mrb[32].mxu0  ;;  %v2081_v22 = vor.u32 %v2079_v20, %v2077_v7  ;;  %v7257_v28 = vpop.permute.xlu1 %2568 }
 0x127   : > { %v1915_v33 = vpack.c.bf16 %v1852_v29, %v1851_v21  ;;  %v878_v52 = vadd.f32 %v6364_v50, %v6952_v44  ;;  %v869_v54 = vpop.f32.mrb[33].mxu0  ;;  %v2083_v21 = vshll.u32 %v1981_v16, 16  ;;  %v2435_v29 = vrot.slane %v7238_v15, 1 }
 0x128   : > { %1950 = vst.msk [vmem:[#allocation2 + $0x88] sm:$0xff] %vm1893_vm2, %v1914_v34  ;;  %v870_v59 = vadd.f32 %v6952_v44, %v869_v54  ;;  %v6365_v60 = vpop.f32.mrb[34].mxu0  ;;  %v2087_v34 = vshrl.u32 %v1981_v16, 16  ;;  %v2093_v49 = vrot.slane %v2091_v35, 1 }
 0x129   : > { %2501 = vrot.lane.b32.xlu0 %v2428_v63, %s6792_s18  ;;  %1951 = vst.msk [vmem:[#allocation2 + $0x90] sm:$0xff] %vm1893_vm2, %v1915_v33  ;;  %v1062_v61 = vmax.f32 %v878_v52, 0.0  ;;  %v872_v63 = vpop.f32.mrb[35].mxu0  ;;  %v2085_v24 = vrot.slane %v2083_v21, 1  ;;  %v2436_v46 = vsel %vm2417_vm3, %v2433_v17, %v2435_v29 }
 0x12a   : > { %2580 = vrot.lane.b32.xlu1 %v7160_v18, %s6791_s17  ;;  %v1060_v1 = vmax.f32 %v870_v59, 0.0  ;;  %v873_v23 = vadd.f32 %v6952_v44, %v872_v63  ;;  %v1137_v18 = vadd.s32 288, %v6947_v43  ;;  %v7272_v52 = vpop.permute.xlu1 %2493  ;;  %v1983_v63 = vld [vmem:[#allocation2 + $0x58] sm:$0xff] }
 0x12b   : > { %v1855_v25 = vmul.f32 %v1783_v0, %v1062_v61  ;;  %v2086_v26 = vsel %vm2018_vm4, %v2081_v22, %v2085_v24  ;;  %v2089_v6 = vor.u32 %v2087_v34, %v2085_v24  ;;  %v7282_v61 = vld [vmem:[#allocation2 + $0x60] sm:$0xff]  ;;  %v2099_v5 = vshll.u32 %v1983_v63, 16 }
 0x12c   : > { %v1853_v8 = vmul.f32 %v1781_v2, %v1060_v1  ;;  %v1061_v11 = vmax.f32 %v873_v23, 0.0  ;;  %v1209_v33 = vand.u32 31, %v1137_v18  ;;  %v2437_v2 = vrot.slane %v1983_v63, 1 }
 0x12d   : > { %2662 = vrot.lane.b32.xlu0 %v2054_v40, %s6797_s24  ;;  %v2094_v58 = vsel %vm2018_vm4, %v2089_v6, %v2093_v49  ;;  %v2439_v22 = vrot.slane %v7282_v61, 1  ;;  %v2103_v24 = vshrl.u32 %v1983_v63, 16  ;;  %v1972_v6 = vld [vmem:[#allocation2] sm:$0x80] }
 0x12e   : > { %2991 = vrot.lane.b32.xlu1 %v2430_v41, %s6798_s25  ;;  %v1916_v12 = vpack.c.bf16 %v1061_v11, %v1853_v8  ;;  %v6368_v30 = vpop.f32.mrb[36].mxu0  ;;  %vm1497_vm12 = vcmp.ge.s32.totalorder %v1209_v33, 1 }
 0x12f   : > { %v894_v37 = vadd.f32 %v6368_v30, %v6952_v44  ;;  %v885_v38 = vpop.f32.mrb[37].mxu0  ;;  %v1785_v42 = vsel %vm1497_vm12, 1.0, %v6794_v10  ;;  %vm3677_vm12 = vsmask.f32 256 }
 0x130   : > { %1952 = vst.msk [vmem:[#allocation2 + $0x98] sm:$0xff] %vm1893_vm2, %v1916_v12  ;;  %v886_v39 = vadd.f32 %v6952_v44, %v885_v38 }
 0x131   : > { %2314 = vrot.lane.b32.xlu0 %v2054_v40, %s6793_s19  ;;  %v1066_v40 = vmax.f32 %v894_v37, 0.0 }
 0x132   : > { %2747 = vrot.lane.b32.xlu1 %v2430_v41, %s6796_s23  ;;  %v1064_v9 = vmax.f32 %v886_v39, 0.0 }
 0x134   : > { %v1857_v53 = vmul.f32 %v1785_v42, %v1064_v9 }
 0x135   : > { %2664 = vrot.lane.b32.xlu0 %v7136_v62, %s6797_s24  ;;  %v881_v62 = vadd.f32 %v6365_v60, %v6952_v44  ;;  %v7279_v60 = vpop.permute.xlu0 %2308 }
 0x136   : > { %2503 = vrot.lane.b32.xlu1 %v2430_v41, %s6792_s18  ;;  %v6369_v41 = vpop.f32.mrb[38].mxu0 }
 0x137   : > { %v1063_v4 = vmax.f32 %v881_v62, 0.0  ;;  %v897_v45 = vadd.f32 %v6369_v41, %v6952_v44  ;;  %v888_v36 = vpop.f32.mrb[39].mxu0  ;;  %v7285_v62 = vpop.permute.xlu1 %2306  ;;  %v2440_v41 = vsel %vm2417_vm3, %v2437_v2, %v2439_v22 }
 0x139   : > { %2822 = vrot.lane.b32.xlu0 %v7168_v27, %s6795_s22  ;;  %v1856_v32 = vmul.f32 0.0, %v1063_v4  ;;  %v1067_v51 = vmax.f32 %v897_v45, 0.0  ;;  %v2095_v4 = vshrl.u32 %v7238_v15, 16 }
 0x13a   : > { %2910 = vrot.lane.b32.xlu1 %v2070_v48, %s6799_s26 }
 0x13b   : > { %v1917_v13 = vpack.c.bf16 %v1856_v32, %v1855_v25  ;;  %v1860_v56 = vmul.f32 0.0, %v1067_v51  ;;  %v2438_v25 = vsel %vm2417_vm3, %v2435_v29, %v2437_v2  ;;  %v2097_v11 = vor.u32 %v2095_v4, %v2093_v49 }
 0x13c   : > { %v2101_v32 = vrot.slane %v2099_v5, 1 }
 0x13d   : > { %2578 = vrot.lane.b32.xlu0 %v7168_v27, %s6791_s17  ;;  %1953 = vst.msk [vmem:[#allocation2 + $0xa0] sm:$0xff] %vm1893_vm2, %v1917_v13  ;;  %v1139_v27 = vadd.s32 304, %v6947_v43 }
 0x13e   : > { %2666 = vrot.lane.b32.xlu1 %v2070_v48, %s6797_s24 }
 0x13f   : > { %v1211_v31 = vand.u32 31, %v1139_v27  ;;  %v6372_v27 = vpop.f32.mrb[40].mxu0 }
 0x140   : > { %v910_v18 = vadd.f32 %v6372_v27, %v6952_v44  ;;  %v901_v29 = vpop.f32.mrb[41].mxu0 }
 0x141   : > { %2993 = vrot.lane.b32.xlu0 %v2432_v3, %s6798_s25  ;;  %vm1643_vm11 = vcmp.le.s32.totalorder %v1211_v31, 16  ;;  %v902_v31 = vadd.f32 %v6952_v44, %v901_v29  ;;  %v6373_v33 = vpop.f32.mrb[42].mxu0 }
 0x142   : > { %2318 = vrot.lane.b32.xlu1 %v2070_v48, %s6793_s19  ;;  %v1787_v55 = vsel %vm1643_vm11, 1.0, %v6794_v10  ;;  %v889_v48 = vadd.f32 %v6952_v44, %v888_v36  ;;  %v1070_v37 = vmax.f32 %v910_v18, 0.0  ;;  %v913_v39 = vadd.f32 %v6373_v33, %v6952_v44  ;;  %v904_v45 = vpop.f32.mrb[43].mxu0 }
 0x143   : > { %v1859_v50 = vmul.f32 %v1787_v55, %v1066_v40  ;;  %v2105_v40 = vor.u32 %v2103_v24, %v2101_v32  ;;  %v1068_v42 = vmax.f32 %v902_v31, 0.0  ;;  %v905_v9 = vadd.f32 %v6952_v44, %v904_v45 }
 0x144   : > { %v1065_v54 = vmax.f32 %v889_v48, 0.0  ;;  %vm3586_vm11 = vcmask 523264  }
 0x145   : > { %2749 = vrot.lane.b32.xlu0 %v2432_v3, %s6796_s23  ;;  %v1919_v59 = vpack.c.bf16 %v1860_v56, %v1859_v50 }
 0x146   : > { %2320 = vrot.lane.b32.xlu1 %v2078_v14, %s6793_s19  ;;  %v1918_v57 = vpack.c.bf16 %v1065_v54, %v1857_v53  ;;  %v1069_v53 = vmax.f32 %v905_v9, 0.0  ;;  %v6707_v54 = vld [vmem:[#allocation2 + $0x8] sm:$0xff]  ;;  %v6376_v9 = vpop.f32.mrb[44].mxu0 }
 0x147   : > { %1955 = vst.msk [vmem:[#allocation2 + $0xb0] sm:$0xff] %vm1893_vm2, %v1919_v59  ;;  %v3065_v56 = vsel %vm1893_vm2, %v6707_v54, %v7279_v60  ;;  %v3063_v59 = vsel %vm1893_vm2, %v1972_v6, %v7285_v62 }
 0x148   : > { %1954 = vst.msk [vmem:[#allocation2 + $0xa8] sm:$0xff] %vm1893_vm2, %v1918_v57  ;;  %v3140_v2 = vsel %vm3136_vm15, %v3065_v56, %v7272_v52  ;;  %v3138_v62 = vsel %vm3136_vm15, %v3063_v59, %v7269_v47  ;;  %v7373_v52 = vld [vmem:[#allocation2 + $0x68] sm:$0xff] }
 0x149   : > { %2505 = vrot.lane.b32.xlu0 %v2432_v3, %s6792_s18  ;;  %v2441_v47 = vrot.slane %v7373_v52, 1 }
 0x14a   : > { %2828 = vrot.lane.b32.xlu1 %v7238_v15, %s6795_s22 }
 0x14b   : > { %v2442_v24 = vsel %vm2417_vm3, %v2439_v22, %v2441_v47 }
 0x14d   : > { %2912 = vrot.lane.b32.xlu0 %v2078_v14, %s6799_s26 }
 0x14e   : > { %2584 = vrot.lane.b32.xlu1 %v7238_v15, %s6791_s17  ;;  %v1143_v15 = vadd.s32 336, %v6947_v43 }
 0x150   : > { %v1215_v20 = vand.u32 31, %v1143_v15 }
 0x151   : > { %2668 = vrot.lane.b32.xlu0 %v2078_v14, %s6797_s24  ;;  %v2102_v14 = vsel %vm2018_vm4, %v2097_v11, %v2101_v32 }
 0x152   : > { %2751 = vrot.lane.b32.xlu1 %v2434_v19, %s6796_s23  ;;  %vm1647_vm13 = vcmp.le.s32.totalorder %v1215_v20, 16 }
 0x153   : > { %v1791_v30 = vsel %vm1647_vm13, 1.0, %v6794_v10  ;;  %vm3960_vm13 = vcmask 588800  }
 0x154   : > { %v1863_v36 = vmul.f32 %v1791_v30, %v1070_v37  ;;  %v1147_v37 = vadd.s32 368, %v6947_v43 }
 0x155   : > { %2826 = vrot.lane.b32.xlu0 %v1981_v16, %s6795_s22 }
 0x156   : > { %2507 = vrot.lane.b32.xlu1 %v2434_v19, %s6792_s18 }
 0x159   : > { %2582 = vrot.lane.b32.xlu0 %v1981_v16, %s6791_s17  ;;  %v1141_v16 = vadd.s32 320, %v6947_v43 }
 0x15a   : > { %2914 = vrot.lane.b32.xlu1 %v2086_v26, %s6799_s26 }
 0x15b   : > { %v1213_v21 = vand.u32 31, %v1141_v16 }
 0x15d   : > { %2995 = vrot.lane.b32.xlu0 %v2434_v19, %s6798_s25  ;;  %vm1501_vm14 = vcmp.ge.s32.totalorder %v1213_v21, 1 }
 0x15e   : > { %2670 = vrot.lane.b32.xlu1 %v2086_v26, %s6797_s24  ;;  %v1789_v38 = vsel %vm1501_vm14, 1.0, %v6794_v10 }
 0x15f   : > { %v1861_v48 = vmul.f32 %v1789_v38, %v1068_v42  ;;  %v1145_v38 = vadd.s32 352, %v6947_v43 }
 0x161   : > { %2997 = vrot.lane.b32.xlu0 %v2436_v46, %s6798_s25  ;;  %v1920_v44 = vpack.c.bf16 %v1069_v53, %v1861_v48  ;;  %v1217_v42 = vand.u32 31, %v1145_v38  ;;  %v7428_v48 = vld [vmem:[%s9670_s2] ss:$0 sm:$0xff] }
 0x162   : > { %2322 = vrot.lane.b32.xlu1 %v2086_v26, %s6793_s19  ;;  %v2107_v26 = vshll.u32 %v7282_v61, 16  ;;  %v926_v6 = vadd.f32 %v7428_v48, %v6376_v9 }
 0x163   : > { %1956 = vst.msk [vmem:[#allocation2 + $0xb8] sm:$0xff] %vm1893_vm2, %v1920_v44  ;;  %vm1505_vm1 = vcmp.ge.s32.totalorder %v1217_v42, 1 }
 0x164   : > { %v7340_v55 = vrot.slane %v2107_v26, 1  ;;  %v2115_v26 = vshll.u32 %v7373_v52, 16  ;;  %v1074_v44 = vmax.f32 %v926_v6, 0.0  ;;  %v1793_v59 = vsel %vm1505_vm1, 1.0, %v6794_v10 }
 0x165   : > { %2753 = vrot.lane.b32.xlu0 %v2436_v46, %s6796_s23 }
 0x166   : > { %2324 = vrot.lane.b32.xlu1 %v2094_v58, %s6793_s19  ;;  %v2110_v57 = vsel %vm2018_vm4, %v2105_v40, %v7340_v55  ;;  %v2117_v31 = vrot.slane %v2115_v26, 1 }
 0x169   : > { %2509 = vrot.lane.b32.xlu0 %v2436_v46, %s6792_s18  ;;  %v1071_v46 = vmax.f32 %v913_v39, 0.0 }
 0x16a   : > { %2832 = vrot.lane.b32.xlu1 %v7282_v61, %s6795_s22 }
 0x16b   : > { %v7290_v0 = vpop.permute.xlu0 %2816  ;;  %v1864_v51 = vmul.f32 0.0, %v1071_v46 }
 0x16c   : > { %v7292_v1 = vpop.permute.xlu1 %2572 }
 0x16d   : > { %2916 = vrot.lane.b32.xlu0 %v2094_v58, %s6799_s26 }
 0x16e   : > { %2588 = vrot.lane.b32.xlu1 %v7282_v61, %s6791_s17 }
 0x16f   : > { %v7299_v3 = vpop.permute.xlu0 %2495 }
 0x170   : > { %v7297_v23 = vpop.permute.xlu1 %2570 }
 0x171   : > { %2672 = vrot.lane.b32.xlu0 %v2094_v58, %s6797_s24  ;;  %v1921_v58 = vpack.c.bf16 %v1864_v51, %v1863_v36  ;;  %v3215_v4 = vsel %vm3211_vm5, %v3140_v2, %v7297_v23  ;;  %v3213_v23 = vsel %vm3211_vm5, %v3138_v62, %v7257_v28  ;;  %v2119_v62 = vshrl.u32 %v7373_v52, 16 }
 0x172   : > { %2755 = vrot.lane.b32.xlu1 %v2438_v25, %s6796_s23 }
 0x173   : > { %v7307_v8 = vpop.permute.xlu0 %2658  ;;  %1957 = vst.msk [vmem:[#allocation2 + $0xc0] sm:$0xff] %vm1893_vm2, %v1921_v58 }
 0x174   : > { %v7305_v7 = vpop.permute.xlu1 %2739  ;;  %v3288_v15 = vsel %vm3286_vm6, %v3213_v23, %v7307_v8 }
 0x175   : > { %2830 = vrot.lane.b32.xlu0 %v1983_v63, %s6795_s22  ;;  %v3363_v21 = vsel %vm3361_vm7, %v3288_v15, %v7305_v7 }
 0x176   : > { %2511 = vrot.lane.b32.xlu1 %v2438_v25, %s6792_s18  ;;  %v3438_v7 = vsel %vm3436_vm10, %v3363_v21, %v7290_v0 }
 0x177   : > { %v7313_v13 = vpop.permute.xlu0 %2310 }
 0x178   : > { %v7311_v12 = vpop.permute.xlu1 %2741 }
 0x179   : > { %2586 = vrot.lane.b32.xlu0 %v1983_v63, %s6791_s17  ;;  %v7355_v63 = vld [vmem:[#allocation2 + $0x70] sm:$0xff] }
 0x17a   : > { %2918 = vrot.lane.b32.xlu1 %v2102_v14, %s6799_s26 }
 0x17b   : > { %v7322_v19 = vpop.permute.xlu0 %2818 }
 0x17c   : > { %v7320_v17 = vpop.permute.xlu1 %2497 }
 0x17d   : > { %2999 = vrot.lane.b32.xlu0 %v2438_v25, %s6798_s25 }
 0x17e   : > { %2674 = vrot.lane.b32.xlu1 %v2102_v14, %s6797_s24 }
 0x17f   : > { %v7333_v35 = vpop.permute.xlu0 %2574 }
 0x180   : > { %v7331_v34 = vpop.permute.xlu1 %2312 }
 0x181   : > { %3001 = vrot.lane.b32.xlu0 %v2440_v41, %s6798_s25 }
 0x182   : > { %2326 = vrot.lane.b32.xlu1 %v2102_v14, %s6793_s19 }
 0x183   : > { %v2661_v50 = vpop.permute.xlu0 %2660 }
 0x184   : > { %v7345_v49 = vpop.permute.xlu1 %2576  ;;  %v3290_v5 = vsel %vm3286_vm6, %v3215_v4, %v2661_v50  ;;  %v917_v50 = vpop.f32.mrb[45].mxu0  ;;  %v2443_v4 = vrot.slane %v7355_v63, 1 }
 0x185   : > { %2757 = vrot.lane.b32.xlu0 %v2440_v41, %s6796_s23  ;;  %v3365_v14 = vsel %vm3361_vm7, %v3290_v5, %v7311_v12  ;;  %v2111_v12 = vshrl.u32 %v7282_v61, 16  ;;  %v918_v54 = vadd.f32 %v7428_v48, %v917_v50  ;;  %v6377_v56 = vpop.f32.mrb[46].mxu0  ;;  %v2123_v5 = vshll.u32 %v7355_v63, 16 }
 0x186   : > { %2328 = vrot.lane.b32.xlu1 %v2110_v57, %s6793_s19  ;;  %v3440_v28 = vsel %vm3436_vm10, %v3365_v14, %v7322_v19  ;;  %v929_v2 = vadd.f32 %v7428_v48, %v6377_v56  ;;  %v920_v23 = vpop.f32.mrb[47].mxu0  ;;  %v6709_v14 = vld [vmem:[#allocation2 + $0x10] sm:$0xff] }
 0x187   : > { %v7361_v25 = vpop.permute.xlu0 %2820  ;;  %v2113_v22 = vor.u32 %v2111_v12, %v7340_v55  ;;  %v1219_v55 = vand.u32 31, %v1147_v37  ;;  %v3067_v15 = vsel %vm1893_vm2, %v6709_v14, %v7313_v13  ;;  %v2444_v13 = vsel %vm2417_vm3, %v2441_v47, %v2443_v4 }
 0x188   : > { %v7359_v60 = vpop.permute.xlu1 %2743  ;;  %v1149_v37 = vadd.s32 384, %v6947_v43 }
 0x189   : > { %2513 = vrot.lane.b32.xlu0 %v2440_v41, %s6792_s18  ;;  %v2118_v46 = vsel %vm2018_vm4, %v2113_v22, %v2117_v31  ;;  %vm1651_vm14 = vcmp.le.s32.totalorder %v1219_v55, 16  ;;  %v6380_v55 = vpop.f32.mrb[48].mxu0 }
 0x18a   : > { %2836 = vrot.lane.b32.xlu1 %v7355_v63, %s6795_s22  ;;  %v1795_v53 = vsel %vm1651_vm14, 1.0, %v6794_v10  ;;  %v933_v9 = vpop.f32.mrb[49].mxu0 }
 0x18b   : > { %v2988_v32 = vpop.permute.xlu0 %2987  ;;  %v934_v6 = vadd.f32 %v7428_v48, %v933_v9  ;;  %v6381_v50 = vpop.f32.mrb[50].mxu0 }
 0x18c   : > { %v7375_v11 = vpop.permute.xlu1 %2499 }
 0x18d   : > { %2920 = vrot.lane.b32.xlu0 %v2110_v57, %s6799_s26 }
 0x18e   : > { %2592 = vrot.lane.b32.xlu1 %v7355_v63, %s6791_s17 }
 0x18f   : > { %v2990_v20 = vpop.permute.xlu0 %2989 }
 0x190   : > { %v2909_v16 = vpop.permute.xlu1 %2908 }
 0x191   : > { %v3515_v8 = vsel %vm3511_vm9, %v3440_v28, %v2909_v16  ;;  %2676 = vrot.lane.b32.xlu0 %v2110_v57, %s6797_s24  ;;  %v1867_v16 = vmul.f32 %v1795_v53, %v1074_v44  ;;  %v1075_v28 = vmax.f32 %v929_v2, 0.0 }
 0x192   : > { %v3590_v27 = vsel %vm3586_vm11, %v3515_v8, %v2990_v20  ;;  %2759 = vrot.lane.b32.xlu1 %v2442_v24, %s6796_s23  ;;  %v921_v20 = vadd.f32 %v7428_v48, %v920_v23 }
 0x193   : > { %v3681_v19 = vshrl.u32 %v3590_v27, 16  ;;  %v2907_v29 = vpop.permute.xlu0 %2906  ;;  %v3684_v0 = vshll.u32 %v3590_v27, 16  ;;  %v1868_v26 = vmul.f32 0.0, %v1075_v28 }
 0x194   : > { %v7402_v18 = vpop.permute.xlu1 %2316  ;;  %v3513_v61 = vsel %vm3511_vm9, %v3438_v7, %v2907_v29  ;;  %v1073_v27 = vmax.f32 %v921_v20, 0.0  ;;  %v2121_v7 = vor.u32 %v2119_v62, %v2117_v31  ;;  %v7473_v31 = vld [vmem:[#allocation2 + $0x80] sm:$0xff] }
 0x195   : > { %v7406_v30 = vrot.slane %v3681_v19, 7  ;;  %v3588_v33 = vsel %vm3586_vm11, %v3513_v61, %v2988_v32  ;;  %2834 = vrot.lane.b32.xlu0 %v7373_v52, %s6795_s22  ;;  %v1072_v32 = vmax.f32 %v918_v54, 0.0  ;;  %v3142_v19 = vsel %vm3136_vm15, %v3067_v15, %v7299_v3 }
 0x196   : > { %2515 = vrot.lane.b32.xlu1 %v2442_v24, %s6792_s18  ;;  %v3678_v39 = vshrl.u32 %v3588_v33, 16  ;;  %v1923_v29 = vpack.c.bf16 %v1868_v26, %v1867_v16  ;;  %v3217_v22 = vsel %vm3211_vm5, %v3142_v19, %v7292_v1  ;;  %v1151_v1 = vadd.s32 400, %v6947_v43 }
 0x197   : > { %v7418_v40 = vpop.permute.xlu0 %2745  ;;  %v3686_v45 = vor.u32 %v3684_v0, %v7406_v30  ;;  %v1865_v12 = vmul.f32 %v1793_v59, %v1072_v32  ;;  %v945_v59 = vadd.f32 %v7428_v48, %v6381_v50  ;;  %v2447_v9 = vrot.slane %v7473_v31, 1 }
 0x198   : > { %v7416_v41 = vpop.permute.xlu1 %2824  ;;  %v3680_v36 = vrot.slane %v3678_v39, 7  ;;  %1959 = vst.msk [vmem:[#allocation2 + $0xd0] sm:$0xff] %vm1893_vm2, %v1923_v29  ;;  %v1223_v42 = vand.u32 31, %v1151_v1 }
 0x199   : > { %2590 = vrot.lane.b32.xlu0 %v7373_v52, %s6791_s17  ;;  %v1922_v61 = vpack.c.bf16 %v1073_v27, %v1865_v12  ;;  %v1079_v14 = vmax.f32 %v945_v59, 0.0 }
 0x19a   : > { %2922 = vrot.lane.b32.xlu1 %v2118_v46, %s6799_s26  ;;  %v3687_v51 = vsel %vm3677_vm12, %v3680_v36, %v3686_v45  ;;  %v1221_v45 = vand.u32 31, %v1149_v37  ;;  %v7486_v36 = vld [vmem:[#allocation2 + $0x78] sm:$0xff]  ;;  %vm1655_vm1 = vcmp.le.s32.totalorder %v1223_v42, 16 }
 0x19b   : > { %6412 = vmatprep.mubr.msk.bf16.mxu0 %vm3960_vm13, %v3687_v51  ;;  %v7437_v58 = vpop.permute.xlu0 %2501  ;;  %1958 = vst.msk [vmem:[#allocation2 + $0xc8] sm:$0xff] %vm1893_vm2, %v1922_v61  ;;  %v1799_v56 = vsel %vm1655_vm1, 1.0, %v6794_v10  ;;  %v2445_v62 = vrot.slane %v7486_v36, 1  ;;  %v1872_v26 = vmul.f32 0.0, %v1079_v14 }
 0x19c   : > { %v7434_v57 = vpop.permute.xlu1 %2580  ;;  %vm1509_vm14 = vcmp.ge.s32.totalorder %v1221_v45, 1 }
 0x19d   : > { %3003 = vrot.lane.b32.xlu0 %v2442_v24, %s6798_s25  ;;  %v7456_v24 = vrot.slane %v2123_v5, 1  ;;  %v1797_v44 = vsel %vm1509_vm14, 1.0, %v6794_v10  ;;  %v1076_v5 = vmax.f32 %v934_v6, 0.0  ;;  %v2139_v6 = vshll.u32 %v7473_v31, 16 }
 0x19e   : > { %2678 = vrot.lane.b32.xlu1 %v2118_v46, %s6797_s24 }
 0x19f   : > { %v2663_v8 = vpop.permute.xlu0 %2662  ;;  %v2126_v47 = vsel %vm2018_vm4, %v2121_v7, %v7456_v24  ;;  %v1869_v28 = vmul.f32 %v1797_v44, %v1076_v5  ;;  %v2131_v7 = vshll.u32 %v7486_v36, 16 }
 0x1a0   : > { %v2992_v21 = vpop.permute.xlu1 %2991  ;;  %v3292_v52 = vsel %vm3286_vm6, %v3217_v22, %v2663_v8  ;;  %v2127_v8 = vshrl.u32 %v7355_v63, 16  ;;  %v6710_v63 = vld [vmem:[#allocation2 + $0x18] sm:$0xff] }
 0x1a1   : > { %3005 = vrot.lane.b32.xlu0 %v2444_v13, %s6798_s25  ;;  %v3367_v38 = vsel %vm3361_vm7, %v3292_v52, %v7359_v60 }
 0x1a2   : > { %2330 = vrot.lane.b32.xlu1 %v2118_v46, %s6793_s19  ;;  %v942_v46 = vadd.f32 %v7428_v48, %v6380_v55  ;;  %v3442_v60 = vsel %vm3436_vm10, %v3367_v38, %v7361_v25  ;;  %v936_v25 = vpop.f32.mrb[51].mxu0  ;;  %v2133_v38 = vrot.slane %v2131_v7, 1 }
 0x1a3   : > { %v7464_v3 = vpop.permute.xlu0 %2314  ;;  %v937_v15 = vadd.f32 %v7428_v48, %v936_v25 }
 0x1a4   : > { %v7462_v33 = vpop.permute.xlu1 %2747  ;;  %v1078_v54 = vmax.f32 %v942_v46, 0.0 }
 0x1a5   : > { %2761 = vrot.lane.b32.xlu0 %v2444_v13, %s6796_s23  ;;  %v1077_v27 = vmax.f32 %v937_v15, 0.0  ;;  %v7582_v15 = vld [vmem:[#allocation2 + $0x90] sm:$0xff] }
 0x1a6   : > { %2332 = vrot.lane.b32.xlu1 %v2126_v47, %s6793_s19  ;;  %v1871_v23 = vmul.f32 %v1799_v56, %v1078_v54  ;;  %v2448_v54 = vsel %vm2417_vm3, %v2445_v62, %v2447_v9  ;;  %v6711_v56 = vld [vmem:[#allocation2 + $0x20] sm:$0xff] }
 0x1a7   : > { %v7481_v39 = vpop.permute.xlu0 %2664  ;;  %v1924_v61 = vpack.c.bf16 %v1077_v27, %v1869_v28  ;;  %v1155_v28 = vadd.s32 432, %v6947_v43 }
 0x1a8   : > { %v7479_v0 = vpop.permute.xlu1 %2503  ;;  %v1925_v29 = vpack.c.bf16 %v1872_v26, %v1871_v23 }
 0x1a9   : > { %2517 = vrot.lane.b32.xlu0 %v2444_v13, %s6792_s18  ;;  %v2446_v13 = vsel %vm2417_vm3, %v2443_v4, %v2445_v62  ;;  %1960 = vst.msk [vmem:[#allocation2 + $0xd8] sm:$0xff] %vm1893_vm2, %v1924_v61  ;;  %v3069_v4 = vsel %vm1893_vm2, %v6710_v63, %v7331_v34  ;;  %v1227_v7 = vand.u32 31, %v1155_v28 }
 0x1aa   : > { %2840 = vrot.lane.b32.xlu1 %v7473_v31, %s6795_s22  ;;  %1961 = vst.msk [vmem:[#allocation2 + $0xe0] sm:$0xff] %vm1893_vm2, %v1925_v29  ;;  %v3144_v55 = vsel %vm3136_vm15, %v3069_v4, %v7320_v17 }
 0x1ab   : > { %v2823_v53 = vpop.permute.xlu0 %2822  ;;  %vm1659_vm1 = vcmp.le.s32.totalorder %v1227_v7, 16  ;;  %v6712_v7 = vld [vmem:[#allocation2 + $0x28] sm:$0xff] }
 0x1ac   : > { %v2911_v51 = vpop.permute.xlu1 %2910 }
 0x1ad   : > { %v3517_v2 = vsel %vm3511_vm9, %v3442_v60, %v2911_v51  ;;  %2924 = vrot.lane.b32.xlu0 %v2126_v47, %s6799_s26  ;;  %v2135_v60 = vshrl.u32 %v7486_v36, 16 }
 0x1ae   : > { %v3592_v32 = vsel %vm3586_vm11, %v3517_v2, %v2992_v21  ;;  %2596 = vrot.lane.b32.xlu1 %v7473_v31, %s6791_s17  ;;  %v7563_v2 = vrot.slane %v2139_v6, 1 }
 0x1af   : > { %v3688_v16 = vshrl.u32 %v3592_v32, 16  ;;  %v7504_v12 = vpop.permute.xlu0 %2578  ;;  %v3691_v19 = vshll.u32 %v3592_v32, 16  ;;  %v2137_v59 = vor.u32 %v2135_v60, %v2133_v38 }
 0x1b0   : > { %v7502_v20 = vpop.permute.xlu1 %2666 }
 0x1b1   : > { %v7507_v21 = vrot.slane %v3688_v16, 7  ;;  %2680 = vrot.lane.b32.xlu0 %v2126_v47, %s6797_s24  ;;  %v2129_v47 = vor.u32 %v2127_v8, %v7456_v24  ;;  %v2142_v23 = vsel %vm2018_vm4, %v2137_v59, %v7563_v2  ;;  %v6384_v16 = vpop.f32.mrb[52].mxu0  ;;  %v1153_v8 = vadd.s32 416, %v6947_v43 }
 0x1b2   : > { %2763 = vrot.lane.b32.xlu1 %v2446_v13, %s6796_s23  ;;  %v949_v29 = vpop.f32.mrb[53].mxu0  ;;  %v2143_v59 = vshrl.u32 %v7473_v31, 16 }
 0x1b3   : > { %v3693_v22 = vor.u32 %v3691_v19, %v7507_v21  ;;  %v2994_v1 = vpop.permute.xlu0 %2993  ;;  %v2134_v34 = vsel %vm2018_vm4, %v2129_v47, %v2133_v38  ;;  %v1225_v61 = vand.u32 31, %v1153_v8  ;;  %v6385_v63 = vpop.f32.mrb[54].mxu0 }
 0x1b4   : > { %v7516_v52 = vpop.permute.xlu1 %2318  ;;  %v2145_v31 = vor.u32 %v2143_v59, %v7563_v2  ;;  %v1157_v59 = vadd.s32 448, %v6947_v43 }
 0x1b5   : > { %v3694_v37 = vsel %vm3677_vm12, %v7406_v30, %v3693_v22  ;;  %2838 = vrot.lane.b32.xlu0 %v7486_v36, %s6795_s22  ;;  %v3219_v30 = vsel %vm3211_vm5, %v3144_v55, %v7333_v35  ;;  %v7599_v22 = vld [vmem:[#allocation2 + $0x88] sm:$0xff]  ;;  %vm1513_vm14 = vcmp.ge.s32.totalorder %v1225_v61, 1  ;;  %v1803_v55 = vsel %vm1659_vm1, 1.0, %v6794_v10 }
 0x1b6   : > { %2519 = vrot.lane.b32.xlu1 %v2446_v13, %s6792_s18  ;;  %6413 = vmatmul.mubr.msk.bf16.vlgmr.msra.gmra.mrb[72].mxu0 %vm3960_vm13, %v3694_v37  ;;  %v3294_v24 = vsel %vm3286_vm6, %v3219_v30, %v7481_v39  ;;  %v952_v37 = vpop.f32.mrb[55].mxu0  ;;  %v1801_v30 = vsel %vm1513_vm14, 1.0, %v6794_v10  ;;  %v2449_v60 = vrot.slane %v7599_v22, 1 }
 0x1b7   : > { %v7533_v45 = vpop.permute.xlu0 %2749  ;;  %v3369_v35 = vsel %vm3361_vm7, %v3294_v24, %v7418_v40  ;;  %v953_v24 = vadd.f32 %v7428_v48, %v952_v37 }
 0x1b8   : > { %v7531_v42 = vpop.permute.xlu1 %2320  ;;  %v3444_v50 = vsel %vm3436_vm10, %v3369_v35, %v2823_v53 }
 0x1b9   : > { %2594 = vrot.lane.b32.xlu0 %v7486_v36, %s6791_s17  ;;  %v3071_v36 = vsel %vm1893_vm2, %v6711_v56, %v7464_v3 }
 0x1ba   : > { %2926 = vrot.lane.b32.xlu1 %v2134_v34, %s6799_s26  ;;  %v3146_v5 = vsel %vm3136_vm15, %v3071_v36, %v7375_v11 }
 0x1bb   : > { %v7545_v17 = vpop.permute.xlu0 %2505  ;;  %v3221_v14 = vsel %vm3211_vm5, %v3146_v5, %v7345_v49  ;;  %v2450_v5 = vsel %vm2417_vm3, %v2447_v9, %v2449_v60 }
 0x1bc   : > { %v7543_v46 = vpop.permute.xlu1 %2828  ;;  %v3296_v26 = vsel %vm3286_vm6, %v3221_v14, %v7502_v20 }
 0x1bd   : > { %3007 = vrot.lane.b32.xlu0 %v2446_v13, %s6798_s25  ;;  %v958_v13 = vadd.f32 %v7428_v48, %v6384_v16  ;;  %v3371_v4 = vsel %vm3361_vm7, %v3296_v26, %v7462_v33 }
 0x1be   : > { %2682 = vrot.lane.b32.xlu1 %v2134_v34, %s6797_s24 }
 0x1bf   : > { %v2913_v51 = vpop.permute.xlu0 %2912  ;;  %v1082_v20 = vmax.f32 %v958_v13, 0.0 }
 0x1c0   : > { %v7555_v39 = vpop.permute.xlu1 %2584  ;;  %v3519_v44 = vsel %vm3511_vm9, %v3444_v50, %v2913_v51  ;;  %v1081_v50 = vmax.f32 %v953_v24, 0.0  ;;  %v3446_v51 = vsel %vm3436_vm10, %v3371_v4, %v7416_v41  ;;  %v2151_v4 = vshrl.u32 %v7599_v22, 16 }
 0x1c1   : > { %v3594_v40 = vsel %vm3586_vm11, %v3519_v44, %v2994_v1  ;;  %3009 = vrot.lane.b32.xlu0 %v2448_v54, %s6798_s25  ;;  %v950_v1 = vadd.f32 %v7428_v48, %v949_v29  ;;  %v1875_v33 = vmul.f32 %v1803_v55, %v1082_v20  ;;  %v3073_v29 = vsel %vm1893_vm2, %v6712_v7, %v7402_v18 }
 0x1c2   : > { %2334 = vrot.lane.b32.xlu1 %v2134_v34, %s6793_s19  ;;  %v3695_v53 = vshrl.u32 %v3594_v40, 16  ;;  %v3698_v32 = vshll.u32 %v3594_v40, 16  ;;  %v3148_v61 = vsel %vm3136_vm15, %v3073_v29, %v7437_v58  ;;  %v2155_v58 = vshll.u32 %v7582_v15, 16 }
 0x1c3   : > { %v7572_v25 = vpop.permute.xlu0 %2668  ;;  %v1080_v34 = vmax.f32 %v950_v1, 0.0  ;;  %v3223_v20 = vsel %vm3211_vm5, %v3148_v61, %v7504_v12 }
 0x1c4   : > { %v7570_v62 = vpop.permute.xlu1 %2751  ;;  %v7574_v3 = vrot.slane %v3695_v53, 7  ;;  %v7676_v24 = vrot.slane %v2155_v58, 1 }
 0x1c5   : > { %2765 = vrot.lane.b32.xlu0 %v2448_v54, %s6796_s23  ;;  %v1873_v35 = vmul.f32 %v1801_v30, %v1080_v34 }
 0x1c6   : > { %2336 = vrot.lane.b32.xlu1 %v2142_v23, %s6793_s19  ;;  %v3700_v11 = vor.u32 %v3698_v32, %v7574_v3  ;;  %v2147_v32 = vshll.u32 %v7599_v22, 16 }
 0x1c7   : > { %v7591_v19 = vpop.permute.xlu0 %2826  ;;  %v1926_v40 = vpack.c.bf16 %v1081_v50, %v1873_v35 }
 0x1c8   : > { %v7589_v27 = vpop.permute.xlu1 %2507  ;;  %v3701_v49 = vsel %vm3677_vm12, %v7507_v21, %v3700_v11  ;;  %v961_v21 = vadd.f32 %v7428_v48, %v6385_v63  ;;  %v2149_v9 = vrot.slane %v2147_v32, 1  ;;  %v2451_v63 = vrot.slane %v7582_v15, 1 }
 0x1c9   : > { %2521 = vrot.lane.b32.xlu0 %v2448_v54, %s6792_s18  ;;  %6416 = vmatprep.mubr.msk.bf16.mxu1 %vm3960_vm13, %v3701_v49  ;;  %1962 = vst.msk [vmem:[#allocation2 + $0xe8] sm:$0xff] %vm1893_vm2, %v1926_v40 }
 0x1ca   : > { %2844 = vrot.lane.b32.xlu1 %v7582_v15, %s6795_s22  ;;  %v1083_v6 = vmax.f32 %v961_v21, 0.0  ;;  %v2150_v2 = vsel %vm2018_vm4, %v2145_v31, %v2149_v9  ;;  %v2153_v30 = vor.u32 %v2151_v4, %v2149_v9 }
 0x1cb   : > { %v7606_v38 = vpop.permute.xlu0 %2582 }
 0x1cc   : > { %v2915_v47 = vpop.permute.xlu1 %2914  ;;  %v1876_v54 = vmul.f32 0.0, %v1083_v6  ;;  %v2158_v50 = vsel %vm2018_vm4, %v2153_v30, %v7676_v24  ;;  %v2159_v30 = vshrl.u32 %v7582_v15, 16 }
 0x1cd   : > { %2928 = vrot.lane.b32.xlu0 %v2142_v23, %s6799_s26  ;;  %v3521_v56 = vsel %vm3511_vm9, %v3446_v51, %v2915_v47  ;;  %v2452_v47 = vsel %vm2417_vm3, %v2449_v60, %v2451_v63 }
 0x1ce   : > { %2600 = vrot.lane.b32.xlu1 %v7582_v15, %s6791_s17  ;;  %v1927_v14 = vpack.c.bf16 %v1876_v54, %v1875_v33 }
 0x1cf   : > { %v2996_v44 = vpop.permute.xlu0 %2995 }
 0x1d0   : > { %v7618_v36 = vpop.permute.xlu1 %2670  ;;  %v3596_v53 = vsel %vm3586_vm11, %v3521_v56, %v2996_v44  ;;  %1963 = vst.msk [vmem:[#allocation2 + $0xf0] sm:$0xff] %vm1893_vm2, %v1927_v14  ;;  %v6388_v56 = vpop.f32.mrb[56].mxu0  ;;  %v1159_v44 = vadd.s32 464, %v6947_v43 }
 0x1d1   : > { %v3702_v11 = vshrl.u32 %v3596_v53, 16  ;;  %2684 = vrot.lane.b32.xlu0 %v2142_v23, %s6797_s24  ;;  %v3705_v16 = vshll.u32 %v3596_v53, 16  ;;  %v974_v32 = vadd.f32 %v7428_v48, %v6388_v56 }
 0x1d2   : > { %2767 = vrot.lane.b32.xlu1 %v2450_v5, %s6796_s23  ;;  %v1231_v14 = vand.u32 31, %v1159_v44 }
 0x1d3   : > { %v3704_v41 = vrot.slane %v3702_v11, 7  ;;  %v2998_v8 = vpop.permute.xlu0 %2997  ;;  %v965_v11 = vpop.f32.mrb[57].mxu0  ;;  %v1086_v31 = vmax.f32 %v974_v32, 0.0 }
 0x1d4   : > { %v7630_v28 = vpop.permute.xlu1 %2322  ;;  %v6389_v9 = vpop.f32.mrb[58].mxu0  ;;  %vm1663_vm1 = vcmp.le.s32.totalorder %v1231_v14, 16  ;;  %v6714_v14 = vld [vmem:[#allocation2 + $0x38] sm:$0xff] }
 0x1d5   : > { %v3707_v26 = vor.u32 %v3705_v16, %v3704_v41  ;;  %2842 = vrot.lane.b32.xlu0 %v7599_v22, %s6795_s22  ;;  %v1229_v16 = vand.u32 31, %v1157_v59 }
 0x1d6   : > { %2523 = vrot.lane.b32.xlu1 %v2450_v5, %s6792_s18 }
 0x1d7   : > { %v7638_v23 = vpop.permute.xlu0 %2753  ;;  %v3708_v49 = vsel %vm3677_vm12, %v7574_v3, %v3707_v26  ;;  %v3298_v3 = vsel %vm3286_vm6, %v3223_v20, %v7572_v25  ;;  %vm1517_vm14 = vcmp.ge.s32.totalorder %v1229_v16, 1 }
 0x1d8   : > { %v7636_v13 = vpop.permute.xlu1 %2324  ;;  %6417 = vmatmul.mubr.msk.bf16.vlgmr.msra.gmra.mrb[0].mxu1 %vm3960_vm13, %v3708_v49  ;;  %v3373_v12 = vsel %vm3361_vm7, %v3298_v3, %v7533_v45  ;;  %v968_v49 = vpop.f32.mrb[59].mxu0  ;;  %v1805_v20 = vsel %vm1517_vm14, 1.0, %v6794_v10 }
 0x1d9   : > { %2598 = vrot.lane.b32.xlu0 %v7599_v22, %s6791_s17  ;;  %v3448_v25 = vsel %vm3436_vm10, %v3373_v12, %v7591_v19  ;;  %v6713_v22 = vld [vmem:[#allocation2 + $0x30] sm:$0xff]  ;;  %v969_v3 = vadd.f32 %v7428_v48, %v968_v49  ;;  %v1163_v49 = vadd.s32 496, %v6947_v43 }
 0x1da   : > { %2930 = vrot.lane.b32.xlu1 %v2150_v2, %s6799_s26  ;;  %v3075_v55 = vsel %vm1893_vm2, %v6713_v22, %v7516_v52 }
 0x1db   : > { %v7657_v18 = vpop.permute.xlu0 %2509  ;;  %v3150_v33 = vsel %vm3136_vm15, %v3075_v55, %v7479_v0  ;;  %v7696_v0 = vld [vmem:[#allocation2 + $0xa0] sm:$0xff] }
 0x1dc   : > { %v7655_v1 = vpop.permute.xlu1 %2832  ;;  %v3225_v51 = vsel %vm3211_vm5, %v3150_v33, %v7434_v57 }
 0x1dd   : > { %3011 = vrot.lane.b32.xlu0 %v2450_v5, %s6798_s25  ;;  %v3300_v40 = vsel %vm3286_vm6, %v3225_v51, %v7618_v36  ;;  %v966_v36 = vadd.f32 %v7428_v48, %v965_v11  ;;  %v3077_v11 = vsel %vm1893_vm2, %v6714_v14, %v7531_v42 }
 0x1de   : > { %2686 = vrot.lane.b32.xlu1 %v2150_v2, %s6797_s24  ;;  %v3375_v26 = vsel %vm3361_vm7, %v3300_v40, %v7570_v62  ;;  %v3152_v16 = vsel %vm3136_vm15, %v3077_v11, %v7545_v17 }
 0x1df   : > { %v2917_v37 = vpop.permute.xlu0 %2916  ;;  %v1084_v61 = vmax.f32 %v966_v36, 0.0  ;;  %v2171_v36 = vshll.u32 %v7696_v0, 16  ;;  %v3227_v42 = vsel %vm3211_vm5, %v3152_v16, %v7606_v38 }
 0x1e0   : > { %v7668_v21 = vpop.permute.xlu1 %2588  ;;  %v3523_v34 = vsel %vm3511_vm9, %v3448_v25, %v2917_v37  ;;  %v1085_v25 = vmax.f32 %v969_v3, 0.0  ;;  %v3450_v37 = vsel %vm3436_vm10, %v3375_v26, %v7543_v46  ;;  %v1235_v3 = vand.u32 31, %v1163_v49 }
 0x1e1   : > { %v3598_v45 = vsel %vm3586_vm11, %v3523_v34, %v2998_v8  ;;  %3013 = vrot.lane.b32.xlu0 %v2452_v47, %s6798_s25  ;;  %v7711_v8 = vld [vmem:[#allocation2 + $0x98] sm:$0xff]  ;;  %v1877_v12 = vmul.f32 %v1805_v20, %v1084_v61 }
 0x1e2   : > { %2338 = vrot.lane.b32.xlu1 %v2150_v2, %s6793_s19  ;;  %v3709_v19 = vshrl.u32 %v3598_v45, 16  ;;  %v3712_v35 = vshll.u32 %v3598_v45, 16  ;;  %v1807_v2 = vsel %vm1663_vm1, 1.0, %v6794_v10  ;;  %v2453_v4 = vrot.slane %v7711_v8, 1 }
 0x1e3   : > { %v7685_v6 = vpop.permute.xlu0 %2672  ;;  %v1879_v62 = vmul.f32 %v1807_v2, %v1086_v31  ;;  %v1928_v45 = vpack.c.bf16 %v1085_v25, %v1877_v12  ;;  %v2455_v31 = vrot.slane %v7696_v0, 1  ;;  %v6715_v25 = vld [vmem:[#allocation2 + $0x40] sm:$0xff]  ;;  %vm1667_vm1 = vcmp.le.s32.totalorder %v1235_v3, 16 }
 0x1e4   : > { %v7683_v60 = vpop.permute.xlu1 %2755  ;;  %v7687_v52 = vrot.slane %v3709_v19, 7  ;;  %v2454_v33 = vsel %vm2417_vm3, %v2451_v63, %v2453_v4  ;;  %v2161_v63 = vor.u32 %v2159_v30, %v7676_v24 }
 0x1e5   : > { %2769 = vrot.lane.b32.xlu0 %v2452_v47, %s6796_s23  ;;  %1964 = vst.msk [vmem:[#allocation2 + $0xf8] sm:$0xff] %vm1893_vm2, %v1928_v45  ;;  %v7784_v38 = vsel %vm2417_vm3, %v2453_v4, %v2455_v31 }
 0x1e6   : > { %2340 = vrot.lane.b32.xlu1 %v2158_v50, %s6793_s19  ;;  %v3714_v54 = vor.u32 %v3712_v35, %v7687_v52  ;;  %v2163_v35 = vshll.u32 %v7711_v8, 16 }
 0x1e7   : > { %v7704_v5 = vpop.permute.xlu0 %2830 }
 0x1e8   : > { %v7702_v53 = vpop.permute.xlu1 %2511  ;;  %v3715_v57 = vsel %vm3677_vm12, %v3704_v41, %v3714_v54  ;;  %v977_v41 = vadd.f32 %v7428_v48, %v6389_v9  ;;  %v2165_v59 = vrot.slane %v2163_v35, 1  ;;  %v3302_v9 = vsel %vm3286_vm6, %v3227_v42, %v7685_v6 }
 0x1e9   : > { %2525 = vrot.lane.b32.xlu0 %v2452_v47, %s6792_s18  ;;  %6420 = vmatprep.mubr.msk.bf16.mxu1 %vm3960_vm13, %v3715_v57  ;;  %v7786_v6 = vrot.slane %v2171_v36, 1  ;;  %v3377_v20 = vsel %vm3361_vm7, %v3302_v9, %v7638_v23 }
 0x1ea   : > { %2848 = vrot.lane.b32.xlu1 %v7696_v0, %s6795_s22  ;;  %v1087_v58 = vmax.f32 %v977_v41, 0.0  ;;  %v2166_v24 = vsel %vm2018_vm4, %v2161_v63, %v2165_v59  ;;  %v6392_v41 = vpop.f32.mrb[60].mxu0  ;;  %v3452_v4 = vsel %vm3436_vm10, %v3377_v20, %v7704_v5 }
 0x1eb   : > { %v7718_v29 = vpop.permute.xlu0 %2586  ;;  %v990_v2 = vadd.f32 %v7428_v48, %v6392_v41  ;;  %v981_v61 = vpop.f32.mrb[61].mxu0  ;;  %v7826_v41 = vld [vmem:[#allocation2 + $0xb0] sm:$0xff] }
 0x1ec   : > { %v2919_v7 = vpop.permute.xlu1 %2918  ;;  %v1880_v47 = vmul.f32 0.0, %v1087_v58  ;;  %v6393_v12 = vpop.f32.mrb[62].mxu0 }
 0x1ed   : > { %2932 = vrot.lane.b32.xlu0 %v2158_v50, %s6799_s26  ;;  %v3525_v22 = vsel %vm3511_vm9, %v3450_v37, %v2919_v7  ;;  %v1161_v7 = vadd.s32 480, %v6947_v43  ;;  %v3079_v37 = vsel %vm1893_vm2, %v6715_v25, %v7630_v28  ;;  %v993_v30 = vadd.f32 %v7428_v48, %v6393_v12 }
 0x1ee   : > { %2604 = vrot.lane.b32.xlu1 %v7696_v0, %s6791_s17  ;;  %v1929_v51 = vpack.c.bf16 %v1880_v47, %v1879_v62  ;;  %v982_v62 = vadd.f32 %v7428_v48, %v981_v61  ;;  %v1811_v28 = vsel %vm1667_vm1, 1.0, %v6794_v10 }
 0x1ef   : > { %v3000_v34 = vpop.permute.xlu0 %2999  ;;  %v1233_v58 = vand.u32 31, %v1161_v7  ;;  %v1091_v35 = vmax.f32 %v993_v30, 0.0  ;;  %v1167_v7 = vadd.s32 528, %v6947_v43 }
 0x1f0   : > { %v7730_v55 = vpop.permute.xlu1 %2674  ;;  %v3600_v19 = vsel %vm3586_vm11, %v3525_v22, %v3000_v34  ;;  %1965 = vst.msk [vmem:[#allocation2 + $0x100] sm:$0xff] %vm1893_vm2, %v1929_v51  ;;  %v1090_v34 = vmax.f32 %v990_v2, 0.0  ;;  %v1088_v45 = vmax.f32 %v982_v62, 0.0  ;;  %v3154_v51 = vsel %vm3136_vm15, %v3079_v37, %v7589_v27 }
 0x1f1   : > { %v3716_v54 = vshrl.u32 %v3600_v19, 16  ;;  %2688 = vrot.lane.b32.xlu0 %v2158_v50, %s6797_s24  ;;  %v3719_v56 = vshll.u32 %v3600_v19, 16  ;;  %vm1521_vm14 = vcmp.ge.s32.totalorder %v1233_v58, 1  ;;  %v984_v19 = vpop.f32.mrb[63].mxu0  ;;  %v3229_v27 = vsel %vm3211_vm5, %v3154_v51, %v7555_v39 }
 0x1f2   : > { %2771 = vrot.lane.b32.xlu1 %v2454_v33, %s6796_s23  ;;  %v1809_v5 = vsel %vm1521_vm14, 1.0, %v6794_v10  ;;  %v6396_v16 = vpop.f32.mrb[64].mxu0  ;;  %v3304_v2 = vsel %vm3286_vm6, %v3229_v27, %v7730_v55  ;;  %v1165_v62 = vadd.s32 512, %v6947_v43  ;;  %v1239_v37 = vand.u32 31, %v1167_v7  ;;  %v7846_v55 = vld [vmem:[#allocation2 + $0xa8] sm:$0xff] }
 0x1f3   : > { %v7742_v46 = vrot.slane %v3716_v54, 7  ;;  %v3002_v15 = vpop.permute.xlu0 %3001  ;;  %v997_v42 = vpop.f32.mrb[65].mxu0  ;;  %v1006_v49 = vadd.f32 %v7428_v48, %v6396_v16  ;;  %v2457_v51 = vrot.slane %v7846_v55, 1 }
 0x1f4   : > { %v7744_v44 = vpop.permute.xlu1 %2326  ;;  %v6397_v39 = vpop.f32.mrb[66].mxu0  ;;  %v1237_v43 = vand.u32 31, %v1165_v62  ;;  %vm1671_vm1 = vcmp.le.s32.totalorder %v1239_v37, 16 }
 0x1f5   : > { %v3721_v40 = vor.u32 %v3719_v56, %v7742_v46  ;;  %2846 = vrot.lane.b32.xlu0 %v7711_v8, %s6795_s22  ;;  %v1883_v56 = vmul.f32 %v1811_v28, %v1090_v34  ;;  %v1009_v58 = vadd.f32 %v7428_v48, %v6397_v39  ;;  %v1094_v25 = vmax.f32 %v1006_v49, 0.0 }
 0x1f6   : > { %2527 = vrot.lane.b32.xlu1 %v2454_v33, %s6792_s18  ;;  %v1815_v28 = vsel %vm1671_vm1, 1.0, %v6794_v10  ;;  %vm1525_vm14 = vcmp.ge.s32.totalorder %v1237_v43, 1 }
 0x1f7   : > { %v7753_v32 = vpop.permute.xlu0 %2757  ;;  %v3722_v57 = vsel %vm3677_vm12, %v7687_v52, %v3721_v40  ;;  %v2167_v52 = vshrl.u32 %v7711_v8, 16  ;;  %v1884_v40 = vmul.f32 0.0, %v1091_v35  ;;  %v1095_v34 = vmax.f32 %v1009_v58, 0.0 }
 0x1f8   : > { %v7751_v50 = vpop.permute.xlu1 %2328  ;;  %6421 = vmatmul.mubr.msk.bf16.gmra.mrb[4].mxu1 %vm3960_vm13, %v3722_v57  ;;  %v985_v57 = vadd.f32 %v7428_v48, %v984_v19 }
 0x1f9   : > { %2602 = vrot.lane.b32.xlu0 %v7711_v8, %s6791_s17  ;;  %v2169_v8 = vor.u32 %v2167_v52, %v2165_v59  ;;  %v1931_v52 = vpack.c.bf16 %v1884_v40, %v1883_v56  ;;  %v1887_v56 = vmul.f32 %v1815_v28, %v1094_v25  ;;  %v4502_v25 = vld [vmem:[%s9673_s5] sm:$0xf]  ;;  %v6716_v28 = vld [vmem:[#allocation2 + $0x48] sm:$0xff] }
 0x1fa   : > { %2934 = vrot.lane.b32.xlu1 %v2166_v24, %s6799_s26  ;;  %v1089_v36 = vmax.f32 %v985_v57, 0.0  ;;  %6645 = vmatprep.subr.msk.bf16.mxu0 %vm4069_vm8, %v4502_v25 }
 0x1fb   : > { %v7775_v17 = vpop.permute.xlu0 %2513  ;;  %1967 = vst.msk [vmem:[#allocation2 + $0x110] sm:$0xff] %vm1893_vm2, %v1931_v52 }
 0x1fc   : > { %v7773_v26 = vpop.permute.xlu1 %2836 }
 0x1fd   : > { %3015 = vrot.lane.b32.xlu0 %v2454_v33, %s6798_s25 }
 0x1fe   : > { %2690 = vrot.lane.b32.xlu1 %v2166_v24, %s6797_s24 }
 0x1ff   : > { %v2921_v22 = vpop.permute.xlu0 %2920 }
 0x200   : > { %v7796_v47 = vpop.permute.xlu1 %2592  ;;  %v3527_v23 = vsel %vm3511_vm9, %v3452_v4, %v2921_v22  ;;  %v1000_v4 = vpop.f32.mrb[67].mxu0 }
 0x201   : > { %v3602_v33 = vsel %vm3586_vm11, %v3527_v23, %v3002_v15  ;;  %3017 = vrot.lane.b32.xlu0 %v7784_v38, %s6798_s25  ;;  %v1881_v15 = vmul.f32 %v1809_v5, %v1088_v45  ;;  %v1001_v30 = vadd.f32 %v7428_v48, %v1000_v4  ;;  %v6400_v23 = vpop.f32.mrb[68].mxu0  ;;  %v1888_v5 = vmul.f32 0.0, %v1095_v34 }
 0x202   : > { %2342 = vrot.lane.b32.xlu1 %v2166_v24, %s6793_s19  ;;  %v3723_v54 = vshrl.u32 %v3602_v33, 16  ;;  %v3726_v11 = vshll.u32 %v3602_v33, 16  ;;  %v7817_v24 = vsel %vm2018_vm4, %v2169_v8, %v7786_v6  ;;  %v998_v8 = vadd.f32 %v7428_v48, %v997_v42  ;;  %v1013_v19 = vpop.f32.mrb[69].mxu0 }
 0x203   : > { %v7810_v59 = vpop.permute.xlu0 %2676  ;;  %v1930_v3 = vpack.c.bf16 %v1089_v36, %v1881_v15  ;;  %v1022_v45 = vadd.f32 %v7428_v48, %v6400_v23  ;;  %v1093_v35 = vmax.f32 %v1001_v30, 0.0  ;;  %v6401_v15 = vpop.f32.mrb[70].mxu0  ;;  %v2179_v36 = vshll.u32 %v7846_v55, 16 }
 0x204   : > { %v7808_v63 = vpop.permute.xlu1 %2759  ;;  %v7813_v14 = vrot.slane %v3723_v54, 7  ;;  %v1092_v22 = vmax.f32 %v998_v8, 0.0  ;;  %v2175_v54 = vshrl.u32 %v7696_v0, 16  ;;  %v1025_v16 = vadd.f32 %v7428_v48, %v6401_v15  ;;  %v1016_v27 = vpop.f32.mrb[71].mxu0 }
 0x205   : > { %2773 = vrot.lane.b32.xlu0 %v7784_v38, %s6796_s23  ;;  %1966 = vst.msk [vmem:[#allocation2 + $0x108] sm:$0xff] %vm1893_vm2, %v1930_v3  ;;  %v1098_v57 = vmax.f32 %v1022_v45, 0.0  ;;  %v1017_v42 = vadd.f32 %v7428_v48, %v1016_v27  ;;  %v4619_v34 = vsel %vm4069_vm8, %v4502_v25, 0  ;;  %v2181_v30 = vrot.slane %v2179_v36, 1 }
 0x206   : > { %2344 = vrot.lane.b32.xlu1 %v7817_v24, %s6793_s19  ;;  %v3728_v9 = vor.u32 %v3726_v11, %v7813_v14  ;;  %v1014_v11 = vadd.f32 %v7428_v48, %v1013_v19  ;;  %6485 = vmatpush3.bf16.msra.mxu0 %v4619_v34  ;;  %v2459_v15 = vrot.slane %v7826_v41, 1 }
 0x207   : > { %v7835_v20 = vpop.permute.xlu0 %2834  ;;  %v1891_v62 = vmul.f32 0.0, %v1098_v57  ;;  %v1097_v48 = vmax.f32 %v1017_v42, 0.0  ;;  %v7948_v42 = vld [vmem:[#allocation2 + $0xc0] sm:$0xff] }
 0x208   : > { %v7833_v61 = vpop.permute.xlu1 %2515  ;;  %v3729_v12 = vsel %vm3677_vm12, %v7742_v46, %v3728_v9  ;;  %v3379_v46 = vsel %vm3361_vm7, %v3304_v2, %v7683_v60  ;;  %v1813_v60 = vsel %vm1525_vm14, 1.0, %v6794_v10  ;;  %v1933_v10 = vpack.c.bf16 %v1888_v5, %v1887_v56 }
 0x209   : > { %2529 = vrot.lane.b32.xlu0 %v7784_v38, %s6792_s18  ;;  %6424 = vmatprep.mubr.msk.bf16.mxu1 %vm3960_vm13, %v3729_v12  ;;  %v1885_v40 = vmul.f32 %v1813_v60, %v1092_v22  ;;  %v3454_v52 = vsel %vm3436_vm10, %v3379_v46, %v7655_v1  ;;  %v1096_v39 = vmax.f32 %v1014_v11, 0.0  ;;  %v1099_v2 = vmax.f32 %v1025_v16, 0.0 }
 0x20a   : > { %2852 = vrot.lane.b32.xlu1 %v7826_v41, %s6795_s22  ;;  %v2458_v1 = vsel %vm2417_vm3, %v2455_v31, %v2457_v51  ;;  %1969 = vst.msk [vmem:[#allocation2 + $0x120] sm:$0xff] %vm1893_vm2, %v1933_v10  ;;  %v1890_v37 = vmul.f32 0.0, %v1097_v48  ;;  %v3081_v5 = vsel %vm1893_vm2, %v6716_v28, %v7636_v13  ;;  %v2187_v11 = vshll.u32 %v7826_v41, 16 }
 0x20b   : > { %v7854_v33 = vpop.permute.xlu0 %2590  ;;  %v1932_v8 = vpack.c.bf16 %v1093_v35, %v1885_v40  ;;  %v1889_v12 = vmul.f32 0.0, %v1096_v39  ;;  %v1892_v0 = vmul.f32 0.0, %v1099_v2  ;;  %v7938_v27 = vsel %vm2417_vm3, %v2457_v51, %v2459_v15 }
 0x20c   : > { %v2923_v38 = vpop.permute.xlu1 %2922  ;;  %v2207_v28 = vshrl.u32 %v7948_v42, 16 }
 0x20d   : > { %2936 = vrot.lane.b32.xlu0 %v7817_v24, %s6799_s26  ;;  %v3529_v9 = vsel %vm3511_vm9, %v3454_v52, %v2923_v38  ;;  %1968 = vst.msk [vmem:[#allocation2 + $0x118] sm:$0xff] %vm1893_vm2, %v1932_v8  ;;  %v1935_v23 = vpack.c.bf16 %v1892_v0, %v1891_v62  ;;  %v1934_v46 = vpack.c.bf16 %v1890_v37, %v1889_v12  ;;  %v7940_v52 = vld [vmem:[#allocation2 + $0xb8] sm:$0xff]  ;;  %v2189_v8 = vrot.slane %v2187_v11, 1 }
 0x20e   : > { %2608 = vrot.lane.b32.xlu1 %v7826_v41, %s6791_s17 }
 0x20f   : > { %v3004_v7 = vpop.permute.xlu0 %3003  ;;  %1971 = vst.msk [vmem:[#allocation2 + $0x130] sm:$0xff] %vm1893_vm2, %v1935_v23  ;;  %1970 = vst.msk [vmem:[#allocation2 + $0x128] sm:$0xff] %vm1893_vm2, %v1934_v46 }
 0x210   : > { %v7871_v49 = vpop.permute.xlu1 %2678  ;;  %v3604_v3 = vsel %vm3586_vm11, %v3529_v9, %v3004_v7  ;;  %v2461_v9 = vrot.slane %v7940_v52, 1 }
 0x211   : > { %v3730_v58 = vshrl.u32 %v3604_v3, 16  ;;  %2692 = vrot.lane.b32.xlu0 %v7817_v24, %s6797_s24  ;;  %v3733_v4 = vshll.u32 %v3604_v3, 16  ;;  %v2177_v24 = vor.u32 %v2175_v54, %v7786_v6  ;;  %v3156_v54 = vsel %vm3136_vm15, %v3081_v5, %v7657_v18 }
 0x212   : > { %2775 = vrot.lane.b32.xlu1 %v2458_v1, %s6796_s23  ;;  %v3231_v56 = vsel %vm3211_vm5, %v3156_v54, %v7718_v29 }
 0x213   : > { %v7888_v31 = vrot.slane %v3730_v58, 7  ;;  %v3006_v43 = vpop.permute.xlu0 %3005  ;;  %v2182_v35 = vsel %vm2018_vm4, %v2177_v24, %v2181_v30 }
 0x214   : > { %v7890_v22 = vpop.permute.xlu1 %2330 }
 0x215   : > { %v3735_v45 = vor.u32 %v3733_v4, %v7888_v31  ;;  %2850 = vrot.lane.b32.xlu0 %v7846_v55, %s6795_s22 }
 0x216   : > { %2531 = vrot.lane.b32.xlu1 %v2458_v1, %s6792_s18 }
 0x217   : > { %v7902_v38 = vpop.permute.xlu0 %2761  ;;  %v3736_v6 = vsel %vm3677_vm12, %v7813_v14, %v3735_v45  ;;  %v3306_v14 = vsel %vm3286_vm6, %v3231_v56, %v7810_v59  ;;  %v2183_v59 = vshrl.u32 %v7846_v55, 16 }
 0x218   : > { %v7900_v19 = vpop.permute.xlu1 %2332  ;;  %6425 = vmatmul.mubr.msk.bf16.gmra.mrb[8].mxu1 %vm3960_vm13, %v3736_v6  ;;  %v3381_v18 = vsel %vm3361_vm7, %v3306_v14, %v7753_v32  ;;  %v6717_v32 = vld [vmem:[#allocation2 + $0x50] sm:$0xff] }
 0x219   : > { %2606 = vrot.lane.b32.xlu0 %v7846_v55, %s6791_s17  ;;  %v3456_v40 = vsel %vm3436_vm10, %v3381_v18, %v7835_v20  ;;  %v3083_v20 = vsel %vm1893_vm2, %v6717_v32, %v7744_v44  ;;  %v2185_v7 = vor.u32 %v2183_v59, %v2181_v30  ;;  %v2191_v44 = vshrl.u32 %v7826_v41, 16 }
 0x21a   : > { %2938 = vrot.lane.b32.xlu1 %v2182_v35, %s6799_s26  ;;  %v3158_v39 = vsel %vm3136_vm15, %v3083_v20, %v7702_v53  ;;  %v7970_v53 = vsel %vm2417_vm3, %v2459_v15, %v2461_v9  ;;  %v6718_v20 = vld [vmem:[#allocation2 + $0x58] sm:$0xff] }
 0x21b   : > { %v7921_v13 = vpop.permute.xlu0 %2517  ;;  %v3233_v48 = vsel %vm3211_vm5, %v3158_v39, %v7668_v21  ;;  %v2190_v12 = vsel %vm2018_vm4, %v2185_v7, %v2189_v8  ;;  %v2193_v37 = vor.u32 %v2191_v44, %v2189_v8  ;;  %v2463_v8 = vrot.slane %v7948_v42, 1 }
 0x21c   : > { %v7919_v60 = vpop.permute.xlu1 %2840  ;;  %v3308_v25 = vsel %vm3286_vm6, %v3233_v48, %v7871_v49  ;;  %v2203_v49 = vshll.u32 %v7948_v42, 16 }
 0x21d   : > { %3019 = vrot.lane.b32.xlu0 %v2458_v1, %s6798_s25  ;;  %v2195_v1 = vshll.u32 %v7940_v52, 16  ;;  %v3383_v21 = vsel %vm3361_vm7, %v3308_v25, %v7808_v63  ;;  %v6719_v25 = vld [vmem:[#allocation2 + $0x60] sm:$0xff] }
 0x21e   : > { %2694 = vrot.lane.b32.xlu1 %v2182_v35, %s6797_s24  ;;  %v3458_v30 = vsel %vm3436_vm10, %v3383_v21, %v7773_v26  ;;  %v2205_v45 = vrot.slane %v2203_v49, 1 }
 0x21f   : > { %v2925_v57 = vpop.permute.xlu0 %2924  ;;  %v2197_v4 = vrot.slane %v2195_v1, 1 }
 0x220   : > { %v7930_v29 = vpop.permute.xlu1 %2596  ;;  %v3531_v16 = vsel %vm3511_vm9, %v3456_v40, %v2925_v57  ;;  %v2209_v18 = vor.u32 %v2207_v28, %v2205_v45 }
 0x221   : > { %v3606_v36 = vsel %vm3586_vm11, %v3531_v16, %v3006_v43  ;;  %3021 = vrot.lane.b32.xlu0 %v7938_v27, %s6798_s25  ;;  %v2198_v24 = vsel %vm2018_vm4, %v2193_v37, %v2197_v4 }
 0x222   : > { %2346 = vrot.lane.b32.xlu1 %v2182_v35, %s6793_s19  ;;  %v3737_v10 = vshrl.u32 %v3606_v36, 16  ;;  %v3740_v3 = vshll.u32 %v3606_v36, 16  ;;  %v2199_v35 = vshrl.u32 %v7940_v52, 16  ;;  %v3085_v36 = vsel %vm1893_vm2, %v6718_v20, %v7751_v50 }
 0x223   : > { %v7952_v51 = vpop.permute.xlu0 %2680  ;;  %v3160_v44 = vsel %vm3136_vm15, %v3085_v36, %v7775_v17  ;;  %v8043_v17 = vsel %vm2417_vm3, %v2461_v9, %v2463_v8 }
 0x224   : > { %v7950_v55 = vpop.permute.xlu1 %2763  ;;  %v3739_v2 = vrot.slane %v3737_v10, 7  ;;  %v2201_v57 = vor.u32 %v2199_v35, %v2197_v4  ;;  %v3235_v50 = vsel %vm3211_vm5, %v3160_v44, %v7854_v33 }
 0x225   : > { %2777 = vrot.lane.b32.xlu0 %v7938_v27, %s6796_s23  ;;  %v3310_v39 = vsel %vm3286_vm6, %v3235_v50, %v7952_v51 }
 0x226   : > { %2856 = vrot.lane.b32.xlu1 %v7948_v42, %s6795_s22  ;;  %v3742_v62 = vor.u32 %v3740_v3, %v3739_v2  ;;  %v8023_v7 = vsel %vm2018_vm4, %v2201_v57, %v2205_v45  ;;  %v3385_v33 = vsel %vm3361_vm7, %v3310_v39, %v7902_v38 }
 0x227   : > { %v2839_v41 = vpop.permute.xlu0 %2838 }
 0x228   : > { %v7965_v58 = vpop.permute.xlu1 %2519  ;;  %v3743_v0 = vsel %vm3677_vm12, %v7888_v31, %v3742_v62  ;;  %v7989_v31 = vld [vmem:[#allocation2 + $0xc8] sm:$0xff]  ;;  %v3460_v51 = vsel %vm3436_vm10, %v3385_v33, %v2839_v41 }
 0x229   : > { %2940 = vrot.lane.b32.xlu0 %v2190_v12, %s6799_s26  ;;  %6428 = vmatprep.mubr.msk.bf16.mxu1 %vm3960_vm13, %v3743_v0  ;;  %v2211_v5 = vshll.u32 %v7989_v31, 16  ;;  %v2465_v1 = vrot.slane %v7989_v31, 1  ;;  %v3087_v0 = vsel %vm1893_vm2, %v6719_v25, %v7890_v22  ;;  %v8075_v22 = vld [vmem:[#allocation2 + $0xd0] sm:$0xff] }
 0x22a   : > { %2779 = vrot.lane.b32.xlu1 %v7970_v53, %s6796_s23  ;;  %v3162_v21 = vsel %vm3136_vm15, %v3087_v0, %v7833_v61  ;;  %v2219_v45 = vshll.u32 %v8075_v22, 16  ;;  %v2223_v28 = vshrl.u32 %v8075_v22, 16 }
 0x22b   : > { %v7983_v34 = vpop.permute.xlu0 %2594  ;;  %v8005_v40 = vrot.slane %v2211_v5, 1  ;;  %v8058_v9 = vsel %vm2417_vm3, %v2463_v8, %v2465_v1 }
 0x22c   : > { %v2927_v43 = vpop.permute.xlu1 %2926 }
 0x22d   : > { %2696 = vrot.lane.b32.xlu0 %v2190_v12, %s6797_s24  ;;  %v3533_v23 = vsel %vm3511_vm9, %v3458_v30, %v2927_v43  ;;  %v8020_v10 = vsel %vm2018_vm4, %v2209_v18, %v8005_v40  ;;  %v2215_v18 = vshrl.u32 %v7989_v31, 16 }
 0x22e   : > { %2942 = vrot.lane.b32.xlu1 %v2198_v24, %s6799_s26 }
 0x22f   : > { %v3008_v63 = vpop.permute.xlu0 %3007  ;;  %v2217_v8 = vor.u32 %v2215_v18, %v8005_v40 }
 0x230   : > { %v7994_v46 = vpop.permute.xlu1 %2682  ;;  %v3608_v6 = vsel %vm3586_vm11, %v3533_v23, %v3008_v63 }
 0x231   : > { %v3744_v54 = vshrl.u32 %v3608_v6, 16  ;;  %3023 = vrot.lane.b32.xlu0 %v7970_v53, %s6798_s25  ;;  %v3747_v56 = vshll.u32 %v3608_v6, 16 }
 0x232   : > { %2698 = vrot.lane.b32.xlu1 %v2198_v24, %s6797_s24 }
 0x233   : > { %v3746_v26 = vrot.slane %v3744_v54, 7  ;;  %v3010_v15 = vpop.permute.xlu0 %3009 }
 0x234   : > { %v8003_v14 = vpop.permute.xlu1 %2334 }
 0x235   : > { %v3749_v59 = vor.u32 %v3747_v56, %v3746_v26  ;;  %2854 = vrot.lane.b32.xlu0 %v7940_v52, %s6795_s22 }
 0x236   : > { %2348 = vrot.lane.b32.xlu1 %v2190_v12, %s6793_s19 }
 0x237   : > { %v8012_v16 = vpop.permute.xlu0 %2765  ;;  %v3750_v32 = vsel %vm3677_vm12, %v3739_v2, %v3749_v59 }
 0x238   : > { %v8010_v11 = vpop.permute.xlu1 %2336  ;;  %6429 = vmatmul.mubr.msk.bf16.gmra.mrb[12].mxu1 %vm3960_vm13, %v3750_v32 }
 0x239   : > { %2944 = vrot.lane.b32.xlu0 %v8023_v7, %s6799_s26 }
 0x23a   : > { %2946 = vrot.lane.b32.xlu1 %v8020_v10, %s6799_s26 }
 0x23b   : > { %v8038_v3 = vpop.permute.xlu0 %2521 }
 0x23c   : > { %v8036_v2 = vpop.permute.xlu1 %2844 }
 0x23d   : > { %3025 = vrot.lane.b32.xlu0 %v8043_v17, %s6798_s25 }
 0x23e   : > { %2350 = vrot.lane.b32.xlu1 %v2198_v24, %s6793_s19  ;;  %v3237_v24 = vsel %vm3211_vm5, %v3162_v21, %v7796_v47 }
 0x23f   : > { %v2929_v48 = vpop.permute.xlu0 %2928  ;;  %v3312_v61 = vsel %vm3286_vm6, %v3237_v24, %v7994_v46  ;;  %v2221_v46 = vrot.slane %v2219_v45, 1 }
 0x240   : > { %v8052_v62 = vpop.permute.xlu1 %2600  ;;  %v3535_v12 = vsel %vm3511_vm9, %v3460_v51, %v2929_v48  ;;  %v3387_v47 = vsel %vm3361_vm7, %v3312_v61, %v7950_v55  ;;  %v6720_v51 = vld [vmem:[#allocation2 + $0x68] sm:$0xff] }
 0x241   : > { %v3610_v37 = vsel %vm3586_vm11, %v3535_v12, %v3010_v15  ;;  %3027 = vrot.lane.b32.xlu0 %v8058_v9, %s6798_s25  ;;  %v2225_v56 = vor.u32 %v2223_v28, %v2221_v46  ;;  %v3089_v48 = vsel %vm1893_vm2, %v6720_v51, %v7900_v19  ;;  %v8133_v40 = vsel %vm2018_vm4, %v2217_v8, %v2221_v46 }
 0x242   : > { %2535 = vrot.lane.b32.xlu1 %v7970_v53, %s6792_s18  ;;  %v3751_v38 = vshrl.u32 %v3610_v37, 16  ;;  %v3754_v49 = vshll.u32 %v3610_v37, 16  ;;  %v2467_v12 = vrot.slane %v8075_v22, 1  ;;  %v3164_v25 = vsel %vm3136_vm15, %v3089_v48, %v7921_v13 }
 0x243   : > { %v2685_v4 = vpop.permute.xlu0 %2684  ;;  %v3239_v0 = vsel %vm3211_vm5, %v3164_v25, %v7983_v34 }
 0x244   : > { %v8067_v41 = vpop.permute.xlu1 %2767  ;;  %v3753_v43 = vrot.slane %v3751_v38, 7  ;;  %v3314_v19 = vsel %vm3286_vm6, %v3239_v0, %v2685_v4  ;;  %v8152_v21 = vsel %vm2417_vm3, %v2465_v1, %v2467_v12 }
 0x245   : > { %2533 = vrot.lane.b32.xlu0 %v7938_v27, %s6792_s18  ;;  %v8089_v27 = vld [vmem:[#allocation2 + $0xd8] sm:$0xff]  ;;  %v3389_v34 = vsel %vm3361_vm7, %v3314_v19, %v8012_v16 }
 0x246   : > { %2612 = vrot.lane.b32.xlu1 %v7948_v42, %s6791_s17  ;;  %v3756_v53 = vor.u32 %v3754_v49, %v3753_v43  ;;  %v2227_v5 = vshll.u32 %v8089_v27, 16  ;;  %v2469_v13 = vrot.slane %v8089_v27, 1 }
 0x247   : > { %v2843_v23 = vpop.permute.xlu0 %2842 }
 0x248   : > { %v8079_v30 = vpop.permute.xlu1 %2523  ;;  %v3757_v63 = vsel %vm3677_vm12, %v3746_v26, %v3756_v53  ;;  %v8106_v15 = vrot.slane %v2227_v5, 1  ;;  %v8168_v1 = vsel %vm2417_vm3, %v2467_v12, %v2469_v13  ;;  %v6721_v53 = vld [vmem:[#allocation2 + $0x70] sm:$0xff] }
 0x249   : > { %2610 = vrot.lane.b32.xlu0 %v7940_v52, %s6791_s17  ;;  %6432 = vmatprep.mubr.msk.bf16.mxu1 %vm3960_vm13, %v3757_v63  ;;  %v3462_v52 = vsel %vm3436_vm10, %v3387_v47, %v7919_v60 }
 0x24a   : > { %2702 = vrot.lane.b32.xlu1 %v8020_v10, %s6797_s24  ;;  %v8117_v36 = vsel %vm2018_vm4, %v2225_v56, %v8106_v15 }
 0x24b   : > { %v8094_v6 = vpop.permute.xlu0 %2598 }
 0x24c   : > { %v2931_v42 = vpop.permute.xlu1 %2930 }
 0x24d   : > { %2700 = vrot.lane.b32.xlu0 %v8023_v7, %s6797_s24  ;;  %v3537_v35 = vsel %vm3511_vm9, %v3462_v52, %v2931_v42 }
 0x24e   : > { %2783 = vrot.lane.b32.xlu1 %v8058_v9, %s6796_s23 }
 0x24f   : > { %v3012_v54 = vpop.permute.xlu0 %3011 }
 0x250   : > { %v2687_v55 = vpop.permute.xlu1 %2686  ;;  %v3612_v26 = vsel %vm3586_vm11, %v3537_v35, %v3012_v54 }
 0x251   : > { %v3758_v57 = vshrl.u32 %v3612_v26, 16  ;;  %2781 = vrot.lane.b32.xlu0 %v8043_v17, %s6796_s23  ;;  %v3761_v60 = vshll.u32 %v3612_v26, 16 }
 0x252   : > { %2860 = vrot.lane.b32.xlu1 %v8075_v22, %s6795_s22 }
 0x253   : > { %v3760_v59 = vrot.slane %v3758_v57, 7  ;;  %v3014_v20 = vpop.permute.xlu0 %3013 }
 0x254   : > { %v8113_v32 = vpop.permute.xlu1 %2338 }
 0x255   : > { %v3763_v44 = vor.u32 %v3761_v60, %v3760_v59  ;;  %2858 = vrot.lane.b32.xlu0 %v7989_v31, %s6795_s22 }
 0x256   : > { %2950 = vrot.lane.b32.xlu1 %v8117_v36, %s6799_s26 }
 0x257   : > { %v8126_v39 = vpop.permute.xlu0 %2769  ;;  %v3764_v33 = vsel %vm3677_vm12, %v3753_v43, %v3763_v44 }
 0x258   : > { %v8124_v50 = vpop.permute.xlu1 %2340  ;;  %6433 = vmatmul.mubr.msk.bf16.gmra.mrb[16].mxu1 %vm3960_vm13, %v3764_v33 }
 0x259   : > { %2948 = vrot.lane.b32.xlu0 %v8133_v40, %s6799_s26 }
 0x25a   : > { %2352 = vrot.lane.b32.xlu1 %v8023_v7, %s6793_s19  ;;  %v3464_v7 = vsel %vm3436_vm10, %v3389_v34, %v2843_v23 }
 0x25b   : > { %v8147_v38 = vpop.permute.xlu0 %2525 }
 0x25c   : > { %v8145_v37 = vpop.permute.xlu1 %2848 }
 0x25d   : > { %3029 = vrot.lane.b32.xlu0 %v8152_v21, %s6798_s25 }
 0x25e   : > { %2354 = vrot.lane.b32.xlu1 %v8020_v10, %s6793_s19  ;;  %v3091_v10 = vsel %vm1893_vm2, %v6721_v53, %v8003_v14  ;;  %v8185_v14 = vld [vmem:[#allocation2 + $0xe0] sm:$0xff] }
 0x25f   : > { %v2933_v43 = vpop.permute.xlu0 %2932  ;;  %v3166_v63 = vsel %vm3136_vm15, %v3091_v10, %v7965_v58  ;;  %v2235_v52 = vshll.u32 %v8185_v14, 16  ;;  %v2239_v54 = vshrl.u32 %v8185_v14, 16 }
 0x260   : > { %v8162_v4 = vpop.permute.xlu1 %2604  ;;  %v3539_v49 = vsel %vm3511_vm9, %v3464_v7, %v2933_v43  ;;  %v3241_v42 = vsel %vm3211_vm5, %v3166_v63, %v7930_v29  ;;  %v6722_v7 = vld [vmem:[#allocation2 + $0x78] sm:$0xff] }
 0x261   : > { %v3614_v24 = vsel %vm3586_vm11, %v3539_v49, %v3014_v20  ;;  %3031 = vrot.lane.b32.xlu0 %v8168_v1, %s6798_s25  ;;  %v3316_v5 = vsel %vm3286_vm6, %v3241_v42, %v2687_v55  ;;  %v2237_v55 = vrot.slane %v2235_v52, 1  ;;  %v2231_v20 = vshrl.u32 %v8089_v27, 16 }
 0x262   : > { %2539 = vrot.lane.b32.xlu1 %v8058_v9, %s6792_s18  ;;  %v3765_v16 = vshrl.u32 %v3614_v24, 16  ;;  %v3768_v47 = vshll.u32 %v3614_v24, 16  ;;  %v3391_v29 = vsel %vm3361_vm7, %v3316_v5, %v8067_v41  ;;  %v3093_v43 = vsel %vm1893_vm2, %v6722_v7, %v8010_v11 }
 0x263   : > { %v2689_v61 = vpop.permute.xlu0 %2688  ;;  %v2233_v12 = vor.u32 %v2231_v20, %v8106_v15  ;;  %v2471_v49 = vrot.slane %v8185_v14, 1  ;;  %v3168_v53 = vsel %vm3136_vm15, %v3093_v43, %v8038_v3 }
 0x264   : > { %v8177_v23 = vpop.permute.xlu1 %2771  ;;  %v3767_v45 = vrot.slane %v3765_v16, 7  ;;  %v3243_v10 = vsel %vm3211_vm5, %v3168_v53, %v8094_v6 }
 0x265   : > { %2537 = vrot.lane.b32.xlu0 %v8043_v17, %s6792_s18  ;;  %v8198_v17 = vld [vmem:[#allocation2 + $0xe8] sm:$0xff]  ;;  %v8244_v15 = vsel %vm2018_vm4, %v2233_v12, %v2237_v55  ;;  %v3318_v11 = vsel %vm3286_vm6, %v3243_v10, %v2689_v61  ;;  %v8263_v63 = vsel %vm2417_vm3, %v2469_v13, %v2471_v49 }
 0x266   : > { %2616 = vrot.lane.b32.xlu1 %v8075_v22, %s6791_s17  ;;  %v3770_v9 = vor.u32 %v3768_v47, %v3767_v45  ;;  %v2243_v26 = vshll.u32 %v8198_v17, 16  ;;  %v2473_v3 = vrot.slane %v8198_v17, 1  ;;  %v3393_v6 = vsel %vm3361_vm7, %v3318_v11, %v8126_v39  ;;  %v6723_v39 = vld [vmem:[#allocation2 + $0x80] sm:$0xff] }
 0x267   : > { %v2847_v28 = vpop.permute.xlu0 %2846 }
 0x268   : > { %v8189_v46 = vpop.permute.xlu1 %2527  ;;  %v3771_v58 = vsel %vm3677_vm12, %v3760_v59, %v3770_v9  ;;  %v2241_v59 = vor.u32 %v2239_v54, %v2237_v55  ;;  %v8217_v60 = vrot.slane %v2243_v26, 1  ;;  %v8279_v13 = vsel %vm2417_vm3, %v2471_v49, %v2473_v3  ;;  %v8310_v54 = vld [vmem:[%s9672_s4] ss:$0 sm:$0xff] }
 0x269   : > { %2614 = vrot.lane.b32.xlu0 %v7989_v31, %s6791_s17  ;;  %6436 = vmatprep.mubr.msk.bf16.mxu1 %vm3960_vm13, %v3771_v58  ;;  %v3466_v31 = vsel %vm3436_vm10, %v3391_v29, %v8036_v2  ;;  %v3095_v9 = vsel %vm1893_vm2, %v6723_v39, %v8113_v32  ;;  %v8294_v29 = vld [vmem:[#allocation2 + $0xf0] sm:$0xff] }
 0x26a   : > { %2706 = vrot.lane.b32.xlu1 %v8117_v36, %s6797_s24  ;;  %v8228_v48 = vsel %vm2018_vm4, %v2241_v59, %v8217_v60  ;;  %v2251_v26 = vshll.u32 %v8294_v29, 16 }
 0x26b   : > { %v8203_v35 = vpop.permute.xlu0 %2602 }
 0x26c   : > { %v2935_v22 = vpop.permute.xlu1 %2934 }
 0x26d   : > { %2704 = vrot.lane.b32.xlu0 %v8133_v40, %s6797_s24  ;;  %v3541_v56 = vsel %vm3511_vm9, %v3466_v31, %v2935_v22 }
 0x26e   : > { %2787 = vrot.lane.b32.xlu1 %v8168_v1, %s6796_s23 }
 0x26f   : > { %v3016_v18 = vpop.permute.xlu0 %3015 }
 0x270   : > { %v8214_v41 = vpop.permute.xlu1 %2690  ;;  %v3616_v57 = vsel %vm3586_vm11, %v3541_v56, %v3016_v18  ;;  %v8322_v56 = vld [vmem:[#allocation2 + $0xf8] sm:$0xff] }
 0x271   : > { %v3772_v8 = vshrl.u32 %v3616_v57, 16  ;;  %2785 = vrot.lane.b32.xlu0 %v8152_v21, %s6796_s23  ;;  %v3775_v44 = vshll.u32 %v3616_v57, 16  ;;  %v2259_v12 = vshll.u32 %v8322_v56, 16 }
 0x272   : > { %2864 = vrot.lane.b32.xlu1 %v8185_v14, %s6795_s22 }
 0x273   : > { %v3774_v2 = vrot.slane %v3772_v8, 7  ;;  %v3018_v51 = vpop.permute.xlu0 %3017  ;;  %v2253_v8 = vrot.slane %v2251_v26, 1  ;;  %v6724_v26 = vld [vmem:[#allocation2 + $0x88] sm:$0xff] }
 0x274   : > { %v8224_v33 = vpop.permute.xlu1 %2342 }
 0x275   : > { %v3777_v25 = vor.u32 %v3775_v44, %v3774_v2  ;;  %2862 = vrot.lane.b32.xlu0 %v8089_v27, %s6795_s22 }
 0x276   : > { %2954 = vrot.lane.b32.xlu1 %v8228_v48, %s6799_s26 }
 0x277   : > { %v8237_v19 = vpop.permute.xlu0 %2773  ;;  %v3778_v34 = vsel %vm3677_vm12, %v3767_v45, %v3777_v25 }
 0x278   : > { %v8235_v0 = vpop.permute.xlu1 %2344  ;;  %6437 = vmatmul.mubr.msk.bf16.gmra.mrb[20].mxu1 %vm3960_vm13, %v3778_v34 }
 0x279   : > { %2952 = vrot.lane.b32.xlu0 %v8244_v15, %s6799_s26 }
 0x27a   : > { %2356 = vrot.lane.b32.xlu1 %v8133_v40, %s6793_s19  ;;  %v3468_v40 = vsel %vm3436_vm10, %v3393_v6, %v2847_v28 }
 0x27b   : > { %v8258_v16 = vpop.permute.xlu0 %2529 }
 0x27c   : > { %v8256_v24 = vpop.permute.xlu1 %2852 }
 0x27d   : > { %3033 = vrot.lane.b32.xlu0 %v8263_v63, %s6798_s25 }
 0x27e   : > { %2358 = vrot.lane.b32.xlu1 %v8117_v36, %s6793_s19 }
 0x27f   : > { %v2937_v45 = vpop.permute.xlu0 %2936 }
 0x280   : > { %v8273_v61 = vpop.permute.xlu1 %2608  ;;  %v3543_v47 = vsel %vm3511_vm9, %v3468_v40, %v2937_v45  ;;  %v8342_v45 = vrot.slane %v2259_v12, 1 }
 0x281   : > { %v3618_v36 = vsel %vm3586_vm11, %v3543_v47, %v3018_v51  ;;  %3035 = vrot.lane.b32.xlu0 %v8279_v13, %s6798_s25 }
 0x282   : > { %2543 = vrot.lane.b32.xlu1 %v8168_v1, %s6792_s18  ;;  %v3779_v42 = vshrl.u32 %v3618_v36, 16  ;;  %v3782_v52 = vshll.u32 %v3618_v36, 16  ;;  %v3170_v1 = vsel %vm3136_vm15, %v3095_v9, %v8079_v30 }
 0x283   : > { %v8290_v5 = vpop.permute.xlu0 %2692  ;;  %v3245_v30 = vsel %vm3211_vm5, %v3170_v1, %v8052_v62 }
 0x284   : > { %v8288_v28 = vpop.permute.xlu1 %2775  ;;  %v8292_v58 = vrot.slane %v3779_v42, 7 }
 0x285   : > { %2541 = vrot.lane.b32.xlu0 %v8152_v21, %s6792_s18  ;;  %v3320_v21 = vsel %vm3286_vm6, %v3245_v30, %v8214_v41  ;;  %v3097_v30 = vsel %vm1893_vm2, %v6724_v26, %v8124_v50 }
 0x286   : > { %2620 = vrot.lane.b32.xlu1 %v8185_v14, %s6791_s17  ;;  %v3784_v32 = vor.u32 %v3782_v52, %v8292_v58  ;;  %v3395_v41 = vsel %vm3361_vm7, %v3320_v21, %v8177_v23  ;;  %v3172_v21 = vsel %vm3136_vm15, %v3097_v30, %v8147_v38 }
 0x287   : > { %v8305_v55 = vpop.permute.xlu0 %2850  ;;  %v3470_v43 = vsel %vm3436_vm10, %v3395_v41, %v8145_v37  ;;  %v2247_v37 = vshrl.u32 %v8198_v17, 16 }
 0x288   : > { %v8303_v22 = vpop.permute.xlu1 %2531  ;;  %v3785_v14 = vsel %vm3677_vm12, %v3774_v2, %v3784_v32 }
 0x289   : > { %v6414_v31 = vpop.f32.mrb[72].mxu0  ;;  %2618 = vrot.lane.b32.xlu0 %v8089_v27, %s6791_s17  ;;  %6440 = vmatprep.mubr.msk.bf16.mxu1 %vm3960_vm13, %v3785_v14  ;;  %v2255_v27 = vshrl.u32 %v8294_v29, 16  ;;  %v2249_v14 = vor.u32 %v2247_v37, %v8217_v60 }
 0x28a   : > { %2710 = vrot.lane.b32.xlu1 %v8228_v48, %s6797_s24  ;;  %v4116_v18 = vadd.f32 %v6414_v31, %v8310_v54  ;;  %v4107_v57 = vpop.f32.mrb[73].mxu0  ;;  %v6725_v31 = vld [vmem:[#allocation2 + $0x90] sm:$0xff] }
 0x28b   : > { %v4108_v62 = vadd.f32 %v8310_v54, %v4107_v57  ;;  %v6415_v59 = vpop.f32.mrb[74].mxu0  ;;  %v8330_v51 = vpop.permute.xlu0 %2606  ;;  %v2257_v40 = vor.u32 %v2255_v27, %v2253_v8 }
 0x28c   : > { %v2939_v20 = vpop.permute.xlu1 %2938  ;;  %v4119_v2 = vadd.f32 %v6415_v59, %v8310_v54  ;;  %v4110_v44 = vpop.f32.mrb[75].mxu0  ;;  %v4396_v34 = vmax.f32 %v4116_v18, 0.0  ;;  %v3099_v18 = vsel %vm1893_vm2, %v6725_v31, %v8224_v33  ;;  %v2475_v33 = vrot.slane %v8294_v29, 1 }
 0x28d   : > { %v4111_v25 = vadd.f32 %v8310_v54, %v4110_v44  ;;  %2708 = vrot.lane.b32.xlu0 %v8244_v15, %s6797_s24  ;;  %v4394_v23 = vmax.f32 %v4108_v62, 0.0  ;;  %v3545_v11 = vsel %vm3511_vm9, %v3470_v43, %v2939_v20  ;;  %v8354_v32 = vsel %vm2018_vm4, %v2257_v40, %v8342_v45 }
 0x28e   : > { %2791 = vrot.lane.b32.xlu1 %v8279_v13, %s6796_s23  ;;  %v4397_v7 = vmax.f32 %v4119_v2, 0.0  ;;  %v3247_v62 = vsel %vm3211_vm5, %v3172_v21, %v8203_v35  ;;  %v3174_v38 = vsel %vm3136_vm15, %v3099_v18, %v8189_v46  ;;  %v8383_v35 = vsel %vm2018_vm4, %v2249_v14, %v2253_v8 }
 0x28f   : > { %v4395_v49 = vmax.f32 %v4111_v25, 0.0  ;;  %v3020_v6 = vpop.permute.xlu0 %3019  ;;  %v3322_v59 = vsel %vm3286_vm6, %v3247_v62, %v8290_v5  ;;  %v3249_v41 = vsel %vm3211_vm5, %v3174_v38, %v8162_v4  ;;  %v2477_v44 = vrot.slane %v8322_v56, 1 }
 0x290   : > { %v2695_v53 = vpop.permute.xlu1 %2694  ;;  %v4467_v10 = vpack.c.bf16 %v4397_v7, %v4396_v34  ;;  %v3620_v36 = vsel %vm3586_vm11, %v3545_v11, %v3020_v6  ;;  %v3397_v5 = vsel %vm3361_vm7, %v3322_v59, %v8237_v19  ;;  %v8403_v19 = vsel %vm2417_vm3, %v2473_v3, %v2475_v33  ;;  %v6726_v11 = vld [vmem:[#allocation2 + $0xa0] sm:$0xff] }
 0x291   : > { %v4466_v47 = vpack.c.bf16 %v4395_v49, %v4394_v23  ;;  %2789 = vrot.lane.b32.xlu0 %v8263_v63, %s6796_s23  ;;  %v3786_v39 = vshrl.u32 %v3620_v36, 16  ;;  %v3789_v52 = vshll.u32 %v3620_v36, 16  ;;  %v3472_v46 = vsel %vm3436_vm10, %v3397_v5, %v8305_v55  ;;  %v6727_v36 = vld [vmem:[#allocation2 + $0x98] sm:$0xff] }
 0x292   : > { %2868 = vrot.lane.b32.xlu1 %v8294_v29, %s6795_s22  ;;  %v3324_v8 = vsel %vm3286_vm6, %v3249_v41, %v2695_v53  ;;  %v8416_v3 = vsel %vm2417_vm3, %v2475_v33, %v2477_v44  ;;  %v8423_v53 = vld [vmem:[#allocation2 + $0x100] sm:$0xff]  ;;  %v3101_v37 = vsel %vm1893_vm2, %v6727_v36, %v8235_v0 }
 0x293   : > { %6486 = vmatprep.mubr.msk.bf16.mxu0 %vm1893_vm2, %v4466_v47  ;;  %v3788_v42 = vrot.slane %v3786_v39, 7  ;;  %v3022_v1 = vpop.permute.xlu0 %3021  ;;  %v3399_v12 = vsel %vm3361_vm7, %v3324_v8, %v8288_v28  ;;  %v2267_v47 = vshll.u32 %v8423_v53, 16 }
 0x294   : > { %v2347_v9 = vpop.permute.xlu1 %2346  ;;  %6487 = vmatmul.mubr.msk.bf16.vlgmr.msra.gmra.mrb[76].mxu0 %vm1893_vm2, %v4467_v10  ;;  %v3474_v23 = vsel %vm3436_vm10, %v3399_v12, %v8256_v24 }
 0x295   : > { %2866 = vrot.lane.b32.xlu0 %v8198_v17, %s6795_s22  ;;  %v3791_v57 = vor.u32 %v3789_v52, %v3788_v42  ;;  %v3103_v6 = vsel %vm1893_vm2, %v6726_v11, %v2347_v9  ;;  %v8440_v52 = vld [vmem:[#allocation2 + $0x108] sm:$0xff]  ;;  %v3176_v9 = vsel %vm3136_vm15, %v3101_v37, %v8258_v16  ;;  %v2269_v21 = vrot.slane %v2267_v47, 1 }
 0x296   : > { %2958 = vrot.lane.b32.xlu1 %v8354_v32, %s6799_s26  ;;  %v2271_v16 = vshrl.u32 %v8423_v53, 16 }
 0x297   : > { %v8373_v20 = vpop.permute.xlu0 %2777  ;;  %v3792_v60 = vsel %vm3677_vm12, %v8292_v58, %v3791_v57 }
 0x298   : > { %v8369_v50 = vpop.permute.xlu1 %2856  ;;  %6441 = vmatmul.mubr.msk.bf16.gmra.mrb[24].mxu1 %vm3960_vm13, %v3792_v60 }
 0x299   : > { %2956 = vrot.lane.b32.xlu0 %v8383_v35, %s6799_s26 }
 0x29a   : > { %2360 = vrot.lane.b32.xlu1 %v8244_v15, %s6793_s19 }
 0x29b   : > { %v2941_v15 = vpop.permute.xlu0 %2940 }
 0x29c   : > { %v8390_v58 = vpop.permute.xlu1 %2779  ;;  %v3547_v2 = vsel %vm3511_vm9, %v3472_v46, %v2941_v15  ;;  %v2273_v15 = vor.u32 %v2271_v16, %v2269_v21 }
 0x29d   : > { %v3622_v55 = vsel %vm3586_vm11, %v3547_v2, %v3022_v1  ;;  %3037 = vrot.lane.b32.xlu0 %v8403_v19, %s6798_s25  ;;  %v3251_v1 = vsel %vm3211_vm5, %v3176_v9, %v8330_v51 }
 0x29e   : > { %2362 = vrot.lane.b32.xlu1 %v8228_v48, %s6793_s19  ;;  %v3793_v4 = vshrl.u32 %v3622_v55, 16  ;;  %v3796_v48 = vshll.u32 %v3622_v55, 16 }
 0x29f   : > { %v2697_v25 = vpop.permute.xlu0 %2696 }
 0x2a0   : > { %v2943_v27 = vpop.permute.xlu1 %2942  ;;  %v3795_v34 = vrot.slane %v3793_v4, 7  ;;  %v3326_v26 = vsel %vm3286_vm6, %v3251_v1, %v2697_v25  ;;  %v2479_v1 = vrot.slane %v8423_v53, 1 }
 0x2a1   : > { %3039 = vrot.lane.b32.xlu0 %v8416_v3, %s6798_s25  ;;  %v3549_v28 = vsel %vm3511_vm9, %v3474_v23, %v2943_v27  ;;  %v3401_v38 = vsel %vm3361_vm7, %v3326_v26, %v8373_v20 }
 0x2a2   : > { %2547 = vrot.lane.b32.xlu1 %v8279_v13, %s6792_s18  ;;  %v3798_v7 = vor.u32 %v3796_v48, %v3795_v34  ;;  %v2263_v48 = vshrl.u32 %v8322_v56, 16 }
 0x2a3   : > { %v3024_v49 = vpop.permute.xlu0 %3023 }
 0x2a4   : > { %v2699_v43 = vpop.permute.xlu1 %2698  ;;  %v3624_v13 = vsel %vm3586_vm11, %v3549_v28, %v3024_v49  ;;  %v3799_v10 = vsel %vm3677_vm12, %v3788_v42, %v3798_v7 }
 0x2a5   : > { %v3800_v40 = vshrl.u32 %v3624_v13, 16  ;;  %2545 = vrot.lane.b32.xlu0 %v8263_v63, %s6792_s18  ;;  %6444 = vmatprep.mubr.msk.bf16.mxu1 %vm3960_vm13, %v3799_v10  ;;  %v3803_v39 = vshll.u32 %v3624_v13, 16  ;;  %v3178_v63 = vsel %vm3136_vm15, %v3103_v6, %v8303_v22  ;;  %v2275_v22 = vshll.u32 %v8440_v52, 16 }
 0x2a6   : > { %2624 = vrot.lane.b32.xlu1 %v8294_v29, %s6791_s17  ;;  %v3253_v31 = vsel %vm3211_vm5, %v3178_v63, %v8273_v61 }
 0x2a7   : > { %v8438_v29 = vrot.slane %v3800_v40, 7  ;;  %v2855_v42 = vpop.permute.xlu0 %2854  ;;  %v8474_v8 = vrot.slane %v2275_v22, 1 }
 0x2a8   : > { %v8433_v24 = vpop.permute.xlu1 %2348  ;;  %v3476_v5 = vsel %vm3436_vm10, %v3401_v38, %v2855_v42 }
 0x2a9   : > { %v3805_v0 = vor.u32 %v3803_v39, %v8438_v29  ;;  %2622 = vrot.lane.b32.xlu0 %v8198_v17, %s6791_s17  ;;  %v3328_v17 = vsel %vm3286_vm6, %v3253_v31, %v2699_v43  ;;  %v8492_v6 = vsel %vm2018_vm4, %v2273_v15, %v8474_v8 }
 0x2aa   : > { %2714 = vrot.lane.b32.xlu1 %v8354_v32, %s6797_s24  ;;  %v3403_v2 = vsel %vm3361_vm7, %v3328_v17, %v8390_v58 }
 0x2ab   : > { %v6418_v14 = vpop.f32.mrb[0].mxu1  ;;  %v2945_v51 = vpop.permute.xlu0 %2944  ;;  %v3806_v62 = vsel %vm3677_vm12, %v3795_v34, %v3805_v0  ;;  %v3478_v58 = vsel %vm3436_vm10, %v3403_v2, %v8369_v50  ;;  %v2265_v50 = vor.u32 %v2263_v48, %v8342_v45 }
 0x2ac   : > { %v2947_v30 = vpop.permute.xlu1 %2946  ;;  %v4132_v18 = vadd.f32 %v6418_v14, %v8310_v54  ;;  %v4123_v57 = vpop.f32.mrb[1].mxu1  ;;  %6445 = vmatmul.mubr.msk.bf16.gmra.mrb[28].mxu1 %vm3960_vm13, %v3806_v62  ;;  %v3551_v20 = vsel %vm3511_vm9, %v3476_v5, %v2945_v51  ;;  %v6728_v62 = vld [vmem:[#allocation2 + $0xa8] sm:$0xff] }
 0x2ad   : > { %v4124_v59 = vadd.f32 %v8310_v54, %v4123_v57  ;;  %v6419_v60 = vpop.f32.mrb[2].mxu1  ;;  %2712 = vrot.lane.b32.xlu0 %v8383_v35, %s6797_s24  ;;  %v3553_v49 = vsel %vm3511_vm9, %v3478_v58, %v2947_v30  ;;  %v8512_v45 = vsel %vm2018_vm4, %v2265_v50, %v2269_v21  ;;  %v8546_v57 = vld [vmem:[#allocation2 + $0x118] sm:$0xff]  ;;  %v3105_v17 = vsel %vm1893_vm2, %v6728_v62, %v8433_v24 }
 0x2ae   : > { %2795 = vrot.lane.b32.xlu1 %v8416_v3, %s6796_s23  ;;  %v4135_v61 = vadd.f32 %v6419_v60, %v8310_v54  ;;  %v4126_v33 = vpop.f32.mrb[3].mxu1  ;;  %v4400_v55 = vmax.f32 %v4132_v18, 0.0 }
 0x2af   : > { %v4127_v46 = vadd.f32 %v8310_v54, %v4126_v33  ;;  %v3026_v27 = vpop.permute.xlu0 %3025  ;;  %v4398_v12 = vmax.f32 %v4124_v59, 0.0 }
 0x2b0   : > { %v8472_v41 = vpop.permute.xlu1 %2350  ;;  %v4401_v4 = vmax.f32 %v4135_v61, 0.0  ;;  %v3626_v34 = vsel %vm3586_vm11, %v3551_v20, %v3026_v27  ;;  %v2291_v61 = vshll.u32 %v8546_v57, 16  ;;  %v6729_v20 = vld [vmem:[#allocation2 + $0xb0] sm:$0xff] }
 0x2b1   : > { %v4399_v25 = vmax.f32 %v4127_v46, 0.0  ;;  %v3807_v23 = vshrl.u32 %v3626_v34, 16  ;;  %2793 = vrot.lane.b32.xlu0 %v8403_v19, %s6796_s23  ;;  %v3810_v10 = vshll.u32 %v3626_v34, 16 }
 0x2b2   : > { %2872 = vrot.lane.b32.xlu1 %v8423_v53, %s6795_s22  ;;  %v4469_v7 = vpack.c.bf16 %v4401_v4, %v4400_v55  ;;  %v2279_v55 = vshrl.u32 %v8440_v52, 16  ;;  %v3107_v4 = vsel %vm1893_vm2, %v6729_v20, %v8472_v41  ;;  %v8581_v41 = vrot.slane %v2291_v61, 1  ;;  %v6730_v20 = vld [vmem:[#allocation2 + $0xb8] sm:$0xff] }
 0x2b3   : > { %v4468_v43 = vpack.c.bf16 %v4399_v25, %v4398_v12  ;;  %v3809_v13 = vrot.slane %v3807_v23, 7  ;;  %v3028_v11 = vpop.permute.xlu0 %3027 }
 0x2b4   : > { %v8487_v28 = vpop.permute.xlu1 %2535  ;;  %v3628_v40 = vsel %vm3586_vm11, %v3553_v49, %v3028_v11 }
 0x2b5   : > { %6490 = vmatprep.mubr.msk.bf16.mxu0 %vm1893_vm2, %v4468_v43  ;;  %v3812_v47 = vor.u32 %v3810_v10, %v3809_v13  ;;  %v3814_v36 = vshrl.u32 %v3628_v40, 16  ;;  %2870 = vrot.lane.b32.xlu0 %v8322_v56, %s6795_s22  ;;  %v3817_v42 = vshll.u32 %v3628_v40, 16  ;;  %v3182_v48 = vsel %vm3136_vm15, %v3107_v4, %v8487_v28 }
 0x2b6   : > { %2962 = vrot.lane.b32.xlu1 %v8492_v6, %s6799_s26  ;;  %6491 = vmatmul.mubr.msk.bf16.gmra.mrb[80].mxu0 %vm1893_vm2, %v4469_v7 }
 0x2b7   : > { %v8504_v39 = vrot.slane %v3814_v36, 7  ;;  %v2534_v9 = vpop.permute.xlu0 %2533  ;;  %v3813_v63 = vsel %vm3677_vm12, %v8438_v29, %v3812_v47  ;;  %v2481_v29 = vrot.slane %v8440_v52, 1 }
 0x2b8   : > { %v8502_v37 = vpop.permute.xlu1 %2612  ;;  %6448 = vmatprep.mubr.msk.bf16.mxu1 %vm3960_vm13, %v3813_v63  ;;  %v3180_v59 = vsel %vm3136_vm15, %v3105_v17, %v2534_v9 }
 0x2b9   : > { %v3819_v0 = vor.u32 %v3817_v42, %v8504_v39  ;;  %2960 = vrot.lane.b32.xlu0 %v8512_v45, %s6799_s26  ;;  %v8535_v22 = vsel %vm2417_vm3, %v2479_v1, %v2481_v29  ;;  %v3257_v43 = vsel %vm3211_vm5, %v3182_v48, %v8502_v37 }
 0x2ba   : > { %2364 = vrot.lane.b32.xlu1 %v8383_v35, %s6793_s19  ;;  %v8525_v35 = vsel %vm2417_vm3, %v2477_v44, %v2479_v1  ;;  %v8539_v44 = vld [vmem:[#allocation2 + $0x110] sm:$0xff] }
 0x2bb   : > { %v2611_v30 = vpop.permute.xlu0 %2610  ;;  %v3820_v14 = vsel %vm3677_vm12, %v3809_v13, %v3819_v0 }
 0x2bc   : > { %v2703_v26 = vpop.permute.xlu1 %2702  ;;  %6449 = vmatmul.mubr.msk.bf16.gmra.mrb[32].mxu1 %vm3960_vm13, %v3820_v14  ;;  %v3255_v33 = vsel %vm3211_vm5, %v3180_v59, %v2611_v30  ;;  %v2483_v59 = vrot.slane %v8539_v44, 1 }
 0x2bd   : > { %3041 = vrot.lane.b32.xlu0 %v8525_v35, %s6798_s25  ;;  %v3332_v40 = vsel %vm3286_vm6, %v3257_v43, %v2703_v26 }
 0x2be   : > { %2366 = vrot.lane.b32.xlu1 %v8354_v32, %s6793_s19 }
 0x2bf   : > { %v2701_v16 = vpop.permute.xlu0 %2700 }
 0x2c0   : > { %v2784_v21 = vpop.permute.xlu1 %2783  ;;  %v3330_v15 = vsel %vm3286_vm6, %v3255_v33, %v2701_v16 }
 0x2c1   : > { %3043 = vrot.lane.b32.xlu0 %v8535_v22, %s6798_s25  ;;  %v3407_v36 = vsel %vm3361_vm7, %v3332_v40, %v2784_v21 }
 0x2c2   : > { %2551 = vrot.lane.b32.xlu1 %v8416_v3, %s6792_s18  ;;  %v2283_v3 = vshll.u32 %v8539_v44, 16 }
 0x2c3   : > { %v2782_v31 = vpop.permute.xlu0 %2781 }
 0x2c4   : > { %v2861_v32 = vpop.permute.xlu1 %2860  ;;  %v3405_v27 = vsel %vm3361_vm7, %v3330_v15, %v2782_v31 }
 0x2c5   : > { %2549 = vrot.lane.b32.xlu0 %v8403_v19, %s6792_s18  ;;  %v2287_v19 = vshrl.u32 %v8539_v44, 16  ;;  %v3482_v37 = vsel %vm3436_vm10, %v3407_v36, %v2861_v32  ;;  %v2281_v32 = vor.u32 %v2279_v55, %v8474_v8  ;;  %v8654_v55 = vld [vmem:[#allocation2 + $0x128] sm:$0xff] }
 0x2c6   : > { %2628 = vrot.lane.b32.xlu1 %v8423_v53, %s6791_s17  ;;  %v8554_v53 = vrot.slane %v2283_v3, 1 }
 0x2c7   : > { %v2859_v51 = vpop.permute.xlu0 %2858 }
 0x2c8   : > { %v2951_v18 = vpop.permute.xlu1 %2950  ;;  %v2289_v34 = vor.u32 %v2287_v19, %v8554_v53  ;;  %v3480_v7 = vsel %vm3436_vm10, %v3405_v27, %v2859_v51  ;;  %v8620_v8 = vsel %vm2018_vm4, %v2281_v32, %v8554_v53  ;;  %v2485_v53 = vrot.slane %v8546_v57, 1 }
 0x2c9   : > { %2626 = vrot.lane.b32.xlu0 %v8322_v56, %s6791_s17  ;;  %v3557_v0 = vsel %vm3511_vm9, %v3482_v37, %v2951_v18 }
 0x2ca   : > { %2718 = vrot.lane.b32.xlu1 %v8492_v6, %s6797_s24  ;;  %v8599_v16 = vsel %vm2018_vm4, %v2289_v34, %v8581_v41  ;;  %v2643_v34 = vshll.u32 %v8654_v55, 16 }
 0x2cb   : > { %v6422_v38 = vpop.f32.mrb[4].mxu1  ;;  %v2949_v46 = vpop.permute.xlu0 %2948 }
 0x2cc   : > { %v8558_v60 = vpop.permute.xlu1 %2352  ;;  %v4148_v5 = vadd.f32 %v6422_v38, %v8310_v54  ;;  %v4139_v24 = vpop.f32.mrb[5].mxu1  ;;  %v3555_v13 = vsel %vm3511_vm9, %v3480_v7, %v2949_v46 }
 0x2cd   : > { %v4140_v56 = vadd.f32 %v8310_v54, %v4139_v24  ;;  %v6423_v2 = vpop.f32.mrb[6].mxu1  ;;  %2716 = vrot.lane.b32.xlu0 %v8512_v45, %s6797_s24  ;;  %v8643_v24 = vsel %vm2417_vm3, %v2483_v59, %v2485_v53  ;;  %v3109_v4 = vsel %vm1893_vm2, %v6730_v20, %v8558_v60 }
 0x2ce   : > { %2799 = vrot.lane.b32.xlu1 %v8535_v22, %s6796_s23  ;;  %v4151_v12 = vadd.f32 %v6423_v2, %v8310_v54  ;;  %v4142_v25 = vpop.f32.mrb[7].mxu1  ;;  %v4404_v49 = vmax.f32 %v4148_v5, 0.0 }
 0x2cf   : > { %v4143_v23 = vadd.f32 %v8310_v54, %v4142_v25  ;;  %v3030_v11 = vpop.permute.xlu0 %3029  ;;  %v4402_v50 = vmax.f32 %v4140_v56, 0.0 }
 0x2d0   : > { %v8579_v58 = vpop.permute.xlu1 %2354  ;;  %v4405_v10 = vmax.f32 %v4151_v12, 0.0  ;;  %v3630_v47 = vsel %vm3586_vm11, %v3555_v13, %v3030_v11  ;;  %v2295_v13 = vshrl.u32 %v8546_v57, 16 }
 0x2d1   : > { %v4403_v28 = vmax.f32 %v4143_v23, 0.0  ;;  %v3821_v9 = vshrl.u32 %v3630_v47, 16  ;;  %2797 = vrot.lane.b32.xlu0 %v8525_v35, %s6796_s23  ;;  %v3824_v30 = vshll.u32 %v3630_v47, 16 }
 0x2d2   : > { %2876 = vrot.lane.b32.xlu1 %v8539_v44, %s6795_s22  ;;  %v4471_v42 = vpack.c.bf16 %v4405_v10, %v4404_v49  ;;  %v6731_v10 = vld [vmem:[#allocation2 + $0xc0] sm:$0xff] }
 0x2d3   : > { %v4470_v63 = vpack.c.bf16 %v4403_v28, %v4402_v50  ;;  %v3823_v26 = vrot.slane %v3821_v9, 7  ;;  %v3032_v14 = vpop.permute.xlu0 %3031  ;;  %v3111_v11 = vsel %vm1893_vm2, %v6731_v10, %v8579_v58  ;;  %v8691_v58 = vrot.slane %v2643_v34, 1  ;;  %v5014_v10 = vld [vmem:[%s9675_s7] sm:$0x3] }
 0x2d4   : > { %v8594_v1 = vpop.permute.xlu1 %2539  ;;  %v3632_v21 = vsel %vm3586_vm11, %v3557_v0, %v3032_v14  ;;  %6646 = vmatprep.subr.msk.bf16.mxu1 %vm703_vm0, %v5014_v10 }
 0x2d5   : > { %6494 = vmatprep.mubr.msk.bf16.mxu0 %vm1893_vm2, %v4470_v63  ;;  %v3826_v31 = vor.u32 %v3824_v30, %v3823_v26  ;;  %v3828_v3 = vshrl.u32 %v3632_v21, 16  ;;  %2874 = vrot.lane.b32.xlu0 %v8440_v52, %s6795_s22  ;;  %v3831_v62 = vshll.u32 %v3632_v21, 16  ;;  %v3186_v36 = vsel %vm3136_vm15, %v3111_v11, %v8594_v1  ;;  %v6732_v11 = vld [vmem:[#allocation2 + $0xc8] sm:$0xff] }
 0x2d6   : > { %2966 = vrot.lane.b32.xlu1 %v8599_v16, %s6799_s26  ;;  %6495 = vmatmul.mubr.msk.bf16.gmra.mrb[84].mxu0 %vm1893_vm2, %v4471_v42 }
 0x2d7   : > { %v8611_v51 = vrot.slane %v3828_v3, 7  ;;  %v2538_v17 = vpop.permute.xlu0 %2537  ;;  %v3827_v19 = vsel %vm3677_vm12, %v8504_v39, %v3826_v31 }
 0x2d8   : > { %v8609_v18 = vpop.permute.xlu1 %2616  ;;  %6452 = vmatprep.mubr.msk.bf16.mxu1 %vm3960_vm13, %v3827_v19  ;;  %v3184_v27 = vsel %vm3136_vm15, %v3109_v4, %v2538_v17 }
 0x2d9   : > { %v3833_v38 = vor.u32 %v3831_v62, %v8611_v51  ;;  %2964 = vrot.lane.b32.xlu0 %v8620_v8, %s6799_s26  ;;  %v3261_v63 = vsel %vm3211_vm5, %v3186_v36, %v8609_v18 }
 0x2da   : > { %2368 = vrot.lane.b32.xlu1 %v8512_v45, %s6793_s19  ;;  %v8633_v45 = vsel %vm2417_vm3, %v2481_v29, %v2483_v59  ;;  %v8647_v29 = vld [vmem:[#allocation2 + $0x120] sm:$0xff] }
 0x2db   : > { %v2615_v33 = vpop.permute.xlu0 %2614  ;;  %v3834_v39 = vsel %vm3677_vm12, %v3823_v26, %v3833_v38 }
 0x2dc   : > { %v2707_v61 = vpop.permute.xlu1 %2706  ;;  %6453 = vmatmul.mubr.msk.bf16.gmra.mrb[36].mxu1 %vm3960_vm13, %v3834_v39  ;;  %v3259_v48 = vsel %vm3211_vm5, %v3184_v27, %v2615_v33  ;;  %v8731_v27 = vrot.slane %v8647_v29, 1 }
 0x2dd   : > { %3045 = vrot.lane.b32.xlu0 %v8633_v45, %s6798_s25  ;;  %v3336_v21 = vsel %vm3286_vm6, %v3261_v63, %v2707_v61 }
 0x2de   : > { %2370 = vrot.lane.b32.xlu1 %v8492_v6, %s6793_s19 }
 0x2df   : > { %v2705_v46 = vpop.permute.xlu0 %2704 }
 0x2e0   : > { %v2788_v5 = vpop.permute.xlu1 %2787  ;;  %v3334_v43 = vsel %vm3286_vm6, %v3259_v48, %v2705_v46 }
 0x2e1   : > { %3047 = vrot.lane.b32.xlu0 %v8643_v24, %s6798_s25  ;;  %v3411_v3 = vsel %vm3361_vm7, %v3336_v21, %v2788_v5 }
 0x2e2   : > { %2555 = vrot.lane.b32.xlu1 %v8535_v22, %s6792_s18  ;;  %v2299_v22 = vshll.u32 %v8647_v29, 16 }
 0x2e3   : > { %v2786_v15 = vpop.permute.xlu0 %2785 }
 0x2e4   : > { %v2865_v6 = vpop.permute.xlu1 %2864  ;;  %v3409_v40 = vsel %vm3361_vm7, %v3334_v43, %v2786_v15 }
 0x2e5   : > { %2553 = vrot.lane.b32.xlu0 %v8525_v35, %s6792_s18  ;;  %v2303_v35 = vshrl.u32 %v8647_v29, 16  ;;  %v3486_v18 = vsel %vm3436_vm10, %v3411_v3, %v2865_v6  ;;  %v2297_v6 = vor.u32 %v2295_v13, %v8581_v41  ;;  %v8765_v13 = vld [vmem:[#allocation2 + $0x138] sm:$0xff] }
 0x2e6   : > { %2632 = vrot.lane.b32.xlu1 %v8539_v44, %s6791_s17  ;;  %v8662_v44 = vrot.slane %v2299_v22, 1 }
 0x2e7   : > { %v2863_v2 = vpop.permute.xlu0 %2862 }
 0x2e8   : > { %v2955_v56 = vpop.permute.xlu1 %2954  ;;  %v8683_v47 = vor.u32 %v2303_v35, %v8662_v44  ;;  %v3484_v42 = vsel %vm3436_vm10, %v3409_v40, %v2863_v2  ;;  %v8728_v41 = vsel %vm2018_vm4, %v2297_v6, %v8662_v44  ;;  %v2733_v44 = vrot.slane %v8654_v55, 1 }
 0x2e9   : > { %2630 = vrot.lane.b32.xlu0 %v8440_v52, %s6791_s17  ;;  %v3561_v38 = vsel %vm3511_vm9, %v3486_v18, %v2955_v56 }
 0x2ea   : > { %2722 = vrot.lane.b32.xlu1 %v8599_v16, %s6797_s24  ;;  %v2646_v46 = vsel %vm2018_vm4, %v8683_v47, %v8691_v58 }
 0x2eb   : > { %v6426_v25 = vpop.f32.mrb[8].mxu1  ;;  %v2953_v23 = vpop.permute.xlu0 %2952 }
 0x2ec   : > { %v8666_v12 = vpop.permute.xlu1 %2356  ;;  %v4164_v7 = vadd.f32 %v6426_v25, %v8310_v54  ;;  %v4155_v60 = vpop.f32.mrb[9].mxu1  ;;  %v3559_v26 = vsel %vm3511_vm9, %v3484_v42, %v2953_v23 }
 0x2ed   : > { %v4156_v52 = vadd.f32 %v8310_v54, %v4155_v60  ;;  %v6427_v49 = vpop.f32.mrb[10].mxu1  ;;  %2720 = vrot.lane.b32.xlu0 %v8620_v8, %s6797_s24  ;;  %v3113_v40 = vsel %vm1893_vm2, %v6732_v11, %v8666_v12 }
 0x2ee   : > { %2803 = vrot.lane.b32.xlu1 %v8643_v24, %s6796_s23  ;;  %v4167_v50 = vadd.f32 %v6427_v49, %v8310_v54  ;;  %v4158_v28 = vpop.f32.mrb[11].mxu1  ;;  %v4408_v0 = vmax.f32 %v4164_v7, 0.0 }
 0x2ef   : > { %v4159_v9 = vadd.f32 %v8310_v54, %v4158_v28  ;;  %v3034_v14 = vpop.permute.xlu0 %3033  ;;  %v4406_v32 = vmax.f32 %v4156_v52, 0.0 }
 0x2f0   : > { %v8689_v37 = vpop.permute.xlu1 %2358  ;;  %v4409_v30 = vmax.f32 %v4167_v50, 0.0  ;;  %v3634_v31 = vsel %vm3586_vm11, %v3559_v26, %v3034_v14 }
 0x2f1   : > { %v4407_v1 = vmax.f32 %v4159_v9, 0.0  ;;  %v3835_v17 = vshrl.u32 %v3634_v31, 16  ;;  %2801 = vrot.lane.b32.xlu0 %v8633_v45, %s6796_s23  ;;  %v3838_v33 = vshll.u32 %v3634_v31, 16  ;;  %v2891_v9 = vshll.u32 %v8765_v13, 16 }
 0x2f2   : > { %2880 = vrot.lane.b32.xlu1 %v8647_v29, %s6795_s22  ;;  %v4473_v62 = vpack.c.bf16 %v4409_v30, %v4408_v0 }
 0x2f3   : > { %v4472_v19 = vpack.c.bf16 %v4407_v1, %v4406_v32  ;;  %v3837_v61 = vrot.slane %v3835_v17, 7  ;;  %v3036_v39 = vpop.permute.xlu0 %3035  ;;  %v2647_v32 = vshrl.u32 %v8654_v55, 16  ;;  %v6733_v1 = vld [vmem:[#allocation2 + $0xd0] sm:$0xff] }
 0x2f4   : > { %v8704_v59 = vpop.permute.xlu1 %2543  ;;  %v3636_v5 = vsel %vm3586_vm11, %v3561_v38, %v3036_v39  ;;  %v3115_v31 = vsel %vm1893_vm2, %v6733_v1, %v8689_v37  ;;  %v8805_v37 = vrot.slane %v2891_v9, 1 }
 0x2f5   : > { %6498 = vmatprep.mubr.msk.bf16.mxu0 %vm1893_vm2, %v4472_v19  ;;  %v3840_v15 = vor.u32 %v3838_v33, %v3837_v61  ;;  %v3842_v22 = vshrl.u32 %v3636_v5, 16  ;;  %2878 = vrot.lane.b32.xlu0 %v8546_v57, %s6795_s22  ;;  %v3845_v20 = vshll.u32 %v3636_v5, 16  ;;  %v3190_v19 = vsel %vm3136_vm15, %v3115_v31, %v8704_v59  ;;  %v2013_v31 = vld [vmem:[#allocation2 + $0x138] sm:$0x1] }
 0x2f6   : > { %2970 = vrot.lane.b32.xlu1 %v2646_v46, %s6799_s26  ;;  %6499 = vmatmul.mubr.msk.bf16.gmra.mrb[88].mxu0 %vm1893_vm2, %v4473_v62 }
 0x2f7   : > { %v8719_v2 = vrot.slane %v3842_v22, 7  ;;  %v2542_v4 = vpop.permute.xlu0 %2541  ;;  %v3841_v35 = vsel %vm3677_vm12, %v8611_v51, %v3840_v15 }
 0x2f8   : > { %v8717_v56 = vpop.permute.xlu1 %2620  ;;  %6456 = vmatprep.mubr.msk.bf16.mxu1 %vm3960_vm13, %v3841_v35  ;;  %v3188_v28 = vsel %vm3136_vm15, %v3113_v40, %v2542_v4 }
 0x2f9   : > { %v3847_v25 = vor.u32 %v3845_v20, %v8719_v2  ;;  %2968 = vrot.lane.b32.xlu0 %v8728_v41, %s6799_s26  ;;  %v3265_v39 = vsel %vm3211_vm5, %v3190_v19, %v8717_v56  ;;  %v6734_v19 = vld [vmem:[#allocation2 + $0xd8] sm:$0xff] }
 0x2fa   : > { %2372 = vrot.lane.b32.xlu1 %v8620_v8, %s6793_s19  ;;  %v8746_v8 = vsel %vm2417_vm3, %v2485_v53, %v8731_v27  ;;  %v8758_v53 = vld [vmem:[#allocation2 + $0x130] sm:$0xff] }
 0x2fb   : > { %v2619_v51 = vpop.permute.xlu0 %2618  ;;  %v3848_v48 = vsel %vm3677_vm12, %v3837_v61, %v3847_v25  ;;  %v2651_v52 = vshll.u32 %v8758_v53, 16  ;;  %v2655_v50 = vshrl.u32 %v8758_v53, 16  ;;  %v2735_v9 = vrot.slane %v8758_v53, 1 }
 0x2fc   : > { %v8736_v34 = vpop.permute.xlu1 %2710  ;;  %6457 = vmatmul.mubr.msk.bf16.gmra.mrb[40].mxu1 %vm3960_vm13, %v3848_v48  ;;  %v3263_v63 = vsel %vm3211_vm5, %v3188_v28, %v2619_v51 }
 0x2fd   : > { %3049 = vrot.lane.b32.xlu0 %v8746_v8, %s6798_s25  ;;  %v3340_v22 = vsel %vm3286_vm6, %v3265_v39, %v8736_v34 }
 0x2fe   : > { %2374 = vrot.lane.b32.xlu1 %v8599_v16, %s6793_s19  ;;  %v2734_v16 = vsel %vm2417_vm3, %v8731_v27, %v2733_v44 }
 0x2ff   : > { %v2709_v23 = vpop.permute.xlu0 %2708 }
 0x300   : > { %v2792_v7 = vpop.permute.xlu1 %2791  ;;  %v3338_v30 = vsel %vm3286_vm6, %v3263_v63, %v2709_v23  ;;  %v2009_v63 = vld [vmem:[#allocation2 + $0x128] sm:$0x1] }
 0x301   : > { %3051 = vrot.lane.b32.xlu0 %v2734_v16, %s6798_s25  ;;  %v3415_v35 = vsel %vm3361_vm7, %v3340_v22, %v2792_v7 }
 0x302   : > { %2559 = vrot.lane.b32.xlu1 %v8643_v24, %s6792_s18 }
 0x303   : > { %v2790_v43 = vpop.permute.xlu0 %2789 }
 0x304   : > { %v2869_v60 = vpop.permute.xlu1 %2868  ;;  %v3413_v3 = vsel %vm3361_vm7, %v3338_v30, %v2790_v43 }
 0x305   : > { %2557 = vrot.lane.b32.xlu0 %v8633_v45, %s6792_s18  ;;  %v8775_v45 = vrot.slane %v2651_v52, 1  ;;  %v3490_v56 = vsel %vm3436_vm10, %v3415_v35, %v2869_v60  ;;  %v2649_v60 = vor.u32 %v2647_v32, %v8691_v58  ;;  %v8867_v32 = vld [vmem:[#allocation2 + $0x140] sm:$0xff] }
 0x306   : > { %2636 = vrot.lane.b32.xlu1 %v8647_v29, %s6791_s17 }
 0x307   : > { %v2867_v49 = vpop.permute.xlu0 %2866  ;;  %v8797_v18 = vor.u32 %v2655_v50, %v8775_v45  ;;  %v2654_v58 = vsel %vm2018_vm4, %v2649_v60, %v8775_v45  ;;  %v2981_v45 = vrot.slane %v8765_v13, 1 }
 0x308   : > { %v2959_v24 = vpop.permute.xlu1 %2958  ;;  %v3488_v38 = vsel %vm3436_vm10, %v3413_v3, %v2867_v49 }
 0x309   : > { %2634 = vrot.lane.b32.xlu0 %v8546_v57, %s6791_s17  ;;  %v5023_v57 = vsel %vm703_vm0, %v5014_v10, 0  ;;  %v3565_v34 = vsel %vm3511_vm9, %v3490_v56, %v2959_v24  ;;  %v2894_v49 = vsel %vm2018_vm4, %v8797_v18, %v8805_v37  ;;  %vm9689_vm0 = vcmask 31744  }
 0x30a   : > { %2726 = vrot.lane.b32.xlu1 %v2646_v46, %s6797_s24  ;;  %6559 = vmatpush3.bf16.msra.mxu1 %v5023_v57  ;;  %v2489_v57 = vrot.slane %v2009_v63, 1  ;;  %vm9692_vm8 = vmmov %vm9689_vm0 }
 0x30b   : > { %v6430_v42 = vpop.f32.mrb[12].mxu1  ;;  %v2957_v0 = vpop.permute.xlu0 %2956  ;;  %vm9702_vm1 = vmmov %vm9689_vm0 }
 0x30c   : > { %v8780_v36 = vpop.permute.xlu1 %2360  ;;  %v4180_v12 = vadd.f32 %v6430_v42, %v8310_v54  ;;  %v4171_v26 = vpop.f32.mrb[13].mxu1  ;;  %v3563_v5 = vsel %vm3511_vm9, %v3488_v38, %v2957_v0  ;;  %vm9703_vm14 = vmmov %vm9689_vm0 }
 0x30d   : > { %v4172_v14 = vadd.f32 %v8310_v54, %v4171_v26  ;;  %v6431_v21 = vpop.f32.mrb[14].mxu1  ;;  %2724 = vrot.lane.b32.xlu0 %v8728_v41, %s6797_s24  ;;  %v3117_v38 = vsel %vm1893_vm2, %v6734_v19, %v8780_v36 }
 0x30e   : > { %2807 = vrot.lane.b32.xlu1 %v2734_v16, %s6796_s23  ;;  %v4183_v62 = vadd.f32 %v6431_v21, %v8310_v54  ;;  %v4174_v17 = vpop.f32.mrb[15].mxu1  ;;  %v4412_v46 = vmax.f32 %v4180_v12, 0.0  ;;  %v2490_v21 = vsel %vm2417_vm3, %v8731_v27, %v2489_v57  ;;  %v2899_v27 = vshll.u32 %v8867_v32, 16 }
 0x30f   : > { %v4175_v61 = vadd.f32 %v8310_v54, %v4174_v17  ;;  %v3038_v15 = vpop.permute.xlu0 %3037  ;;  %v4410_v59 = vmax.f32 %v4172_v14, 0.0  ;;  %v2737_v17 = vrot.slane %v2013_v31, 1 }
 0x310   : > { %v8803_v33 = vpop.permute.xlu1 %2362  ;;  %v4413_v6 = vmax.f32 %v4183_v62, 0.0  ;;  %v3638_v4 = vsel %vm3586_vm11, %v3563_v5, %v3038_v15 }
 0x311   : > { %v4411_v20 = vmax.f32 %v4175_v61, 0.0  ;;  %v3849_v51 = vshrl.u32 %v3638_v4, 16  ;;  %2805 = vrot.lane.b32.xlu0 %v8746_v8, %s6796_s23  ;;  %v3852_v43 = vshll.u32 %v3638_v4, 16  ;;  %v2903_v61 = vshrl.u32 %v8867_v32, 16  ;;  %v6735_v4 = vld [vmem:[#allocation2 + $0xe0] sm:$0xff] }
 0x312   : > { %2884 = vrot.lane.b32.xlu1 %v8758_v53, %s6795_s22  ;;  %v4475_v25 = vpack.c.bf16 %v4413_v6, %v4412_v46  ;;  %v2738_v22 = vsel %vm2417_vm3, %v2735_v9, %v2737_v17  ;;  %v3119_v35 = vsel %vm1893_vm2, %v6735_v4, %v8803_v33  ;;  %v2895_v33 = vshrl.u32 %v8765_v13, 16 }
 0x313   : > { %v4474_v48 = vpack.c.bf16 %v4411_v20, %v4410_v59  ;;  %v3851_v16 = vrot.slane %v3849_v51, 7  ;;  %v3040_v52 = vpop.permute.xlu0 %3039  ;;  %v2983_v20 = vrot.slane %v8867_v32, 1 }
 0x314   : > { %v8819_v23 = vpop.permute.xlu1 %2547  ;;  %v3640_v7 = vsel %vm3586_vm11, %v3565_v34, %v3040_v52 }
 0x315   : > { %6502 = vmatprep.mubr.msk.bf16.mxu0 %vm1893_vm2, %v4474_v48  ;;  %v3854_v10 = vor.u32 %v3852_v43, %v3851_v16  ;;  %v3856_v11 = vshrl.u32 %v3640_v7, 16  ;;  %2882 = vrot.lane.b32.xlu0 %v8654_v55, %s6795_s22  ;;  %v3859_v50 = vshll.u32 %v3640_v7, 16  ;;  %v3194_v34 = vsel %vm3136_vm15, %v3119_v35, %v8819_v23 }
 0x316   : > { %2974 = vrot.lane.b32.xlu1 %v2894_v49, %s6799_s26  ;;  %6503 = vmatmul.mubr.msk.bf16.gmra.mrb[92].mxu0 %vm1893_vm2, %v4475_v25  ;;  %v2017_v49 = vld [vmem:[#allocation2 + $0x148] sm:$0x1] }
 0x317   : > { %v8834_v40 = vrot.slane %v3856_v11, 7  ;;  %v2546_v28 = vpop.permute.xlu0 %2545  ;;  %v3855_v42 = vsel %vm3677_vm12, %v8719_v2, %v3854_v10 }
 0x318   : > { %v8832_v24 = vpop.permute.xlu1 %2624  ;;  %6460 = vmatprep.mubr.msk.bf16.mxu1 %vm3960_vm13, %v3855_v42 }
 0x319   : > { %v3861_v12 = vor.u32 %v3859_v50, %v8834_v40  ;;  %2972 = vrot.lane.b32.xlu0 %v2654_v58, %s6799_s26  ;;  %v3269_v7 = vsel %vm3211_vm5, %v3194_v34, %v8832_v24  ;;  %v2985_v24 = vrot.slane %v2017_v49, 1 }
 0x31a   : > { %2376 = vrot.lane.b32.xlu1 %v8728_v41, %s6793_s19  ;;  %v8855_v41 = vsel %vm2417_vm3, %v2733_v44, %v2735_v9 }
 0x31b   : > { %v2623_v26 = vpop.permute.xlu0 %2622  ;;  %v3862_v2 = vsel %vm3677_vm12, %v3851_v16, %v3861_v12 }
 0x31c   : > { %v8846_v0 = vpop.permute.xlu1 %2714  ;;  %6461 = vmatmul.mubr.msk.bf16.gmra.mrb[44].mxu1 %vm3960_vm13, %v3862_v2 }
 0x31d   : > { %3053 = vrot.lane.b32.xlu0 %v8855_v41, %s6798_s25  ;;  %v3344_v23 = vsel %vm3286_vm6, %v3269_v7, %v8846_v0  ;;  %v2897_v0 = vor.u32 %v2895_v33, %v8805_v37  ;;  %v2986_v37 = vsel %vm2417_vm3, %v2983_v20, %v2985_v24 }
 0x31e   : > { %2378 = vrot.lane.b32.xlu1 %v8683_v47, %s6793_s19  ;;  %v2982_v47 = vsel %vm2417_vm3, %v2735_v9, %v2981_v45 }
 0x31f   : > { %v2713_v14 = vpop.permute.xlu0 %2712 }
 0x320   : > { %v2796_v30 = vpop.permute.xlu1 %2795 }
 0x321   : > { %3055 = vrot.lane.b32.xlu0 %v2982_v47, %s6798_s25 }
 0x322   : > { %2563 = vrot.lane.b32.xlu1 %v2490_v21, %s6792_s18 }
 0x323   : > { %v2794_v1 = vpop.permute.xlu0 %2793 }
 0x324   : > { %v2873_v44 = vpop.permute.xlu1 %2872 }
 0x325   : > { %2561 = vrot.lane.b32.xlu0 %v8746_v8, %s6792_s18  ;;  %v3192_v8 = vsel %vm3136_vm15, %v3117_v38, %v2546_v28  ;;  %v2984_v38 = vsel %vm2417_vm3, %v2981_v45, %v2983_v20  ;;  %vm9690_vm3 = vmmov %vm9689_vm0 }
 0x326   : > { %2640 = vrot.lane.b32.xlu1 %v8758_v53, %s6791_s17  ;;  %v2901_v53 = vrot.slane %v2899_v27, 1  ;;  %v3267_v5 = vsel %vm3211_vm5, %v3192_v8, %v2623_v26 }
 0x327   : > { %v2871_v62 = vpop.permute.xlu0 %2870  ;;  %v3342_v36 = vsel %vm3286_vm6, %v3267_v5, %v2713_v14 }
 0x328   : > { %v2963_v3 = vpop.permute.xlu1 %2962  ;;  %v3417_v25 = vsel %vm3361_vm7, %v3342_v36, %v2794_v1  ;;  %v2905_v48 = vor.u32 %v2903_v61, %v2901_v53  ;;  %v2902_v1 = vsel %vm2018_vm4, %v2897_v0, %v2901_v53  ;;  %vm9691_vm4 = vmmov %vm9689_vm0 }
 0x329   : > { %2638 = vrot.lane.b32.xlu0 %v8654_v55, %s6791_s17  ;;  %v3492_v16 = vsel %vm3436_vm10, %v3417_v25, %v2871_v62 }
 0x32a   : > { %2730 = vrot.lane.b32.xlu1 %v8797_v18, %s6797_s24 }
 0x32b   : > { %v6434_v46 = vpop.f32.mrb[16].mxu1  ;;  %v2961_v18 = vpop.permute.xlu0 %2960 }
 0x32c   : > { %v8882_v39 = vpop.permute.xlu1 %2364  ;;  %v4196_v6 = vadd.f32 %v6434_v46, %v8310_v54  ;;  %v4187_v15 = vpop.f32.mrb[17].mxu1  ;;  %v3567_v10 = vsel %vm3511_vm9, %v3492_v16, %v2961_v18 }
 0x32d   : > { %v4188_v55 = vadd.f32 %v8310_v54, %v4187_v15  ;;  %v6435_v59 = vpop.f32.mrb[18].mxu1  ;;  %2728 = vrot.lane.b32.xlu0 %v2654_v58, %s6797_s24  ;;  %v3419_v58 = vsel %vm3361_vm7, %v3344_v23, %v2796_v30  ;;  %v6736_v15 = vld [vmem:[#allocation2 + $0xe8] sm:$0xff] }
 0x32e   : > { %2811 = vrot.lane.b32.xlu1 %v2738_v22, %s6796_s23  ;;  %v4199_v51 = vadd.f32 %v6435_v59, %v8310_v54  ;;  %v4190_v56 = vpop.f32.mrb[19].mxu1  ;;  %v4416_v60 = vmax.f32 %v4196_v6, 0.0  ;;  %v3494_v12 = vsel %vm3436_vm10, %v3419_v58, %v2873_v44  ;;  %v3121_v22 = vsel %vm1893_vm2, %v6736_v15, %v8882_v39  ;;  %v8948_v59 = vld [vmem:[%s9672_s4] ss:$0 sm:$0xff] }
 0x32f   : > { %v4191_v43 = vadd.f32 %v8310_v54, %v4190_v56  ;;  %v3042_v50 = vpop.permute.xlu0 %3041  ;;  %v4414_v28 = vmax.f32 %v4188_v55, 0.0  ;;  %v3569_v57 = vsel %vm3511_vm9, %v3494_v12, %v2963_v3  ;;  %v6738_v56 = vld [vmem:[#allocation2 + $0xf0] sm:$0xff] }
 0x330   : > { %v8900_v52 = vpop.permute.xlu1 %2366  ;;  %v4417_v11 = vmax.f32 %v4199_v51, 0.0  ;;  %v3642_v54 = vsel %vm3586_vm11, %v3567_v10, %v3042_v50 }
 0x331   : > { %v4415_v42 = vmax.f32 %v4191_v43, 0.0  ;;  %v3863_v63 = vshrl.u32 %v3642_v54, 16  ;;  %2809 = vrot.lane.b32.xlu0 %v8855_v41, %s6796_s23  ;;  %v3866_v21 = vshll.u32 %v3642_v54, 16 }
 0x332   : > { %2888 = vrot.lane.b32.xlu1 %v8867_v32, %s6795_s22  ;;  %v4477_v9 = vpack.c.bf16 %v4417_v11, %v4416_v60 }
 0x333   : > { %v4476_v26 = vpack.c.bf16 %v4415_v42, %v4414_v28  ;;  %v3865_v14 = vrot.slane %v3863_v63, 7  ;;  %v3044_v47 = vpop.permute.xlu0 %3043 }
 0x334   : > { %v2552_v2 = vpop.permute.xlu1 %2551  ;;  %v3644_v32 = vsel %vm3586_vm11, %v3569_v57, %v3044_v47 }
 0x335   : > { %6506 = vmatprep.mubr.msk.bf16.mxu0 %vm1893_vm2, %v4476_v26  ;;  %v3868_v30 = vor.u32 %v3866_v21, %v3865_v14  ;;  %v3870_v41 = vshrl.u32 %v3644_v32, 16  ;;  %2886 = vrot.lane.b32.xlu0 %v8765_v13, %s6795_s22  ;;  %v3873_v27 = vshll.u32 %v3644_v32, 16 }
 0x336   : > { %2978 = vrot.lane.b32.xlu1 %v2905_v48, %s6799_s26  ;;  %6507 = vmatmul.mubr.msk.bf16.gmra.mrb[96].mxu0 %vm1893_vm2, %v4477_v9  ;;  %v3123_v48 = vsel %vm1893_vm2, %v6738_v56, %v8900_v52 }
 0x337   : > { %v8925_v31 = vrot.slane %v3870_v41, 7  ;;  %v2550_v3 = vpop.permute.xlu0 %2549  ;;  %v3869_v62 = vsel %vm3677_vm12, %v8834_v40, %v3868_v30  ;;  %v3198_v49 = vsel %vm3136_vm15, %v3123_v48, %v2552_v2 }
 0x338   : > { %v2629_v44 = vpop.permute.xlu1 %2628  ;;  %6464 = vmatprep.mubr.msk.bf16.mxu1 %vm3960_vm13, %v3869_v62  ;;  %v3196_v13 = vsel %vm3136_vm15, %v3121_v22, %v2550_v3 }
 0x339   : > { %v3875_v17 = vor.u32 %v3873_v27, %v8925_v31  ;;  %2976 = vrot.lane.b32.xlu0 %v2902_v1, %s6799_s26  ;;  %v3273_v10 = vsel %vm3211_vm5, %v3198_v49, %v2629_v44  ;;  %s9310_s26 = scalar_lea.vmem %s9677_s9, %s6647_s13 }
 0x33a   : > { %3059 = vrot.lane.b32.xlu1 %v2986_v37, %s6798_s25 }
 0x33b   : > { %v2627_v53 = vpop.permute.xlu0 %2626  ;;  %v3876_v61 = vsel %vm3677_vm12, %v3865_v14, %v3875_v17 }
 0x33c   : > { %v2719_v19 = vpop.permute.xlu1 %2718  ;;  %6465 = vmatmul.mubr.msk.bf16.gmra.mrb[48].mxu1 %vm3960_vm13, %v3876_v61  ;;  %v3271_v55 = vsel %vm3211_vm5, %v3196_v13, %v2627_v53 }
 0x33d   : > { %3057 = vrot.lane.b32.xlu0 %v2984_v38, %s6798_s25  ;;  %v3348_v52 = vsel %vm3286_vm6, %v3273_v10, %v2719_v19 }
 0x33f   : > { %v2717_v8 = vpop.permute.xlu0 %2716 }
 0x340   : > { %v2800_v40 = vpop.permute.xlu1 %2799  ;;  %v3346_v25 = vsel %vm3286_vm6, %v3271_v55, %v2717_v8 }
 0x341   : > { %v3423_v9 = vsel %vm3361_vm7, %v3348_v52, %v2800_v40 }
 0x343   : > { %v2798_v5 = vpop.permute.xlu0 %2797 }
 0x344   : > { %v2877_v46 = vpop.permute.xlu1 %2876  ;;  %v3421_v34 = vsel %vm3361_vm7, %v3346_v25, %v2798_v5 }
 0x345   : > { %v3498_v12 = vsel %vm3436_vm10, %v3423_v9, %v2877_v46 }
 0x347   : > { %v2875_v18 = vpop.permute.xlu0 %2874 }
 0x348   : > { %v2967_v6 = vpop.permute.xlu1 %2966  ;;  %v3496_v33 = vsel %vm3436_vm10, %v3421_v34, %v2875_v18  ;;  %v6739_v18 = vld [vmem:[#allocation2 + $0xf8] sm:$0xff] }
 0x349   : > { %v3573_v0 = vsel %vm3511_vm9, %v3498_v12, %v2967_v6 }
 0x34b   : > { %v6438_v36 = vpop.f32.mrb[20].mxu1  ;;  %v2965_v4 = vpop.permute.xlu0 %2964 }
 0x34c   : > { %v8942_v45 = vpop.permute.xlu1 %2368  ;;  %v4212_v20 = vadd.f32 %v8948_v59, %v6438_v36  ;;  %v4203_v35 = vpop.f32.mrb[21].mxu1  ;;  %v3571_v50 = vsel %vm3511_vm9, %v3496_v33, %v2965_v4 }
 0x34d   : > { %v4204_v39 = vadd.f32 %v8948_v59, %v4203_v35  ;;  %v6439_v51 = vpop.f32.mrb[22].mxu1  ;;  %v3125_v15 = vsel %vm1893_vm2, %v6739_v18, %v8942_v45 }
 0x34e   : > { %v4215_v16 = vadd.f32 %v8948_v59, %v6439_v51  ;;  %v4206_v43 = vpop.f32.mrb[23].mxu1  ;;  %v4420_v11 = vmax.f32 %v4212_v20, 0.0  ;;  %v6740_v51 = vld [vmem:[#allocation2 + $0x100] sm:$0xff] }
 0x34f   : > { %v4207_v7 = vadd.f32 %v8948_v59, %v4206_v43  ;;  %v3046_v28 = vpop.permute.xlu0 %3045  ;;  %v4418_v42 = vmax.f32 %v4204_v39, 0.0 }
 0x350   : > { %v2371_v60 = vpop.permute.xlu1 %2370  ;;  %v4421_v23 = vmax.f32 %v4215_v16, 0.0  ;;  %v3646_v58 = vsel %vm3586_vm11, %v3571_v50, %v3046_v28 }
 0x351   : > { %v4419_v54 = vmax.f32 %v4207_v7, 0.0  ;;  %v3877_v24 = vshrl.u32 %v3646_v58, 16  ;;  %v3880_v14 = vshll.u32 %v3646_v58, 16  ;;  %v3127_v56 = vsel %vm1893_vm2, %v6740_v51, %v2371_v60 }
 0x352   : > { %v4479_v63 = vpack.c.bf16 %v4421_v23, %v4420_v11 }
 0x353   : > { %v4478_v26 = vpack.c.bf16 %v4419_v54, %v4418_v42  ;;  %v3879_v57 = vrot.slane %v3877_v24, 7  ;;  %v3048_v21 = vpop.permute.xlu0 %3047 }
 0x354   : > { %v2556_v2 = vpop.permute.xlu1 %2555  ;;  %v3648_v47 = vsel %vm3586_vm11, %v3573_v0, %v3048_v21 }
 0x355   : > { %6510 = vmatprep.mubr.msk.bf16.mxu0 %vm1893_vm2, %v4478_v26  ;;  %v3882_v32 = vor.u32 %v3880_v14, %v3879_v57  ;;  %v3884_v30 = vshrl.u32 %v3648_v47, 16  ;;  %v3887_v44 = vshll.u32 %v3648_v47, 16  ;;  %v3202_v16 = vsel %vm3136_vm15, %v3127_v56, %v2556_v2 }
 0x356   : > { %6511 = vmatmul.mubr.msk.bf16.gmra.mrb[100].mxu0 %vm1893_vm2, %v4479_v63 }
 0x357   : > { %v8970_v37 = vrot.slane %v3884_v30, 7  ;;  %v2554_v1 = vpop.permute.xlu0 %2553  ;;  %v3883_v27 = vsel %vm3677_vm12, %v8925_v31, %v3882_v32 }
 0x358   : > { %v2633_v41 = vpop.permute.xlu1 %2632  ;;  %6468 = vmatprep.mubr.msk.bf16.mxu1 %vm3960_vm13, %v3883_v27  ;;  %v3200_v13 = vsel %vm3136_vm15, %v3125_v15, %v2554_v1 }
 0x359   : > { %v3889_v3 = vor.u32 %v3887_v44, %v8970_v37  ;;  %v3277_v10 = vsel %vm3211_vm5, %v3202_v16, %v2633_v41 }
 0x35b   : > { %v2631_v17 = vpop.permute.xlu0 %2630  ;;  %v3890_v19 = vsel %vm3677_vm12, %v3879_v57, %v3889_v3 }
 0x35c   : > { %v2723_v62 = vpop.permute.xlu1 %2722  ;;  %6469 = vmatmul.mubr.msk.bf16.gmra.mrb[52].mxu1 %vm3960_vm13, %v3890_v19  ;;  %v3275_v55 = vsel %vm3211_vm5, %v3200_v13, %v2631_v17 }
 0x35d   : > { %v3352_v23 = vsel %vm3286_vm6, %v3277_v10, %v2723_v62 }
 0x35f   : > { %v2721_v53 = vpop.permute.xlu0 %2720 }
 0x360   : > { %v2804_v38 = vpop.permute.xlu1 %2803  ;;  %v3350_v35 = vsel %vm3286_vm6, %v3275_v55, %v2721_v53 }
 0x361   : > { %v3427_v54 = vsel %vm3361_vm7, %v3352_v23, %v2804_v38 }
 0x363   : > { %v2802_v40 = vpop.permute.xlu0 %2801 }
 0x364   : > { %v2881_v61 = vpop.permute.xlu1 %2880  ;;  %v3425_v45 = vsel %vm3361_vm7, %v3350_v35, %v2802_v40 }
 0x365   : > { %v3502_v24 = vsel %vm3436_vm10, %v3427_v54, %v2881_v61 }
 0x367   : > { %v8978_v8 = vpop.f32.mrb[76].mxu0  ;;  %v2879_v31 = vpop.permute.xlu0 %2878 }
 0x368   : > { %v2971_v46 = vpop.permute.xlu1 %2970  ;;  %v8980_v5 = vpop.f32.mrb[77].mxu0  ;;  %v3500_v43 = vsel %vm3436_vm10, %v3425_v45, %v2879_v31 }
 0x369   : > { %v8982_v6 = vpop.f32.mrb[78].mxu0  ;;  %v3577_v2 = vsel %vm3511_vm9, %v3502_v24, %v2971_v46 }
 0x36a   : > { %v8986_v22 = vpop.f32.mrb[79].mxu0 }
 0x36b   : > { %v6442_v20 = vpop.f32.mrb[24].mxu1  ;;  %v2969_v4 = vpop.permute.xlu0 %2968 }
 0x36c   : > { %v8989_v36 = vpop.permute.xlu1 %2372  ;;  %v4228_v25 = vadd.f32 %v8948_v59, %v6442_v20  ;;  %v4219_v39 = vpop.f32.mrb[25].mxu1  ;;  %v3575_v11 = vsel %vm3511_vm9, %v3500_v43, %v2969_v4  ;;  %v6741_v43 = vld [vmem:[#allocation2 + $0x108] sm:$0xff] }
 0x36d   : > { %v4220_v48 = vadd.f32 %v8948_v59, %v4219_v39  ;;  %v6443_v34 = vpop.f32.mrb[26].mxu1 }
 0x36e   : > { %v4231_v49 = vadd.f32 %v8948_v59, %v6443_v34  ;;  %v4222_v33 = vpop.f32.mrb[27].mxu1  ;;  %v4424_v28 = vmax.f32 %v4228_v25, 0.0 }
 0x36f   : > { %v4223_v60 = vadd.f32 %v8948_v59, %v4222_v33  ;;  %v3050_v50 = vpop.permute.xlu0 %3049  ;;  %v4422_v58 = vmax.f32 %v4220_v48, 0.0 }
 0x370   : > { %v9000_v7 = vpop.permute.xlu1 %2374  ;;  %v4425_v52 = vmax.f32 %v4231_v49, 0.0  ;;  %v3650_v42 = vsel %vm3586_vm11, %v3575_v11, %v3050_v50  ;;  %v3129_v49 = vsel %vm1893_vm2, %v6741_v43, %v8989_v36  ;;  %v6742_v36 = vld [vmem:[#allocation2 + $0x110] sm:$0xff] }
 0x371   : > { %v4423_v9 = vmax.f32 %v4223_v60, 0.0  ;;  %v3891_v63 = vshrl.u32 %v3650_v42, 16  ;;  %v3894_v14 = vshll.u32 %v3650_v42, 16  ;;  %v3131_v42 = vsel %vm1893_vm2, %v6742_v36, %v9000_v7 }
 0x372   : > { %v4481_v12 = vpack.c.bf16 %v4425_v52, %v4424_v28 }
 0x373   : > { %v4480_v0 = vpack.c.bf16 %v4423_v9, %v4422_v58  ;;  %v3893_v57 = vrot.slane %v3891_v63, 7  ;;  %v3052_v21 = vpop.permute.xlu0 %3051 }
 0x374   : > { %v2560_v26 = vpop.permute.xlu1 %2559  ;;  %v3652_v47 = vsel %vm3586_vm11, %v3577_v2, %v3052_v21 }
 0x375   : > { %v3896_v32 = vor.u32 %v3894_v14, %v3893_v57  ;;  %v3898_v30 = vshrl.u32 %v3652_v47, 16  ;;  %6514 = vmatprep.mubr.msk.bf16.mxu0 %vm1893_vm2, %v4480_v0  ;;  %v3901_v1 = vshll.u32 %v3652_v47, 16  ;;  %v3206_v58 = vsel %vm3136_vm15, %v3131_v42, %v2560_v26 }
 0x376   : > { %6515 = vmatmul.mubr.msk.bf16.gmra.mrb[104].mxu0 %vm1893_vm2, %v4481_v12 }
 0x377   : > { %v9013_v44 = vrot.slane %v3898_v30, 7  ;;  %v2558_v27 = vpop.permute.xlu0 %2557  ;;  %v3897_v3 = vsel %vm3677_vm12, %v8970_v37, %v3896_v32 }
 0x378   : > { %v2637_v41 = vpop.permute.xlu1 %2636  ;;  %6472 = vmatprep.mubr.msk.bf16.mxu1 %vm3960_vm13, %v3897_v3  ;;  %v3204_v10 = vsel %vm3136_vm15, %v3129_v49, %v2558_v27 }
 0x379   : > { %v3903_v62 = vor.u32 %v3901_v1, %v9013_v44  ;;  %v3281_v24 = vsel %vm3211_vm5, %v3206_v58, %v2637_v41 }
 0x37b   : > { %v2635_v19 = vpop.permute.xlu0 %2634  ;;  %v3904_v38 = vsel %vm3677_vm12, %v3893_v57, %v3903_v62 }
 0x37c   : > { %v2727_v17 = vpop.permute.xlu1 %2726  ;;  %6473 = vmatmul.mubr.msk.bf16.gmra.mrb[56].mxu1 %vm3960_vm13, %v3904_v38  ;;  %v3279_v50 = vsel %vm3211_vm5, %v3204_v10, %v2635_v19 }
 0x37d   : > { %v3356_v57 = vsel %vm3286_vm6, %v3281_v24, %v2727_v17 }
 0x37f   : > { %v6446_v61 = vpop.f32.mrb[28].mxu1  ;;  %v2725_v40 = vpop.permute.xlu0 %2724 }
 0x380   : > { %v2808_v53 = vpop.permute.xlu1 %2807  ;;  %v4244_v46 = vadd.f32 %v8948_v59, %v6446_v61  ;;  %v4235_v31 = vpop.f32.mrb[29].mxu1  ;;  %v3354_v52 = vsel %vm3286_vm6, %v3279_v50, %v2725_v40 }
 0x381   : > { %v4236_v18 = vadd.f32 %v8948_v59, %v4235_v31  ;;  %v6447_v15 = vpop.f32.mrb[30].mxu1  ;;  %v3431_v47 = vsel %vm3361_vm7, %v3356_v57, %v2808_v53 }
 0x382   : > { %v4247_v37 = vadd.f32 %v8948_v59, %v6447_v15  ;;  %v4238_v13 = vpop.f32.mrb[31].mxu1  ;;  %v4428_v35 = vmax.f32 %v4244_v46, 0.0 }
 0x383   : > { %v4239_v20 = vadd.f32 %v8948_v59, %v4238_v13  ;;  %v2806_v4 = vpop.permute.xlu0 %2805  ;;  %v4426_v39 = vmax.f32 %v4236_v18, 0.0 }
 0x384   : > { %v2885_v55 = vpop.permute.xlu1 %2884  ;;  %v4429_v25 = vmax.f32 %v4247_v37, 0.0  ;;  %v3429_v54 = vsel %vm3361_vm7, %v3354_v52, %v2806_v4 }
 0x385   : > { %v4427_v51 = vmax.f32 %v4239_v20, 0.0  ;;  %v3506_v1 = vsel %vm3436_vm10, %v3431_v47, %v2885_v55 }
 0x386   : > { %v4483_v56 = vpack.c.bf16 %v4429_v25, %v4428_v35 }
 0x387   : > { %v4482_v48 = vpack.c.bf16 %v4427_v51, %v4426_v39  ;;  %v2883_v34 = vpop.permute.xlu0 %2882 }
 0x388   : > { %v2975_v45 = vpop.permute.xlu1 %2974  ;;  %v3504_v9 = vsel %vm3436_vm10, %v3429_v54, %v2883_v34 }
 0x389   : > { %v9025_v16 = vpop.f32.mrb[80].mxu0  ;;  %6518 = vmatprep.mubr.msk.bf16.mxu0 %vm1893_vm2, %v4482_v48  ;;  %v3581_v62 = vsel %vm3511_vm9, %v3506_v1, %v2975_v45 }
 0x38a   : > { %v9030_v33 = vpop.f32.mrb[81].mxu0  ;;  %6519 = vmatmul.mubr.msk.bf16.gmra.mrb[108].mxu0 %vm1893_vm2, %v4483_v56 }
 0x38b   : > { %v9036_v60 = vpop.f32.mrb[82].mxu0  ;;  %v2973_v23 = vpop.permute.xlu0 %2972 }
 0x38c   : > { %v9034_v11 = vpop.permute.xlu1 %2376  ;;  %v9039_v28 = vpop.f32.mrb[83].mxu0  ;;  %v3579_v12 = vsel %vm3511_vm9, %v3504_v9, %v2973_v23  ;;  %v6743_v9 = vld [vmem:[#allocation2 + $0x118] sm:$0xff] }
 0x38d   : > { %v3133_v24 = vsel %vm1893_vm2, %v6743_v9, %v9034_v11 }
 0x38f   : > { %v6450_v2 = vpop.f32.mrb[32].mxu1  ;;  %v3054_v0 = vpop.permute.xlu0 %3053 }
 0x390   : > { %v2379_v63 = vpop.permute.xlu1 %2378  ;;  %v4260_v14 = vadd.f32 %v8948_v59, %v6450_v2  ;;  %v3654_v21 = vsel %vm3586_vm11, %v3579_v12, %v3054_v0  ;;  %v4251_v7 = vpop.f32.mrb[33].mxu1 }
 0x391   : > { %v3905_v32 = vshrl.u32 %v3654_v21, 16  ;;  %v4252_v26 = vadd.f32 %v8948_v59, %v4251_v7  ;;  %v6451_v30 = vpop.f32.mrb[34].mxu1  ;;  %v3908_v19 = vshll.u32 %v3654_v21, 16 }
 0x392   : > { %v4263_v41 = vadd.f32 %v8948_v59, %v6451_v30  ;;  %v4254_v27 = vpop.f32.mrb[35].mxu1  ;;  %v4432_v40 = vmax.f32 %v4260_v14, 0.0 }
 0x393   : > { %v3907_v17 = vrot.slane %v3905_v32, 7  ;;  %v4255_v38 = vadd.f32 %v8948_v59, %v4254_v27  ;;  %v3056_v61 = vpop.permute.xlu0 %3055  ;;  %v4430_v18 = vmax.f32 %v4252_v26, 0.0 }
 0x394   : > { %v2564_v3 = vpop.permute.xlu1 %2563  ;;  %v4433_v46 = vmax.f32 %v4263_v41, 0.0  ;;  %v3656_v53 = vsel %vm3586_vm11, %v3581_v62, %v3056_v61 }
 0x395   : > { %v3910_v31 = vor.u32 %v3908_v19, %v3907_v17  ;;  %v4431_v15 = vmax.f32 %v4255_v38, 0.0  ;;  %v3912_v37 = vshrl.u32 %v3656_v53, 16  ;;  %v3915_v35 = vshll.u32 %v3656_v53, 16 }
 0x396   : > { %v4485_v13 = vpack.c.bf16 %v4433_v46, %v4432_v40 }
 0x397   : > { %v4484_v20 = vpack.c.bf16 %v4431_v15, %v4430_v18  ;;  %v9059_v4 = vrot.slane %v3912_v37, 7  ;;  %v2562_v25 = vpop.permute.xlu0 %2561  ;;  %v3911_v39 = vsel %vm3677_vm12, %v9013_v44, %v3910_v31  ;;  %v3135_v44 = vsel %vm1893_vm2, %v8647_v29, %v2379_v63 }
 0x398   : > { %v2641_v55 = vpop.permute.xlu1 %2640  ;;  %6476 = vmatprep.mubr.msk.bf16.mxu1 %vm3960_vm13, %v3911_v39  ;;  %v3210_v50 = vsel %vm3136_vm15, %v3135_v44, %v2564_v3  ;;  %v3208_v29 = vsel %vm3136_vm15, %v3133_v24, %v2562_v25  ;;  %vm9693_vm15 = vmmov %vm9689_vm0 }
 0x399   : > { %v3917_v51 = vor.u32 %v3915_v35, %v9059_v4  ;;  %6522 = vmatprep.mubr.msk.bf16.mxu0 %vm1893_vm2, %v4484_v20  ;;  %v3285_v23 = vsel %vm3211_vm5, %v3210_v50, %v2641_v55 }
 0x39a   : > { %6523 = vmatmul.mubr.msk.bf16.gmra.mrb[112].mxu0 %vm1893_vm2, %v4485_v13 }
 0x39b   : > { %v2639_v45 = vpop.permute.xlu0 %2638  ;;  %v3918_v48 = vsel %vm3677_vm12, %v3907_v17, %v3917_v51 }
 0x39c   : > { %v2731_v56 = vpop.permute.xlu1 %2730  ;;  %6477 = vmatmul.mubr.msk.bf16.gmra.mrb[60].mxu1 %vm3960_vm13, %v3918_v48  ;;  %v3283_v14 = vsel %vm3211_vm5, %v3208_v29, %v2639_v45  ;;  %vm9694_vm5 = vmmov %vm9689_vm0 }
 0x39d   : > { %v3360_v36 = vsel %vm3286_vm6, %v3285_v23, %v2731_v56  ;;  %v6748_v23 = vld [vmem:[%s6871_s16 + $0x20] sm:$0xff]  }
 0x39f   : > { %v2729_v43 = vpop.permute.xlu0 %2728 }
 0x3a0   : > { %v2812_v34 = vpop.permute.xlu1 %2811  ;;  %v3358_v11 = vsel %vm3286_vm6, %v3283_v14, %v2729_v43  ;;  %v6745_v43 = vld [vmem:[%s6871_s16 + $0x8] sm:$0xff]   ;;  %vm9695_vm6 = vmmov %vm9689_vm0 }
 0x3a1   : > { %v3435_v54 = vsel %vm3361_vm7, %v3360_v36, %v2812_v34  ;;  %v6744_v34 = vld [vmem:[%s6871_s16] sm:$0xff]  }
 0x3a3   : > { %v2810_v10 = vpop.permute.xlu0 %2809 }
 0x3a4   : > { %v2889_v49 = vpop.permute.xlu1 %2888  ;;  %v3433_v32 = vsel %vm3361_vm7, %v3358_v11, %v2810_v10  ;;  %v6747_v10 = vld [vmem:[%s6871_s16 + $0x18] sm:$0xff]   ;;  %vm9696_vm7 = vmmov %vm9689_vm0 }
 0x3a5   : > { %v3510_v12 = vsel %vm3436_vm10, %v3435_v54, %v2889_v49  ;;  %v6746_v49 = vld [vmem:[%s6871_s16 + $0x10] sm:$0xff]  }
 0x3a7   : > { %v2887_v42 = vpop.permute.xlu0 %2886 }
 0x3a8   : > { %v2979_v52 = vpop.permute.xlu1 %2978  ;;  %v3508_v26 = vsel %vm3436_vm10, %v3433_v32, %v2887_v42  ;;  %vm9698_vm10 = vmmov %vm9689_vm0 }
 0x3a9   : > { %v9075_v58 = vpop.f32.mrb[84].mxu0  ;;  %v3585_v63 = vsel %vm3511_vm9, %v3510_v12, %v2979_v52  ;;  %v6749_v12 = vld [vmem:[%s6871_s16 + $0x28] sm:$0xff]  }
 0x3aa   : > { %v9080_v2 = vpop.f32.mrb[85].mxu0 }
 0x3ab   : > { %v9084_v57 = vpop.f32.mrb[86].mxu0  ;;  %v2977_v7 = vpop.permute.xlu0 %2976 }
 0x3ac   : > { %v3060_v0 = vpop.permute.xlu1 %3059  ;;  %v9088_v47 = vpop.f32.mrb[87].mxu0  ;;  %v3583_v1 = vsel %vm3511_vm9, %v3508_v26, %v2977_v7  ;;  %vm9697_vm9 = vmmov %vm9689_vm0 }
 0x3ad   : > { %v3660_v21 = vsel %vm3586_vm11, %v3585_v63, %v3060_v0  ;;  %v6750_v0 = vld [vmem:[%s6871_s16 + $0x30] sm:$0xff]  }
 0x3ae   : > { %v3926_v30 = vshrl.u32 %v3660_v21, 16  ;;  %v3929_v37 = vshll.u32 %v3660_v21, 16 }
 0x3af   : > { %v6454_v41 = vpop.f32.mrb[36].mxu1  ;;  %v3058_v27 = vpop.permute.xlu0 %3057 }
 0x3b0   : > { %v4276_v3 = vadd.f32 %v8948_v59, %v6454_v41  ;;  %v3658_v62 = vsel %vm3586_vm11, %v3583_v1, %v3058_v27  ;;  %v4267_v17 = vpop.f32.mrb[37].mxu1  ;;  %v3928_v40 = vrot.slane %v3926_v30, 7  ;;  %v6751_v1 = vld [vmem:[%s6871_s16 + $0x38] sm:$0xff]   ;;  %v6752_v41 = vld [vmem:[%s6871_s16 + $0x40] sm:$0xff]   ;;  %v6753_v27 = vld [vmem:[%s6871_s16 + $0x48] sm:$0xff]  }
 0x3b1   : > { %v3919_v19 = vshrl.u32 %v3658_v62, 16  ;;  %v4268_v38 = vadd.f32 %v8948_v59, %v4267_v17  ;;  %v6455_v61 = vpop.f32.mrb[38].mxu1  ;;  %v3922_v18 = vshll.u32 %v3658_v62, 16  ;;  %vm9699_vm11 = vmmov %vm9689_vm0  ;;  %v6755_v17 = vld [vmem:[%s6871_s16 + $0x58] sm:$0xff]  }
 0x3b2   : > { %v4279_v46 = vadd.f32 %v8948_v59, %v6455_v61  ;;  %v4270_v53 = vpop.f32.mrb[39].mxu1  ;;  %v4436_v13 = vmax.f32 %v4276_v3, 0.0  ;;  %v3931_v39 = vor.u32 %v3929_v37, %v3928_v40  ;;  %v6754_v3 = vld [vmem:[%s6871_s16 + $0x50] sm:$0xff]   ;;  %v6756_v61 = vld [vmem:[%s6871_s16 + $0x60] sm:$0xff]   ;;  %v6757_v37 = vld [vmem:[%s6871_s16 + $0x68] sm:$0xff]  }
 0x3b3   : > { %v3921_v31 = vrot.slane %v3919_v19, 7  ;;  %v4271_v15 = vadd.f32 %v8948_v59, %v4270_v53  ;;  %v4434_v35 = vmax.f32 %v4268_v38, 0.0 }
 0x3b4   : > { %v4437_v55 = vmax.f32 %v4279_v46, 0.0 }
 0x3b5   : > { %v3924_v20 = vor.u32 %v3922_v18, %v3921_v31  ;;  %v4435_v25 = vmax.f32 %v4271_v15, 0.0  ;;  %v3932_v48 = vsel %vm3677_vm12, %v3921_v31, %v3931_v39 }
 0x3b6   : > { %v4487_v51 = vpack.c.bf16 %v4437_v55, %v4436_v13 }
 0x3b7   : > { %v4486_v56 = vpack.c.bf16 %v4435_v25, %v4434_v35  ;;  %v3925_v45 = vsel %vm3677_vm12, %v9059_v4, %v3924_v20  ;;  %vm9700_vm12 = vmmov %vm9689_vm0  ;;  %v6758_v20 = vld [vmem:[%s6871_s16 + $0x70] sm:$0xff]  }
 0x3b8   : > { %6480 = vmatprep.mubr.msk.bf16.mxu1 %vm3960_vm13, %v3925_v45 }
 0x3b9   : > { %6481 = vmatmul.mubr.msk.bf16.gmra.mrb[64].mxu1 %vm3960_vm13, %v3932_v48  ;;  %6526 = vmatprep.mubr.msk.bf16.mxu0 %vm1893_vm2, %v4486_v56  ;;  %vm9701_vm13 = vmmov %vm9689_vm0 }
 0x3ba   : > { %6527 = vmatmul.mubr.msk.bf16.gmra.mrb[116].mxu0 %vm1893_vm2, %v4487_v51  ;;  %6560 = vmatprep.mubr.msk.bf16.mxu1 %vm9689_vm0, %v6744_v34  ;;  %v6759_v34 = vld [vmem:[%s6871_s16 + $0x78] sm:$0xff]  }
 0x3c1   : > { %6561 = vmatmul.mubr.msk.bf16.vlgmr.msra.gmra.mrb[68].mxu1 %vm9690_vm3, %v6745_v43  ;;  %v6760_v43 = vld [vmem:[%s6871_s16 + $0x80] sm:$0xff]   ;;  %vm9704_vm3 = vmmov %vm9689_vm0 }
 0x3c2   : > { %6564 = vmatprep.mubr.msk.bf16.mxu1 %vm9691_vm4, %v6746_v49  ;;  %v6761_v49 = vld [vmem:[%s6871_s16 + $0x88] sm:$0xff]   ;;  %vm9705_vm4 = vmmov %vm9689_vm0 }
 0x3c9   : > { %v9112_v4 = vpop.f32.mrb[88].mxu0  ;;  %6565 = vmatmul.mubr.msk.bf16.gmra.mrb[72].mxu1 %vm9692_vm8, %v6747_v10  ;;  %v6762_v10 = vld [vmem:[%s6871_s16 + $0x90] sm:$0xff]   ;;  %vm9706_vm8 = vmmov %vm9689_vm0 }
 0x3ca   : > { %v9116_v44 = vpop.f32.mrb[89].mxu0  ;;  %6568 = vmatprep.mubr.msk.bf16.mxu1 %vm9693_vm15, %v6748_v23  ;;  %vm9707_vm15 = vmmov %vm9689_vm0 }
 0x3cb   : > { %v9118_v50 = vpop.f32.mrb[90].mxu0 }
 0x3cc   : > { %v9122_v52 = vpop.f32.mrb[91].mxu0 }
 0x3cf   : > { %v6458_v36 = vpop.f32.mrb[40].mxu1 }
 0x3d0   : > { %v4292_v42 = vadd.f32 %v8948_v59, %v6458_v36  ;;  %v4283_v54 = vpop.f32.mrb[41].mxu1  ;;  %v6763_v36 = vld [vmem:[%s6871_s16 + $0x98] sm:$0xff]  }
 0x3d1   : > { %v4284_v9 = vadd.f32 %v8948_v59, %v4283_v54  ;;  %v6459_v24 = vpop.f32.mrb[42].mxu1  ;;  %6569 = vmatmul.mubr.msk.bf16.gmra.mrb[76].mxu1 %vm9694_vm5, %v6749_v12  ;;  %vm9708_vm5 = vmmov %vm9689_vm0 }
 0x3d2   : > { %v4295_v29 = vadd.f32 %v8948_v59, %v6459_v24  ;;  %v4286_v63 = vpop.f32.mrb[43].mxu1  ;;  %6572 = vmatprep.mubr.msk.bf16.mxu1 %vm9695_vm6, %v6750_v0  ;;  %v4440_v21 = vmax.f32 %v4292_v42, 0.0  ;;  %vm9709_vm6 = vmmov %vm9689_vm0 }
 0x3d3   : > { %v4287_v14 = vadd.f32 %v8948_v59, %v4286_v63  ;;  %v4438_v11 = vmax.f32 %v4284_v9, 0.0  ;;  %v6764_v9 = vld [vmem:[%s6871_s16 + $0xa0] sm:$0xff]  }
 0x3d4   : > { %v4441_v7 = vmax.f32 %v4295_v29, 0.0 }
 0x3d5   : > { %v4439_v32 = vmax.f32 %v4287_v14, 0.0 }
 0x3d6   : > { %v4489_v26 = vpack.c.bf16 %v4441_v7, %v4440_v21  ;;  %v6765_v21 = vld [vmem:[%s6871_s16 + $0xa8] sm:$0xff]  }
 0x3d7   : > { %v4488_v30 = vpack.c.bf16 %v4439_v32, %v4438_v11  ;;  %v6766_v32 = vld [vmem:[%s6871_s16 + $0xb0] sm:$0xff]  }
 0x3d9   : > { %6530 = vmatprep.mubr.msk.bf16.mxu0 %vm1893_vm2, %v4488_v30  ;;  %6573 = vmatmul.mubr.msk.bf16.gmra.mrb[80].mxu1 %vm9696_vm7, %v6751_v1  ;;  %vm9710_vm7 = vmmov %vm9689_vm0 }
 0x3da   : > { %6531 = vmatmul.mubr.msk.bf16.gmra.mrb[120].mxu0 %vm1893_vm2, %v4489_v26  ;;  %6576 = vmatprep.mubr.msk.bf16.mxu1 %vm9697_vm9, %v6752_v41  ;;  %vm9711_vm9 = vmmov %vm9689_vm0 }
 0x3e1   : > { %6577 = vmatmul.mubr.msk.bf16.gmra.mrb[84].mxu1 %vm9698_vm10, %v6753_v27  ;;  %vm9712_vm10 = vmmov %vm9689_vm0 }
 0x3e2   : > { %6580 = vmatprep.mubr.msk.bf16.mxu1 %vm9699_vm11, %v6754_v3  ;;  %vm9713_vm11 = vmmov %vm9689_vm0 }
 0x3e9   : > { %v9142_v62 = vpop.f32.mrb[92].mxu0  ;;  %6581 = vmatmul.mubr.msk.bf16.gmra.mrb[88].mxu1 %vm9700_vm12, %v6755_v17  ;;  %vm9714_vm12 = vmmov %vm9689_vm0 }
 0x3ea   : > { %v9146_v19 = vpop.f32.mrb[93].mxu0  ;;  %6584 = vmatprep.mubr.msk.bf16.mxu1 %vm9701_vm13, %v6756_v61  ;;  %v6767_v61 = vld [vmem:[%s6871_s16 + $0xb8] sm:$0xff]   ;;  %vm9715_vm13 = vmmov %vm9689_vm0 }
 0x3eb   : > { %v9148_v38 = vpop.f32.mrb[94].mxu0 }
 0x3ec   : > { %v9152_v40 = vpop.f32.mrb[95].mxu0 }
 0x3ef   : > { %v6462_v46 = vpop.f32.mrb[44].mxu1 }
 0x3f0   : > { %v4308_v53 = vadd.f32 %v8948_v59, %v6462_v46  ;;  %v4299_v31 = vpop.f32.mrb[45].mxu1  ;;  %v6768_v46 = vld [vmem:[%s6871_s16 + $0xc0] sm:$0xff]  }
 0x3f1   : > { %v4300_v18 = vadd.f32 %v8948_v59, %v4299_v31  ;;  %v6463_v15 = vpop.f32.mrb[46].mxu1  ;;  %6585 = vmatmul.mubr.msk.bf16.gmra.mrb[92].mxu1 %vm9702_vm1, %v6757_v37  ;;  %v6770_v31 = vld [vmem:[%s6871_s16 + $0xd0] sm:$0xff]   ;;  %vm9716_vm1 = vmmov %vm9689_vm0 }
 0x3f2   : > { %v4311_v13 = vadd.f32 %v8948_v59, %v6463_v15  ;;  %v4302_v55 = vpop.f32.mrb[47].mxu1  ;;  %6588 = vmatprep.mubr.msk.bf16.mxu1 %vm9703_vm14, %v6758_v20  ;;  %v4444_v25 = vmax.f32 %v4308_v53, 0.0  ;;  %v6769_v53 = vld [vmem:[%s6871_s16 + $0xc8] sm:$0xff]   ;;  %v6771_v15 = vld [vmem:[%s6871_s16 + $0xd8] sm:$0xff]   ;;  %vm9717_vm14 = vmmov %vm9689_vm0 }
 0x3f3   : > { %v4303_v35 = vadd.f32 %v8948_v59, %v4302_v55  ;;  %v4442_v51 = vmax.f32 %v4300_v18, 0.0  ;;  %v6772_v55 = vld [vmem:[%s6871_s16 + $0xe0] sm:$0xff]  }
 0x3f4   : > { %v4445_v39 = vmax.f32 %v4311_v13, 0.0 }
 0x3f5   : > { %v4443_v56 = vmax.f32 %v4303_v35, 0.0 }
 0x3f6   : > { %v4491_v45 = vpack.c.bf16 %v4445_v39, %v4444_v25 }
 0x3f7   : > { %v4490_v48 = vpack.c.bf16 %v4443_v56, %v4442_v51 }
 0x3f9   : > { %6534 = vmatprep.mubr.msk.bf16.mxu0 %vm1893_vm2, %v4490_v48  ;;  %6589 = vmatmul.mubr.msk.bf16.gmra.mrb[96].mxu1 %vm9689_vm0, %v6759_v34 }
 0x3fa   : > { %6535 = vmatmul.mubr.msk.bf16.gmra.mrb[124].mxu0 %vm1893_vm2, %v4491_v45  ;;  %6592 = vmatprep.mubr.msk.bf16.mxu1 %vm9704_vm3, %v6760_v43  ;;  %v6773_v45 = vld [vmem:[%s6871_s16 + $0xe8] sm:$0xff]   ;;  %v6774_v43 = vld [vmem:[%s6871_s16 + $0xf0] sm:$0xff]   ;;  %vm9718_vm3 = vmmov %vm9689_vm0 }
 0x401   : > { %6593 = vmatmul.mubr.msk.bf16.gmra.mrb[100].mxu1 %vm9705_vm4, %v6761_v49  ;;  %vm9719_vm4 = vmmov %vm9689_vm0 }
 0x402   : > { %6596 = vmatprep.mubr.msk.bf16.mxu1 %vm9706_vm8, %v6762_v10  ;;  %vm9720_vm8 = vmmov %vm9689_vm0 }
 0x409   : > { %v9172_v23 = vpop.f32.mrb[96].mxu0  ;;  %6597 = vmatmul.mubr.msk.bf16.gmra.mrb[104].mxu1 %vm9707_vm15, %v6763_v36  ;;  %vm9721_vm15 = vmmov %vm9689_vm0 }
 0x40a   : > { %v9176_v42 = vpop.f32.mrb[97].mxu0  ;;  %6600 = vmatprep.mubr.msk.bf16.mxu1 %vm9708_vm5, %v6764_v9  ;;  %vm9722_vm5 = vmmov %vm9689_vm0 }
 0x40b   : > { %v9178_v54 = vpop.f32.mrb[98].mxu0 }
 0x40c   : > { %v9182_v24 = vpop.f32.mrb[99].mxu0 }
 0x40f   : > { %v6466_v12 = vpop.f32.mrb[48].mxu1 }
 0x410   : > { %v4324_v29 = vadd.f32 %v8948_v59, %v6466_v12  ;;  %v4315_v63 = vpop.f32.mrb[49].mxu1 }
 0x411   : > { %v4316_v0 = vadd.f32 %v8948_v59, %v4315_v63  ;;  %v6467_v14 = vpop.f32.mrb[50].mxu1  ;;  %6601 = vmatmul.mubr.msk.bf16.gmra.mrb[108].mxu1 %vm9709_vm6, %v6765_v21  ;;  %v6777_v21 = vld [vmem:[%s6871_s16 + $0x108] sm:$0xff]   ;;  %vm5706_vm6 = vcmask 125952  }
 0x412   : > { %v4327_v7 = vadd.f32 %v8948_v59, %v6467_v14  ;;  %v4318_v11 = vpop.f32.mrb[51].mxu1  ;;  %6604 = vmatprep.mubr.msk.bf16.mxu1 %vm9710_vm7, %v6766_v32  ;;  %v4448_v30 = vmax.f32 %v4324_v29, 0.0  ;;  %v6776_v14 = vld [vmem:[%s6871_s16 + $0x100] sm:$0xff]   ;;  %v6779_v32 = vld [vmem:[%s6871_s16 + $0x118] sm:$0xff]  }
 0x413   : > { %v4319_v26 = vadd.f32 %v8948_v59, %v4318_v11  ;;  %v4446_v41 = vmax.f32 %v4316_v0, 0.0  ;;  %v6775_v0 = vld [vmem:[%s6871_s16 + $0xf8] sm:$0xff]  }
 0x414   : > { %v4449_v1 = vmax.f32 %v4327_v7, 0.0  ;;  %v6778_v7 = vld [vmem:[%s6871_s16 + $0x110] sm:$0xff]  }
 0x415   : > { %v4447_v27 = vmax.f32 %v4319_v26, 0.0 }
 0x416   : > { %v4493_v3 = vpack.c.bf16 %v4449_v1, %v4448_v30 }
 0x417   : > { %v4492_v17 = vpack.c.bf16 %v4447_v27, %v4446_v41 }
 0x419   : > { %6538 = vmatprep.mubr.msk.bf16.mxu0 %vm1893_vm2, %v4492_v17  ;;  %6605 = vmatmul.mubr.msk.bf16.gmra.mrb[112].mxu1 %vm9711_vm9, %v6767_v61 }
 0x41a   : > { %6539 = vmatmul.mubr.msk.bf16.gmra.mrb[128].mxu0 %vm1893_vm2, %v4493_v3  ;;  %6608 = vmatprep.mubr.msk.bf16.mxu1 %vm9712_vm10, %v6768_v46 }
 0x421   : > { %6609 = vmatmul.mubr.msk.bf16.gmra.mrb[116].mxu1 %vm9713_vm11, %v6769_v53 }
 0x422   : > { %6612 = vmatprep.mubr.msk.bf16.mxu1 %vm9714_vm12, %v6770_v31 }
 0x429   : > { %v9202_v18 = vpop.f32.mrb[100].mxu0  ;;  %6613 = vmatmul.mubr.msk.bf16.gmra.mrb[120].mxu1 %vm9715_vm13, %v6771_v15 }
 0x42a   : > { %v9206_v37 = vpop.f32.mrb[101].mxu0  ;;  %6616 = vmatprep.mubr.msk.bf16.mxu1 %vm9716_vm1, %v6772_v55 }
 0x42b   : > { %v9208_v13 = vpop.f32.mrb[102].mxu0 }
 0x42c   : > { %v9212_v20 = vpop.f32.mrb[103].mxu0 }
 0x42f   : > { %v6470_v35 = vpop.f32.mrb[52].mxu1 }
 0x430   : > { %v4340_v25 = vadd.f32 %v8948_v59, %v6470_v35  ;;  %v4331_v39 = vpop.f32.mrb[53].mxu1 }
 0x431   : > { %v4332_v51 = vadd.f32 %v8948_v59, %v4331_v39  ;;  %v6471_v56 = vpop.f32.mrb[54].mxu1  ;;  %6617 = vmatmul.mubr.msk.bf16.gmra.mrb[124].mxu1 %vm9717_vm14, %v6773_v45 }
 0x432   : > { %v4343_v48 = vadd.f32 %v8948_v59, %v6471_v56  ;;  %v4334_v34 = vpop.f32.mrb[55].mxu1  ;;  %6620 = vmatprep.mubr.msk.bf16.mxu1 %vm9689_vm0, %v6774_v43  ;;  %v4452_v10 = vmax.f32 %v4340_v25, 0.0 }
 0x433   : > { %v4335_v49 = vadd.f32 %v8948_v59, %v4334_v34  ;;  %v4450_v9 = vmax.f32 %v4332_v51, 0.0 }
 0x434   : > { %v4453_v36 = vmax.f32 %v4343_v48, 0.0 }
 0x435   : > { %v4451_v12 = vmax.f32 %v4335_v49, 0.0 }
 0x436   : > { %v4495_v29 = vpack.c.bf16 %v4453_v36, %v4452_v10 }
 0x437   : > { %v4494_v63 = vpack.c.bf16 %v4451_v12, %v4450_v9 }
 0x439   : > { %6542 = vmatprep.mubr.msk.bf16.mxu0 %vm1893_vm2, %v4494_v63  ;;  %6621 = vmatmul.mubr.msk.bf16.gmra.mrb[128].mxu1 %vm9718_vm3, %v6775_v0 }
 0x43a   : > { %6543 = vmatmul.mubr.msk.bf16.gmra.mrb[132].mxu0 %vm1893_vm2, %v4495_v29  ;;  %6624 = vmatprep.mubr.msk.bf16.mxu1 %vm9719_vm4, %v6776_v14 }
 0x441   : > { %6625 = vmatmul.mubr.msk.bf16.gmra.mrb[132].mxu1 %vm9720_vm8, %v6777_v21 }
 0x442   : > { %6628 = vmatprep.mubr.msk.bf16.mxu1 %vm9721_vm15, %v6778_v7 }
 0x449   : > { %v9232_v11 = vpop.f32.mrb[104].mxu0  ;;  %6629 = vmatmul.mubr.msk.bf16.gmra.mrb[136].mxu1 %vm9722_vm5, %v6779_v32 }
 0x44a   : > { %v9236_v26 = vpop.f32.mrb[105].mxu0 }
 0x44b   : > { %v9238_v30 = vpop.f32.mrb[106].mxu0 }
 0x44c   : > { %v9240_v1 = vpop.f32.mrb[107].mxu0 }
 0x44f   : > { %v6474_v41 = vpop.f32.mrb[56].mxu1 }
 0x450   : > { %v4356_v27 = vadd.f32 %v8948_v59, %v6474_v41  ;;  %v4347_v3 = vpop.f32.mrb[57].mxu1 }
 0x451   : > { %v4348_v17 = vadd.f32 %v8948_v59, %v4347_v3  ;;  %v6475_v61 = vpop.f32.mrb[58].mxu1 }
 0x452   : > { %v4359_v46 = vadd.f32 %v8948_v59, %v6475_v61  ;;  %v4350_v53 = vpop.f32.mrb[59].mxu1  ;;  %v4456_v15 = vmax.f32 %v4356_v27, 0.0 }
 0x453   : > { %v4351_v31 = vadd.f32 %v8948_v59, %v4350_v53  ;;  %v4454_v35 = vmax.f32 %v4348_v17, 0.0 }
 0x454   : > { %v4457_v55 = vmax.f32 %v4359_v46, 0.0 }
 0x455   : > { %v4455_v25 = vmax.f32 %v4351_v31, 0.0 }
 0x456   : > { %v4497_v39 = vpack.c.bf16 %v4457_v55, %v4456_v15  ;;  %v9276_v55 = vld [vmem:[%s9674_s6] ss:$0 sm:$0xff] }
 0x457   : > { %v4496_v51 = vpack.c.bf16 %v4455_v25, %v4454_v35 }
 0x459   : > { %6546 = vmatprep.mubr.msk.bf16.mxu0 %vm1893_vm2, %v4496_v51 }
 0x45a   : > { %6547 = vmatmul.mubr.msk.bf16.gmra.mrb[136].mxu0 %vm1893_vm2, %v4497_v39 }
 0x45d   : > { %v9248_v56 = vpop.f32.mrb[108].mxu0 }
 0x45e   : > { %v9250_v45 = vpop.f32.mrb[109].mxu0 }
 0x45f   : > { %v9252_v48 = vpop.f32.mrb[110].mxu0 }
 0x460   : > { %v9254_v34 = vpop.f32.mrb[111].mxu0 }
 0x46d   : > { %v9256_v43 = vpop.f32.mrb[112].mxu0 }
 0x46e   : > { %v9258_v49 = vpop.f32.mrb[113].mxu0 }
 0x46f   : > { %v6478_v10 = vpop.f32.mrb[60].mxu1  ;;  %v9260_v36 = vpop.f32.mrb[114].mxu0 }
 0x470   : > { %v4372_v9 = vadd.f32 %v8948_v59, %v6478_v10  ;;  %v4363_v12 = vpop.f32.mrb[61].mxu1  ;;  %v9263_v29 = vpop.f32.mrb[115].mxu0 }
 0x471   : > { %v4364_v63 = vadd.f32 %v8948_v59, %v4363_v12  ;;  %v6479_v0 = vpop.f32.mrb[62].mxu1 }
 0x472   : > { %v4375_v14 = vadd.f32 %v8948_v59, %v6479_v0  ;;  %v4366_v21 = vpop.f32.mrb[63].mxu1  ;;  %v4460_v32 = vmax.f32 %v4372_v9, 0.0  ;;  %v4664_v0 = vadd.f32 %v8978_v8, %v9276_v55  ;;  %v4659_v8 = vadd.f32 %v9276_v55, %v8986_v22 }
 0x473   : > { %v4367_v7 = vadd.f32 %v8948_v59, %v4366_v21  ;;  %v4458_v27 = vmax.f32 %v4364_v63, 0.0 }
 0x474   : > { %v4461_v41 = vmax.f32 %v4375_v14, 0.0  ;;  %v4943_v22 = vmax.f32 %v4659_v8, 0.0 }
 0x475   : > { %v4459_v3 = vmax.f32 %v4367_v7, 0.0  ;;  %v4656_v7 = vadd.f32 %v9276_v55, %v8980_v5 }
 0x476   : > { %v4499_v17 = vpack.c.bf16 %v4461_v41, %v4460_v32 }
 0x477   : > { %v4498_v61 = vpack.c.bf16 %v4459_v3, %v4458_v27  ;;  %v9294_v27 = vld [vmem:[%s9676_s8] ss:$0 sm:$0xff] }
 0x479   : > { %6550 = vmatprep.mubr.msk.bf16.mxu0 %vm1893_vm2, %v4498_v61 }
 0x47a   : > { %6551 = vmatmul.mubr.msk.bf16.gmra.mrb[140].mxu0 %vm1893_vm2, %v4499_v17 }
 0x48c   : > { %v6482_v46 = vpop.f32.mrb[64].mxu1 }
 0x48d   : > { %v4388_v53 = vadd.f32 %v8948_v59, %v6482_v46  ;;  %v4379_v31 = vpop.f32.mrb[65].mxu1  ;;  %v9271_v15 = vpop.f32.mrb[116].mxu0  ;;  %v4944_v46 = vmax.f32 %v4664_v0, 0.0 }
 0x48e   : > { %v4380_v35 = vadd.f32 %v8948_v59, %v4379_v31  ;;  %v6483_v25 = vpop.f32.mrb[66].mxu1  ;;  %v9279_v39 = vpop.f32.mrb[117].mxu0  ;;  %v4942_v31 = vmax.f32 %v4656_v7, 0.0 }
 0x48f   : > { %v4391_v51 = vadd.f32 %v8948_v59, %v6483_v25  ;;  %v4382_v10 = vpop.f32.mrb[67].mxu1  ;;  %v9282_v9 = vpop.f32.mrb[118].mxu0  ;;  %v4464_v14 = vmax.f32 %v4388_v53, 0.0 }
 0x490   : > { %v4383_v12 = vadd.f32 %v8948_v59, %v4382_v10  ;;  %v9285_v63 = vpop.f32.mrb[119].mxu0  ;;  %v4462_v32 = vmax.f32 %v4380_v35, 0.0  ;;  %v4667_v59 = vadd.f32 %v8982_v6, %v9276_v55 }
 0x491   : > { %v4465_v21 = vmax.f32 %v4391_v51, 0.0 }
 0x492   : > { %v4463_v41 = vmax.f32 %v4383_v12, 0.0  ;;  %v4945_v51 = vmax.f32 %v4667_v59, 0.0 }
 0x493   : > { %v4501_v3 = vpack.c.bf16 %v4465_v21, %v4464_v14  ;;  %v4680_v21 = vadd.f32 %v9025_v16, %v9276_v55 }
 0x494   : > { %v4500_v17 = vpack.c.bf16 %v4463_v41, %v4462_v32  ;;  %v6562_v61 = vpop.f32.mrb[68].mxu1  ;;  %v4672_v41 = vadd.f32 %v9276_v55, %v9030_v33 }
 0x495   : > { %v5068_v5 = vadd.f32 %v6562_v61, %v9294_v27  ;;  %v5059_v53 = vpop.f32.mrb[69].mxu1  ;;  %v4675_v61 = vadd.f32 %v9276_v55, %v9039_v28 }
 0x496   : > { %v5060_v35 = vadd.f32 %v9294_v27, %v5059_v53  ;;  %6554 = vmatprep.mubr.msk.bf16.mxu0 %vm1893_vm2, %v4500_v17  ;;  %v6563_v25 = vpop.f32.mrb[70].mxu1  ;;  %v4683_v17 = vadd.f32 %v9036_v60, %v9276_v55 }
 0x497   : > { %v5348_v10 = vadd.f32 %v5068_v5, %v4944_v46  ;;  %v5071_v6 = vadd.f32 %v6563_v25, %v9294_v27  ;;  %6555 = vmatmul.mubr.msk.bf16.gmra.mrb[144].mxu0 %vm1893_vm2, %v4501_v3  ;;  %v5062_v12 = vpop.f32.mrb[71].mxu1  ;;  %v4948_v5 = vmax.f32 %v4680_v21, 0.0 }
 0x498   : > { %v5346_v0 = vadd.f32 %v5060_v35, %v4942_v31  ;;  %v5063_v14 = vadd.f32 %v9294_v27, %v5062_v12  ;;  %v4946_v31 = vmax.f32 %v4672_v41, 0.0  ;;  %v4949_v25 = vmax.f32 %v4683_v17, 0.0 }
 0x499   : > { %v6106_v7 = vpack.c.bf16 %v5348_v10, %v5348_v10  ;;  %v5349_v32 = vadd.f32 %v5071_v6, %v4945_v51  ;;  %v4947_v6 = vmax.f32 %v4675_v61, 0.0  ;;  %v4691_v17 = vadd.f32 %v9276_v55, %v9088_v47 }
 0x49a   : > { %v6104_v59 = vpack.c.bf16 %v5346_v0, %v5346_v0  ;;  %v5347_v3 = vadd.f32 %v5063_v14, %v4943_v22  ;;  %v4696_v0 = vadd.f32 %v9075_v58, %v9276_v55 }
 0x49b   : > { %5709 = vst.msk [vmem:[%s9310_s26 + $0x8] sm:$0xf] %vm5706_vm6, %v6106_v7  ;;  %v6107_v8 = vpack.c.bf16 %v5349_v32, %v5349_v32  ;;  %v4688_v7 = vadd.f32 %v9276_v55, %v9080_v2 }
 0x49c   : > { %5707 = vst.msk [vmem:[%s9310_s26] sm:$0xf] %vm5706_vm6, %v6104_v59  ;;  %v6105_v16 = vpack.c.bf16 %v5347_v3, %v5347_v3  ;;  %v6566_v46 = vpop.f32.mrb[72].mxu1  ;;  %v4699_v59 = vadd.f32 %v9084_v57, %v9276_v55  ;;  %v4952_v61 = vmax.f32 %v4696_v0, 0.0  ;;  %v4715_v0 = vadd.f32 %v9118_v50, %v9276_v55 }
 0x49d   : > { %5710 = vst.msk [vmem:[%s9310_s26 + $0xc] sm:$0xf] %vm5706_vm6, %v6107_v8  ;;  %v5084_v33 = vadd.f32 %v6566_v46, %v9294_v27  ;;  %v5075_v53 = vpop.f32.mrb[73].mxu1  ;;  %v4950_v46 = vmax.f32 %v4688_v7, 0.0 }
 0x49e   : > { %5708 = vst.msk [vmem:[%s9310_s26 + $0x4] sm:$0xf] %vm5706_vm6, %v6105_v16  ;;  %v5076_v60 = vadd.f32 %v9294_v27, %v5075_v53  ;;  %v6567_v35 = vpop.f32.mrb[74].mxu1 }
 0x49f   : > { %v5352_v51 = vadd.f32 %v5084_v33, %v4948_v5  ;;  %v5087_v28 = vadd.f32 %v6567_v35, %v9294_v27  ;;  %v5078_v10 = vpop.f32.mrb[75].mxu1  ;;  %v4953_v33 = vmax.f32 %v4699_v59, 0.0 }
 0x4a0   : > { %v5350_v12 = vadd.f32 %v5076_v60, %v4946_v31  ;;  %v5079_v22 = vadd.f32 %v9294_v27, %v5078_v10  ;;  %v4951_v60 = vmax.f32 %v4691_v17, 0.0 }
 0x4a1   : > { %v6110_v14 = vpack.c.bf16 %v5352_v51, %v5352_v51  ;;  %v5353_v21 = vadd.f32 %v5087_v28, %v4949_v25  ;;  %v4712_v51 = vadd.f32 %v9112_v4, %v9276_v55 }
 0x4a2   : > { %v6108_v32 = vpack.c.bf16 %v5350_v12, %v5350_v12  ;;  %v5351_v41 = vadd.f32 %v5079_v22, %v4947_v6  ;;  %v4704_v6 = vadd.f32 %v9276_v55, %v9116_v44 }
 0x4a3   : > { %5713 = vst.msk [vmem:[%s9310_s26 + $0x18] sm:$0xf] %vm5706_vm6, %v6110_v14  ;;  %v6111_v3 = vpack.c.bf16 %v5353_v21, %v5353_v21  ;;  %v4707_v21 = vadd.f32 %v9276_v55, %v9122_v52 }
 0x4a4   : > { %5711 = vst.msk [vmem:[%s9310_s26 + $0x10] sm:$0xf] %vm5706_vm6, %v6108_v32  ;;  %v6109_v58 = vpack.c.bf16 %v5351_v41, %v5351_v41  ;;  %v6570_v8 = vpop.f32.mrb[76].mxu1  ;;  %v4956_v32 = vmax.f32 %v4712_v51, 0.0  ;;  %v4731_v51 = vadd.f32 %v9148_v38, %v9276_v55 }
 0x4a5   : > { %5714 = vst.msk [vmem:[%s9310_s26 + $0x1c] sm:$0xf] %vm5706_vm6, %v6111_v3  ;;  %v5100_v2 = vadd.f32 %v6570_v8, %v9294_v27  ;;  %v5091_v16 = vpop.f32.mrb[77].mxu1  ;;  %v4954_v3 = vmax.f32 %v4704_v6, 0.0 }
 0x4a6   : > { %5712 = vst.msk [vmem:[%s9310_s26 + $0x14] sm:$0xf] %vm5706_vm6, %v6109_v58  ;;  %v5092_v57 = vadd.f32 %v9294_v27, %v5091_v16  ;;  %v6571_v5 = vpop.f32.mrb[78].mxu1  ;;  %v4957_v58 = vmax.f32 %v4715_v0, 0.0 }
 0x4a7   : > { %v5356_v53 = vadd.f32 %v5100_v2, %v4952_v61  ;;  %v5103_v47 = vadd.f32 %v6571_v5, %v9294_v27  ;;  %v5094_v31 = vpop.f32.mrb[79].mxu1 }
 0x4a8   : > { %v5354_v35 = vadd.f32 %v5092_v57, %v4950_v46  ;;  %v5095_v25 = vadd.f32 %v9294_v27, %v5094_v31  ;;  %v4955_v46 = vmax.f32 %v4707_v21, 0.0  ;;  %v4961_v21 = vmax.f32 %v4731_v51, 0.0 }
 0x4a9   : > { %v6114_v28 = vpack.c.bf16 %v5356_v53, %v5356_v53  ;;  %v5357_v10 = vadd.f32 %v5103_v47, %v4953_v33  ;;  %v4728_v53 = vadd.f32 %v9142_v62, %v9276_v55 }
 0x4aa   : > { %v6112_v12 = vpack.c.bf16 %v5354_v35, %v5354_v35  ;;  %v5355_v22 = vadd.f32 %v5095_v25, %v4951_v60  ;;  %v4720_v60 = vadd.f32 %v9276_v55, %v9146_v19 }
 0x4ab   : > { %5717 = vst.msk [vmem:[%s9310_s26 + $0x28] sm:$0xf] %vm5706_vm6, %v6114_v28  ;;  %v6115_v14 = vpack.c.bf16 %v5357_v10, %v5357_v10  ;;  %v4723_v10 = vadd.f32 %v9276_v55, %v9152_v40 }
 0x4ac   : > { %5715 = vst.msk [vmem:[%s9310_s26 + $0x20] sm:$0xf] %vm5706_vm6, %v6112_v12  ;;  %v6113_v4 = vpack.c.bf16 %v5355_v22, %v5355_v22  ;;  %v6574_v7 = vpop.f32.mrb[80].mxu1  ;;  %v4960_v12 = vmax.f32 %v4728_v53, 0.0  ;;  %v4958_v0 = vmax.f32 %v4720_v60, 0.0 }
 0x4ad   : > { %5718 = vst.msk [vmem:[%s9310_s26 + $0x2c] sm:$0xf] %vm5706_vm6, %v6115_v14  ;;  %v5116_v44 = vadd.f32 %v6574_v7, %v9294_v27  ;;  %v9368_v41 = vpop.f32.mrb[120].mxu0  ;;  %v5107_v59 = vpop.f32.mrb[81].mxu1 }
 0x4ae   : > { %5716 = vst.msk [vmem:[%s9310_s26 + $0x24] sm:$0xf] %vm5706_vm6, %v6113_v4  ;;  %v5108_v50 = vadd.f32 %v9294_v27, %v5107_v59  ;;  %v9373_v17 = vpop.f32.mrb[121].mxu0  ;;  %v6575_v52 = vpop.f32.mrb[82].mxu1 }
 0x4af   : > { %v5360_v8 = vadd.f32 %v5116_v44, %v4956_v32  ;;  %v5119_v61 = vadd.f32 %v6575_v52, %v9294_v27  ;;  %v9376_v2 = vpop.f32.mrb[122].mxu0  ;;  %v5110_v16 = vpop.f32.mrb[83].mxu1  ;;  %v4959_v32 = vmax.f32 %v4723_v10, 0.0 }
 0x4b0   : > { %v5358_v57 = vadd.f32 %v5108_v50, %v4954_v3  ;;  %v5111_v5 = vadd.f32 %v9294_v27, %v5110_v16  ;;  %v9379_v33 = vpop.f32.mrb[123].mxu0  ;;  %v4744_v3 = vadd.f32 %v9172_v23, %v9276_v55  ;;  %v4747_v16 = vadd.f32 %v9178_v54, %v9276_v55 }
 0x4b1   : > { %v6118_v47 = vpack.c.bf16 %v5360_v8, %v5360_v8  ;;  %v5361_v31 = vadd.f32 %v5119_v61, %v4957_v58  ;;  %v4736_v58 = vadd.f32 %v9276_v55, %v9176_v42 }
 0x4b2   : > { %v6116_v35 = vpack.c.bf16 %v5358_v57, %v5358_v57  ;;  %v5359_v25 = vadd.f32 %v5111_v5, %v4955_v46  ;;  %v4739_v57 = vadd.f32 %v9276_v55, %v9182_v24  ;;  %v4964_v53 = vmax.f32 %v4744_v3, 0.0 }
 0x4b3   : > { %5721 = vst.msk [vmem:[%s9310_s26 + $0x38] sm:$0xf] %vm5706_vm6, %v6118_v47  ;;  %v6119_v28 = vpack.c.bf16 %v5361_v31, %v5361_v31  ;;  %v4962_v31 = vmax.f32 %v4736_v58, 0.0 }
 0x4b4   : > { %5719 = vst.msk [vmem:[%s9310_s26 + $0x30] sm:$0xf] %vm5706_vm6, %v6116_v35  ;;  %v6117_v62 = vpack.c.bf16 %v5359_v25, %v5359_v25  ;;  %v6578_v6 = vpop.f32.mrb[84].mxu1  ;;  %v4965_v35 = vmax.f32 %v4747_v16, 0.0  ;;  %v4776_v16 = vadd.f32 %v9232_v11, %v9276_v55 }
 0x4b5   : > { %5722 = vst.msk [vmem:[%s9310_s26 + $0x3c] sm:$0xf] %vm5706_vm6, %v6119_v28  ;;  %v5132_v19 = vadd.f32 %v6578_v6, %v9294_v27  ;;  %v5123_v22 = vpop.f32.mrb[85].mxu1  ;;  %v4963_v28 = vmax.f32 %v4739_v57, 0.0  ;;  %v4760_v6 = vadd.f32 %v9202_v18, %v9276_v55 }
 0x4b6   : > { %5720 = vst.msk [vmem:[%s9310_s26 + $0x34] sm:$0xf] %vm5706_vm6, %v6117_v62  ;;  %v5124_v38 = vadd.f32 %v9294_v27, %v5123_v22  ;;  %v6579_v14 = vpop.f32.mrb[86].mxu1  ;;  %v4752_v22 = vadd.f32 %v9276_v55, %v9206_v37 }
 0x4b7   : > { %v5364_v4 = vadd.f32 %v5132_v19, %v4960_v12  ;;  %v5135_v40 = vadd.f32 %v6579_v14, %v9294_v27  ;;  %v5126_v7 = vpop.f32.mrb[87].mxu1  ;;  %v4763_v14 = vadd.f32 %v9208_v13, %v9276_v55 }
 0x4b8   : > { %v5362_v44 = vadd.f32 %v5124_v38, %v4958_v0  ;;  %v5127_v59 = vadd.f32 %v9294_v27, %v5126_v7  ;;  %v4968_v7 = vmax.f32 %v4760_v6, 0.0 }
 0x4b9   : > { %v6122_v50 = vpack.c.bf16 %v5364_v4, %v5364_v4  ;;  %v5365_v52 = vadd.f32 %v5135_v40, %v4961_v21  ;;  %v4755_v4 = vadd.f32 %v9276_v55, %v9212_v20  ;;  %v4969_v3 = vmax.f32 %v4763_v14, 0.0 }
 0x4ba   : > { %v6120_v8 = vpack.c.bf16 %v5362_v44, %v5362_v44  ;;  %v5363_v61 = vadd.f32 %v5127_v59, %v4959_v32  ;;  %v4966_v44 = vmax.f32 %v4752_v22, 0.0  ;;  %v4792_v14 = vadd.f32 %v9248_v56, %v9276_v55 }
 0x4bb   : > { %5725 = vst.msk [vmem:[%s9310_s26 + $0x48] sm:$0xf] %vm5706_vm6, %v6122_v50  ;;  %v6123_v46 = vpack.c.bf16 %v5365_v52, %v5365_v52  ;;  %v4967_v58 = vmax.f32 %v4755_v4, 0.0 }
 0x4bc   : > { %5723 = vst.msk [vmem:[%s9310_s26 + $0x40] sm:$0xf] %vm5706_vm6, %v6120_v8  ;;  %v6121_v23 = vpack.c.bf16 %v5363_v61, %v5363_v61  ;;  %v6582_v5 = vpop.f32.mrb[88].mxu1 }
 0x4bd   : > { %5726 = vst.msk [vmem:[%s9310_s26 + $0x4c] sm:$0xf] %vm5706_vm6, %v6123_v46  ;;  %v5148_v42 = vadd.f32 %v6582_v5, %v9294_v27  ;;  %v5139_v47 = vpop.f32.mrb[89].mxu1 }
 0x4be   : > { %5724 = vst.msk [vmem:[%s9310_s26 + $0x44] sm:$0xf] %vm5706_vm6, %v6121_v23  ;;  %v5140_v54 = vadd.f32 %v9294_v27, %v5139_v47  ;;  %v6583_v60 = vpop.f32.mrb[90].mxu1  ;;  %v4768_v23 = vadd.f32 %v9276_v55, %v9236_v26 }
 0x4bf   : > { %v5368_v25 = vadd.f32 %v5148_v42, %v4964_v53  ;;  %v5151_v24 = vadd.f32 %v6583_v60, %v9294_v27  ;;  %v5142_v51 = vpop.f32.mrb[91].mxu1  ;;  %v4779_v42 = vadd.f32 %v9238_v30, %v9276_v55  ;;  %v4972_v60 = vmax.f32 %v4776_v16, 0.0 }
 0x4c0   : > { %v5366_v10 = vadd.f32 %v5140_v54, %v4962_v31  ;;  %v5143_v62 = vadd.f32 %v9294_v27, %v5142_v51  ;;  %v4771_v31 = vadd.f32 %v9276_v55, %v9240_v1 }
 0x4c1   : > { %v6126_v12 = vpack.c.bf16 %v5368_v25, %v5368_v25  ;;  %v5369_v19 = vadd.f32 %v5151_v24, %v4965_v35  ;;  %v4970_v24 = vmax.f32 %v4768_v23, 0.0 }
 0x4c2   : > { %v6124_v0 = vpack.c.bf16 %v5366_v10, %v5366_v10  ;;  %v5367_v38 = vadd.f32 %v5143_v62, %v4963_v28  ;;  %v4973_v28 = vmax.f32 %v4779_v42, 0.0 }
 0x4c3   : > { %5729 = vst.msk [vmem:[%s9310_s26 + $0x58] sm:$0xf] %vm5706_vm6, %v6126_v12  ;;  %v6127_v21 = vpack.c.bf16 %v5369_v19, %v5369_v19  ;;  %v4971_v19 = vmax.f32 %v4771_v31, 0.0  ;;  %v4811_v31 = vadd.f32 %v9260_v36, %v9276_v55 }
 0x4c4   : > { %5727 = vst.msk [vmem:[%s9310_s26 + $0x50] sm:$0xf] %vm5706_vm6, %v6124_v0  ;;  %v6125_v18 = vpack.c.bf16 %v5367_v38, %v5367_v38  ;;  %v6586_v40 = vpop.f32.mrb[92].mxu1 }
 0x4c5   : > { %5730 = vst.msk [vmem:[%s9310_s26 + $0x5c] sm:$0xf] %vm5706_vm6, %v6127_v21  ;;  %v5164_v37 = vadd.f32 %v6586_v40, %v9294_v27  ;;  %v5155_v32 = vpop.f32.mrb[93].mxu1 }
 0x4c6   : > { %5728 = vst.msk [vmem:[%s9310_s26 + $0x54] sm:$0xf] %vm5706_vm6, %v6125_v18  ;;  %v5156_v13 = vadd.f32 %v9294_v27, %v5155_v32  ;;  %v6587_v59 = vpop.f32.mrb[94].mxu1  ;;  %v4784_v18 = vadd.f32 %v9276_v55, %v9250_v45 }
 0x4c7   : > { %v5372_v50 = vadd.f32 %v5164_v37, %v4968_v7  ;;  %v5167_v20 = vadd.f32 %v6587_v59, %v9294_v27  ;;  %v5158_v52 = vpop.f32.mrb[95].mxu1  ;;  %v4795_v37 = vadd.f32 %v9252_v48, %v9276_v55  ;;  %v4976_v59 = vmax.f32 %v4792_v14, 0.0 }
 0x4c8   : > { %v5370_v8 = vadd.f32 %v5156_v13, %v4966_v44  ;;  %v5159_v61 = vadd.f32 %v9294_v27, %v5158_v52  ;;  %v4787_v44 = vadd.f32 %v9276_v55, %v9254_v34 }
 0x4c9   : > { %v6130_v46 = vpack.c.bf16 %v5372_v50, %v5372_v50  ;;  %v5373_v57 = vadd.f32 %v5167_v20, %v4969_v3  ;;  %v4974_v50 = vmax.f32 %v4784_v18, 0.0  ;;  %v4977_v52 = vmax.f32 %v4795_v37, 0.0 }
 0x4ca   : > { %v6128_v5 = vpack.c.bf16 %v5370_v8, %v5370_v8  ;;  %v5371_v53 = vadd.f32 %v5159_v61, %v4967_v58  ;;  %v4975_v61 = vmax.f32 %v4787_v44, 0.0  ;;  %v4819_v37 = vadd.f32 %v9276_v55, %v9285_v63 }
 0x4cb   : > { %5733 = vst.msk [vmem:[%s9310_s26 + $0x68] sm:$0xf] %vm5706_vm6, %v6130_v46  ;;  %v6131_v47 = vpack.c.bf16 %v5373_v57, %v5373_v57  ;;  %v4808_v57 = vadd.f32 %v9256_v43, %v9276_v55 }
 0x4cc   : > { %5731 = vst.msk [vmem:[%s9310_s26 + $0x60] sm:$0xf] %vm5706_vm6, %v6128_v5  ;;  %v6129_v11 = vpack.c.bf16 %v5371_v53, %v5371_v53  ;;  %v6590_v54 = vpop.f32.mrb[96].mxu1  ;;  %v4800_v53 = vadd.f32 %v9276_v55, %v9258_v49 }
 0x4cd   : > { %5734 = vst.msk [vmem:[%s9310_s26 + $0x6c] sm:$0xf] %vm5706_vm6, %v6131_v47  ;;  %v5180_v26 = vadd.f32 %v6590_v54, %v9294_v27  ;;  %v9456_v35 = vpop.f32.mrb[124].mxu0  ;;  %v5171_v25 = vpop.f32.mrb[97].mxu1  ;;  %v4803_v54 = vadd.f32 %v9276_v55, %v9263_v29 }
 0x4ce   : > { %5732 = vst.msk [vmem:[%s9310_s26 + $0x64] sm:$0xf] %vm5706_vm6, %v6129_v11  ;;  %v5172_v30 = vadd.f32 %v9294_v27, %v5171_v25  ;;  %v9461_v51 = vpop.f32.mrb[125].mxu0  ;;  %v6591_v1 = vpop.f32.mrb[98].mxu1 }
 0x4cf   : > { %v5376_v10 = vadd.f32 %v5180_v26, %v4972_v60  ;;  %v5183_v62 = vadd.f32 %v6591_v1, %v9294_v27  ;;  %v9464_v6 = vpop.f32.mrb[126].mxu0  ;;  %v5174_v12 = vpop.f32.mrb[99].mxu1  ;;  %v4980_v26 = vmax.f32 %v4808_v57, 0.0  ;;  %v4981_v1 = vmax.f32 %v4811_v31, 0.0 }
 0x4d0   : > { %v5374_v22 = vadd.f32 %v5172_v30, %v4970_v24  ;;  %v5175_v0 = vadd.f32 %v9294_v27, %v5174_v12  ;;  %v9467_v38 = vpop.f32.mrb[127].mxu0  ;;  %v4978_v24 = vmax.f32 %v4800_v53, 0.0  ;;  %v4843_v57 = vadd.f32 %v9376_v2, %v9276_v55 }
 0x4d1   : > { %v6134_v21 = vpack.c.bf16 %v5376_v10, %v5376_v10  ;;  %v5377_v4 = vadd.f32 %v5183_v62, %v4973_v28  ;;  %v4979_v62 = vmax.f32 %v4803_v54, 0.0 }
 0x4d2   : > { %v6132_v40 = vpack.c.bf16 %v5374_v22, %v5374_v22  ;;  %v5375_v7 = vadd.f32 %v5175_v0, %v4971_v19  ;;  %v4824_v22 = vadd.f32 %v9271_v15, %v9276_v55 }
 0x4d3   : > { %5737 = vst.msk [vmem:[%s9310_s26 + $0x78] sm:$0xf] %vm5706_vm6, %v6134_v21  ;;  %v6135_v32 = vpack.c.bf16 %v5377_v4, %v5377_v4  ;;  %v4816_v21 = vadd.f32 %v9276_v55, %v9279_v39 }
 0x4d4   : > { %5735 = vst.msk [vmem:[%s9310_s26 + $0x70] sm:$0xf] %vm5706_vm6, %v6132_v40  ;;  %v6133_v56 = vpack.c.bf16 %v5375_v7, %v5375_v7  ;;  %v6594_v13 = vpop.f32.mrb[100].mxu1  ;;  %v4827_v40 = vadd.f32 %v9282_v9, %v9276_v55  ;;  %v4984_v44 = vmax.f32 %v4824_v22, 0.0  ;;  %v4859_v22 = vadd.f32 %v9464_v6, %v9276_v55 }
 0x4d5   : > { %5738 = vst.msk [vmem:[%s9310_s26 + $0x7c] sm:$0xf] %vm5706_vm6, %v6135_v32  ;;  %v5196_v45 = vadd.f32 %v6594_v13, %v9294_v27  ;;  %v5187_v3 = vpop.f32.mrb[101].mxu1  ;;  %v4982_v13 = vmax.f32 %v4816_v21, 0.0 }
 0x4d6   : > { %5736 = vst.msk [vmem:[%s9310_s26 + $0x74] sm:$0xf] %vm5706_vm6, %v6133_v56  ;;  %v5188_v48 = vadd.f32 %v9294_v27, %v5187_v3  ;;  %v6595_v20 = vpop.f32.mrb[102].mxu1 }
 0x4d7   : > { %v5380_v58 = vadd.f32 %v5196_v45, %v4976_v59  ;;  %v5199_v34 = vadd.f32 %v6595_v20, %v9294_v27  ;;  %v5190_v8 = vpop.f32.mrb[103].mxu1  ;;  %v4985_v45 = vmax.f32 %v4827_v40, 0.0 }
 0x4d8   : > { %v5378_v16 = vadd.f32 %v5188_v48, %v4974_v50  ;;  %v5191_v46 = vadd.f32 %v9294_v27, %v5190_v8  ;;  %v4983_v48 = vmax.f32 %v4819_v37, 0.0  ;;  %v4993_v37 = vmax.f32 %v4859_v22, 0.0 }
 0x4d9   : > { %v6138_v23 = vpack.c.bf16 %v5380_v58, %v5380_v58  ;;  %v5381_v5 = vadd.f32 %v5199_v34, %v4977_v52  ;;  %v4840_v58 = vadd.f32 %v9368_v41, %v9276_v55 }
 0x4da   : > { %v6136_v42 = vpack.c.bf16 %v5378_v16, %v5378_v16  ;;  %v5379_v47 = vadd.f32 %v5191_v46, %v4975_v61  ;;  %v4832_v61 = vadd.f32 %v9276_v55, %v9373_v17 }
 0x4db   : > { %5741 = vst.msk [vmem:[%s9310_s26 + $0x88] sm:$0xf] %vm5706_vm6, %v6138_v23  ;;  %v6139_v11 = vpack.c.bf16 %v5381_v5, %v5381_v5  ;;  %v4835_v5 = vadd.f32 %v9276_v55, %v9379_v33 }
 0x4dc   : > { %5739 = vst.msk [vmem:[%s9310_s26 + $0x80] sm:$0xf] %vm5706_vm6, %v6136_v42  ;;  %v6137_v43 = vpack.c.bf16 %v5379_v47, %v5379_v47  ;;  %v6598_v60 = vpop.f32.mrb[104].mxu1  ;;  %v4988_v42 = vmax.f32 %v4840_v58, 0.0 }
 0x4dd   : > { %5742 = vst.msk [vmem:[%s9310_s26 + $0x8c] sm:$0xf] %vm5706_vm6, %v6139_v11  ;;  %v5212_v49 = vadd.f32 %v6598_v60, %v9294_v27  ;;  %v5203_v25 = vpop.f32.mrb[105].mxu1  ;;  %v4986_v11 = vmax.f32 %v4832_v61, 0.0  ;;  %v4989_v60 = vmax.f32 %v4843_v57, 0.0 }
 0x4de   : > { %5740 = vst.msk [vmem:[%s9310_s26 + $0x84] sm:$0xf] %vm5706_vm6, %v6137_v43  ;;  %v5204_v36 = vadd.f32 %v9294_v27, %v5203_v25  ;;  %v6599_v30 = vpop.f32.mrb[106].mxu1 }
 0x4df   : > { %v5384_v28 = vadd.f32 %v5212_v49, %v4980_v26  ;;  %v5215_v29 = vadd.f32 %v6599_v30, %v9294_v27  ;;  %v5206_v10 = vpop.f32.mrb[107].mxu1 }
 0x4e0   : > { %v5382_v12 = vadd.f32 %v5204_v36, %v4978_v24  ;;  %v5207_v19 = vadd.f32 %v9294_v27, %v5206_v10  ;;  %v4987_v24 = vmax.f32 %v4835_v5, 0.0 }
 0x4e1   : > { %v6142_v0 = vpack.c.bf16 %v5384_v28, %v5384_v28  ;;  %v5385_v14 = vadd.f32 %v5215_v29, %v4981_v1  ;;  %v4856_v28 = vadd.f32 %v9456_v35, %v9276_v55 }
 0x4e2   : > { %v6140_v4 = vpack.c.bf16 %v5382_v12, %v5382_v12  ;;  %v5383_v18 = vadd.f32 %v5207_v19, %v4979_v62  ;;  %v4848_v62 = vadd.f32 %v9276_v55, %v9461_v51 }
 0x4e3   : > { %5745 = vst.msk [vmem:[%s9310_s26 + $0x98] sm:$0xf] %vm5706_vm6, %v6142_v0  ;;  %v6143_v7 = vpack.c.bf16 %v5385_v14, %v5385_v14  ;;  %v4851_v14 = vadd.f32 %v9276_v55, %v9467_v38 }
 0x4e4   : > { %5743 = vst.msk [vmem:[%s9310_s26 + $0x90] sm:$0xf] %vm5706_vm6, %v6140_v4  ;;  %v6141_v15 = vpack.c.bf16 %v5383_v18, %v5383_v18  ;;  %v6602_v32 = vpop.f32.mrb[108].mxu1  ;;  %v4992_v4 = vmax.f32 %v4856_v28, 0.0  ;;  %v4990_v40 = vmax.f32 %v4848_v62, 0.0 }
 0x4e5   : > { %5746 = vst.msk [vmem:[%s9310_s26 + $0x9c] sm:$0xf] %vm5706_vm6, %v6143_v7  ;;  %v5228_v39 = vadd.f32 %v6602_v32, %v9294_v27  ;;  %v5219_v56 = vpop.f32.mrb[109].mxu1 }
 0x4e6   : > { %5744 = vst.msk [vmem:[%s9310_s26 + $0x94] sm:$0xf] %vm5706_vm6, %v6141_v15  ;;  %v5220_v9 = vadd.f32 %v9294_v27, %v5219_v56  ;;  %v6603_v59 = vpop.f32.mrb[110].mxu1 }
 0x4e7   : > { %v5388_v3 = vadd.f32 %v5228_v39, %v4984_v44  ;;  %v5231_v63 = vadd.f32 %v6603_v59, %v9294_v27  ;;  %v5222_v50 = vpop.f32.mrb[111].mxu1  ;;  %v4991_v44 = vmax.f32 %v4851_v14, 0.0 }
 0x4e8   : > { %v5386_v20 = vadd.f32 %v5220_v9, %v4982_v13  ;;  %v5223_v52 = vadd.f32 %v9294_v27, %v5222_v50 }
 0x4e9   : > { %v6146_v34 = vpack.c.bf16 %v5388_v3, %v5388_v3  ;;  %v5389_v8 = vadd.f32 %v5231_v63, %v4985_v45 }
 0x4ea   : > { %v6144_v16 = vpack.c.bf16 %v5386_v20, %v5386_v20  ;;  %v5387_v46 = vadd.f32 %v5223_v52, %v4983_v48 }
 0x4eb   : > { %5749 = vst.msk [vmem:[%s9310_s26 + $0xa8] sm:$0xf] %vm5706_vm6, %v6146_v34  ;;  %v6147_v23 = vpack.c.bf16 %v5389_v8, %v5389_v8 }
 0x4ec   : > { %5747 = vst.msk [vmem:[%s9310_s26 + $0xa0] sm:$0xf] %vm5706_vm6, %v6144_v16  ;;  %v6145_v41 = vpack.c.bf16 %v5387_v46, %v5387_v46  ;;  %v6606_v53 = vpop.f32.mrb[112].mxu1 }
 0x4ed   : > { %5750 = vst.msk [vmem:[%s9310_s26 + $0xac] sm:$0xf] %vm5706_vm6, %v6147_v23  ;;  %v5244_v17 = vadd.f32 %v6606_v53, %v9294_v27  ;;  %v6540_v47 = vpop.f32.mrb[128].mxu0  ;;  %v5235_v31 = vpop.f32.mrb[113].mxu1 }
 0x4ee   : > { %5748 = vst.msk [vmem:[%s9310_s26 + $0xa4] sm:$0xf] %vm5706_vm6, %v6145_v41  ;;  %v5236_v2 = vadd.f32 %v9294_v27, %v5235_v31  ;;  %v4863_v54 = vpop.f32.mrb[129].mxu0  ;;  %v6607_v43 = vpop.f32.mrb[114].mxu1  ;;  %v4872_v13 = vadd.f32 %v6540_v47, %v9276_v55 }
 0x4ef   : > { %v5392_v33 = vadd.f32 %v5244_v17, %v4988_v42  ;;  %v5247_v26 = vadd.f32 %v6607_v43, %v9294_v27  ;;  %v6541_v49 = vpop.f32.mrb[130].mxu0  ;;  %v5238_v25 = vpop.f32.mrb[115].mxu1  ;;  %v4864_v45 = vadd.f32 %v9276_v55, %v4863_v54 }
 0x4f0   : > { %v5390_v36 = vadd.f32 %v5236_v2, %v4986_v11  ;;  %v5239_v30 = vadd.f32 %v9294_v27, %v5238_v25  ;;  %v4866_v1 = vpop.f32.mrb[131].mxu0  ;;  %v4875_v50 = vadd.f32 %v6541_v49, %v9276_v55  ;;  %v4996_v34 = vmax.f32 %v4872_v13, 0.0 }
 0x4f1   : > { %v6150_v29 = vpack.c.bf16 %v5392_v33, %v5392_v33  ;;  %v5393_v10 = vadd.f32 %v5247_v26, %v4989_v60  ;;  %v4867_v20 = vadd.f32 %v9276_v55, %v4866_v1  ;;  %v4994_v16 = vmax.f32 %v4864_v45, 0.0 }
 0x4f2   : > { %v6148_v12 = vpack.c.bf16 %v5390_v36, %v5390_v36  ;;  %v5391_v19 = vadd.f32 %v5239_v30, %v4987_v24  ;;  %v4997_v23 = vmax.f32 %v4875_v50, 0.0 }
 0x4f3   : > { %5753 = vst.msk [vmem:[%s9310_s26 + $0xb8] sm:$0xf] %vm5706_vm6, %v6150_v29  ;;  %v6151_v0 = vpack.c.bf16 %v5393_v10, %v5393_v10  ;;  %v4995_v42 = vmax.f32 %v4867_v20, 0.0 }
 0x4f4   : > { %5751 = vst.msk [vmem:[%s9310_s26 + $0xb0] sm:$0xf] %vm5706_vm6, %v6148_v12  ;;  %v6149_v35 = vpack.c.bf16 %v5391_v19, %v5391_v19  ;;  %v6610_v21 = vpop.f32.mrb[116].mxu1 }
 0x4f5   : > { %5754 = vst.msk [vmem:[%s9310_s26 + $0xbc] sm:$0xf] %vm5706_vm6, %v6151_v0  ;;  %v5260_v51 = vadd.f32 %v6610_v21, %v9294_v27  ;;  %v5251_v18 = vpop.f32.mrb[117].mxu1 }
 0x4f6   : > { %5752 = vst.msk [vmem:[%s9310_s26 + $0xb4] sm:$0xf] %vm5706_vm6, %v6149_v35  ;;  %v5252_v6 = vadd.f32 %v9294_v27, %v5251_v18  ;;  %v6611_v7 = vpop.f32.mrb[118].mxu1 }
 0x4f7   : > { %v5396_v15 = vadd.f32 %v5260_v51, %v4992_v4  ;;  %v5263_v38 = vadd.f32 %v6611_v7, %v9294_v27  ;;  %v5254_v32 = vpop.f32.mrb[119].mxu1 }
 0x4f8   : > { %v5394_v39 = vadd.f32 %v5252_v6, %v4990_v40  ;;  %v5255_v56 = vadd.f32 %v9294_v27, %v5254_v32 }
 0x4f9   : > { %v6154_v9 = vpack.c.bf16 %v5396_v15, %v5396_v15  ;;  %v5397_v59 = vadd.f32 %v5263_v38, %v4993_v37 }
 0x4fa   : > { %v6152_v3 = vpack.c.bf16 %v5394_v39, %v5394_v39  ;;  %v5395_v63 = vadd.f32 %v5255_v56, %v4991_v44 }
 0x4fb   : > { %5757 = vst.msk [vmem:[%s9310_s26 + $0xc8] sm:$0xf] %vm5706_vm6, %v6154_v9  ;;  %v6155_v48 = vpack.c.bf16 %v5397_v59, %v5397_v59 }
 0x4fc   : > { %5755 = vst.msk [vmem:[%s9310_s26 + $0xc0] sm:$0xf] %vm5706_vm6, %v6152_v3  ;;  %v6153_v52 = vpack.c.bf16 %v5395_v63, %v5395_v63  ;;  %v6614_v58 = vpop.f32.mrb[120].mxu1 }
 0x4fd   : > { %5758 = vst.msk [vmem:[%s9310_s26 + $0xcc] sm:$0xf] %vm5706_vm6, %v6155_v48  ;;  %v5276_v8 = vadd.f32 %v6614_v58, %v9294_v27  ;;  %v5267_v61 = vpop.f32.mrb[121].mxu1 }
 0x4fe   : > { %5756 = vst.msk [vmem:[%s9310_s26 + $0xc4] sm:$0xf] %vm5706_vm6, %v6153_v52  ;;  %v5268_v46 = vadd.f32 %v9294_v27, %v5267_v61  ;;  %v6615_v57 = vpop.f32.mrb[122].mxu1 }
 0x4ff   : > { %v5400_v5 = vadd.f32 %v5276_v8, %v4996_v34  ;;  %v5279_v41 = vadd.f32 %v6615_v57, %v9294_v27  ;;  %v5270_v53 = vpop.f32.mrb[123].mxu1 }
 0x500   : > { %v5398_v17 = vadd.f32 %v5268_v46, %v4994_v16  ;;  %v5271_v47 = vadd.f32 %v9294_v27, %v5270_v53 }
 0x501   : > { %v6158_v31 = vpack.c.bf16 %v5400_v5, %v5400_v5  ;;  %v5401_v11 = vadd.f32 %v5279_v41, %v4997_v23 }
 0x502   : > { %v6156_v2 = vpack.c.bf16 %v5398_v17, %v5398_v17  ;;  %v5399_v54 = vadd.f32 %v5271_v47, %v4995_v42 }
 0x503   : > { %5761 = vst.msk [vmem:[%s9310_s26 + $0xd8] sm:$0xf] %vm5706_vm6, %v6158_v31  ;;  %v6159_v43 = vpack.c.bf16 %v5401_v11, %v5401_v11 }
 0x504   : > { %5759 = vst.msk [vmem:[%s9310_s26 + $0xd0] sm:$0xf] %vm5706_vm6, %v6156_v2  ;;  %v6157_v60 = vpack.c.bf16 %v5399_v54, %v5399_v54  ;;  %v6618_v33 = vpop.f32.mrb[124].mxu1 }
 0x505   : > { %5762 = vst.msk [vmem:[%s9310_s26 + $0xdc] sm:$0xf] %vm5706_vm6, %v6159_v43  ;;  %v5283_v26 = vpop.f32.mrb[125].mxu1  ;;  %v5292_v29 = vadd.f32 %v6618_v33, %v9294_v27 }
 0x506   : > { %5760 = vst.msk [vmem:[%s9310_s26 + $0xd4] sm:$0xf] %vm5706_vm6, %v6157_v60  ;;  %v6619_v49 = vpop.f32.mrb[126].mxu1  ;;  %v5284_v19 = vadd.f32 %v9294_v27, %v5283_v26 }
 0x507   : > { %v5286_v25 = vpop.f32.mrb[127].mxu1  ;;  %v5295_v21 = vadd.f32 %v6619_v49, %v9294_v27 }
 0x508   : > { %v5287_v18 = vadd.f32 %v9294_v27, %v5286_v25 }
 0x50c   : > { %v6622_v24 = vpop.f32.mrb[128].mxu1 }
 0x50d   : > { %v6544_v36 = vpop.f32.mrb[132].mxu0  ;;  %v5299_v30 = vpop.f32.mrb[129].mxu1  ;;  %v5308_v34 = vadd.f32 %v6622_v24, %v9294_v27 }
 0x50e   : > { %v4888_v1 = vadd.f32 %v6544_v36, %v9276_v55  ;;  %v4879_v28 = vpop.f32.mrb[133].mxu0  ;;  %v6623_v10 = vpop.f32.mrb[130].mxu1  ;;  %v5300_v16 = vadd.f32 %v9294_v27, %v5299_v30 }
 0x50f   : > { %v4880_v62 = vadd.f32 %v9276_v55, %v4879_v28  ;;  %v6545_v12 = vpop.f32.mrb[134].mxu0  ;;  %v5302_v22 = vpop.f32.mrb[131].mxu1  ;;  %v5311_v5 = vadd.f32 %v6623_v10, %v9294_v27 }
 0x510   : > { %v5000_v0 = vmax.f32 %v4888_v1, 0.0  ;;  %v4891_v14 = vadd.f32 %v6545_v12, %v9276_v55  ;;  %v4882_v35 = vpop.f32.mrb[135].mxu0  ;;  %v5303_v42 = vadd.f32 %v9294_v27, %v5302_v22 }
 0x511   : > { %v4998_v4 = vmax.f32 %v4880_v62, 0.0  ;;  %v4883_v51 = vadd.f32 %v9276_v55, %v4882_v35 }
 0x512   : > { %v5001_v40 = vmax.f32 %v4891_v14, 0.0  ;;  %v5404_v6 = vadd.f32 %v5292_v29, %v5000_v0 }
 0x513   : > { %v4999_v7 = vmax.f32 %v4883_v51, 0.0  ;;  %v5402_v37 = vadd.f32 %v5284_v19, %v4998_v4 }
 0x514   : > { %v6162_v15 = vpack.c.bf16 %v5404_v6, %v5404_v6  ;;  %v5405_v38 = vadd.f32 %v5295_v21, %v5001_v40  ;;  %v6626_v32 = vpop.f32.mrb[132].mxu1 }
 0x515   : > { %v6160_v44 = vpack.c.bf16 %v5402_v37, %v5402_v37  ;;  %v5403_v39 = vadd.f32 %v5287_v18, %v4999_v7  ;;  %v5315_v56 = vpop.f32.mrb[133].mxu1  ;;  %v5324_v36 = vadd.f32 %v6626_v32, %v9294_v27 }
 0x516   : > { %5765 = vst.msk [vmem:[%s9310_s26 + $0xe8] sm:$0xf] %vm5706_vm6, %v6162_v15  ;;  %v6163_v13 = vpack.c.bf16 %v5405_v38, %v5405_v38  ;;  %v6627_v9 = vpop.f32.mrb[134].mxu1  ;;  %v5316_v28 = vadd.f32 %v9294_v27, %v5315_v56  ;;  %v6780_v38 = vld [vmem:[%s9674_s6] ss:$0 sm:$0xff] }
 0x517   : > { %5763 = vst.msk [vmem:[%s9310_s26 + $0xe0] sm:$0xf] %vm5706_vm6, %v6160_v44  ;;  %v6161_v59 = vpack.c.bf16 %v5403_v39, %v5403_v39  ;;  %v5318_v45 = vpop.f32.mrb[135].mxu1  ;;  %v5327_v12 = vadd.f32 %v6627_v9, %v9294_v27  ;;  %v6781_v39 = vld [vmem:[%s9676_s8] ss:$0 sm:$0xff] }
 0x518   : > { %5766 = vst.msk [vmem:[%s9310_s26 + $0xec] sm:$0xf] %vm5706_vm6, %v6163_v13  ;;  %v5319_v0 = vadd.f32 %v9294_v27, %v5318_v45 }
 0x519   : > { %5764 = vst.msk [vmem:[%s9310_s26 + $0xe4] sm:$0xf] %vm5706_vm6, %v6161_v59 }
 0x51c   : > { %v6630_v3 = vpop.f32.mrb[136].mxu1 }
 0x51d   : > { %v9609_v63 = vpop.f32.mrb[137].mxu1  ;;  %v5340_v15 = vadd.f32 %v6630_v3, %v9294_v27 }
 0x51e   : > { %v9611_v50 = vpop.f32.mrb[138].mxu1  ;;  %v5332_v56 = vadd.f32 %v6781_v39, %v9609_v63 }
 0x51f   : > { %v9613_v48 = vpop.f32.mrb[139].mxu1 }
 0x52d   : > { %v6548_v20 = vpop.f32.mrb[136].mxu0 }
 0x52e   : > { %v4904_v52 = vadd.f32 %v6548_v20, %v9276_v55  ;;  %v4895_v58 = vpop.f32.mrb[137].mxu0 }
 0x52f   : > { %v4896_v8 = vadd.f32 %v9276_v55, %v4895_v58  ;;  %v6549_v61 = vpop.f32.mrb[138].mxu0  ;;  %v5343_v58 = vadd.f32 %v6781_v39, %v9611_v50 }
 0x530   : > { %v5004_v46 = vmax.f32 %v4904_v52, 0.0  ;;  %v4907_v57 = vadd.f32 %v6549_v61, %v9276_v55  ;;  %v4898_v23 = vpop.f32.mrb[139].mxu0  ;;  %v5335_v61 = vadd.f32 %v6781_v39, %v9613_v48 }
 0x531   : > { %v5002_v41 = vmax.f32 %v4896_v8, 0.0  ;;  %v4899_v53 = vadd.f32 %v9276_v55, %v4898_v23 }
 0x532   : > { %v5005_v17 = vmax.f32 %v4907_v57, 0.0  ;;  %v5408_v47 = vadd.f32 %v5308_v34, %v5004_v46 }
 0x533   : > { %v5003_v31 = vmax.f32 %v4899_v53, 0.0  ;;  %v5406_v11 = vadd.f32 %v5300_v16, %v5002_v41 }
 0x534   : > { %v6166_v2 = vpack.c.bf16 %v5408_v47, %v5408_v47  ;;  %v5409_v54 = vadd.f32 %v5311_v5, %v5005_v17 }
 0x535   : > { %v6164_v43 = vpack.c.bf16 %v5406_v11, %v5406_v11  ;;  %v5407_v60 = vadd.f32 %v5303_v42, %v5003_v31 }
 0x536   : > { %5769 = vst.msk [vmem:[%s9310_s26 + $0xf8] sm:$0xf] %vm5706_vm6, %v6166_v2  ;;  %v6167_v33 = vpack.c.bf16 %v5409_v54, %v5409_v54 }
 0x537   : > { %5767 = vst.msk [vmem:[%s9310_s26 + $0xf0] sm:$0xf] %vm5706_vm6, %v6164_v43  ;;  %v6165_v26 = vpack.c.bf16 %v5407_v60, %v5407_v60 }
 0x538   : > { %5770 = vst.msk [vmem:[%s9310_s26 + $0xfc] sm:$0xf] %vm5706_vm6, %v6167_v33 }
 0x539   : > { %5768 = vst.msk [vmem:[%s9310_s26 + $0xf4] sm:$0xf] %vm5706_vm6, %v6165_v26 }
 0x54d   : > { %v6552_v49 = vpop.f32.mrb[140].mxu0 }
 0x54e   : > { %v4920_v25 = vadd.f32 %v6552_v49, %v9276_v55  ;;  %v4911_v24 = vpop.f32.mrb[141].mxu0 }
 0x54f   : > { %v4912_v30 = vadd.f32 %v9276_v55, %v4911_v24  ;;  %v6553_v1 = vpop.f32.mrb[142].mxu0 }
 0x550   : > { %v5008_v29 = vmax.f32 %v4920_v25, 0.0  ;;  %v4923_v10 = vadd.f32 %v6553_v1, %v9276_v55  ;;  %v4914_v62 = vpop.f32.mrb[143].mxu0 }
 0x551   : > { %v5006_v19 = vmax.f32 %v4912_v30, 0.0  ;;  %v4915_v22 = vadd.f32 %v9276_v55, %v4914_v62 }
 0x552   : > { %v5009_v14 = vmax.f32 %v4923_v10, 0.0  ;;  %v5412_v35 = vadd.f32 %v5324_v36, %v5008_v29 }
 0x553   : > { %v5007_v21 = vmax.f32 %v4915_v22, 0.0  ;;  %v5410_v4 = vadd.f32 %v5316_v28, %v5006_v19 }
 0x554   : > { %v6170_v51 = vpack.c.bf16 %v5412_v35, %v5412_v35  ;;  %v5413_v18 = vadd.f32 %v5327_v12, %v5009_v14 }
 0x555   : > { %v6168_v40 = vpack.c.bf16 %v5410_v4, %v5410_v4  ;;  %v5411_v6 = vadd.f32 %v5319_v0, %v5007_v21 }
 0x556   : > { %5773 = vst.msk [vmem:[%s9310_s26 + $0x108] sm:$0xf] %vm5706_vm6, %v6170_v51  ;;  %v6171_v7 = vpack.c.bf16 %v5413_v18, %v5413_v18 }
 0x557   : > { %5771 = vst.msk [vmem:[%s9310_s26 + $0x100] sm:$0xf] %vm5706_vm6, %v6168_v40  ;;  %v6169_v37 = vpack.c.bf16 %v5411_v6, %v5411_v6 }
 0x558   : > { %5774 = vst.msk [vmem:[%s9310_s26 + $0x10c] sm:$0xf] %vm5706_vm6, %v6171_v7 }
 0x559   : > { %5772 = vst.msk [vmem:[%s9310_s26 + $0x104] sm:$0xf] %vm5706_vm6, %v6169_v37 }
 0x56a   : > { %v6556_v55 = vpop.f32.mrb[144].mxu0 }
 0x56b   : > { %v4936_v32 = vadd.f32 %v6780_v38, %v6556_v55  ;;  %v4927_v44 = vpop.f32.mrb[145].mxu0 }
 0x56c   : > { %v4928_v13 = vadd.f32 %v6780_v38, %v4927_v44  ;;  %v6557_v9 = vpop.f32.mrb[146].mxu0 }
 0x56d   : > { %v5012_v59 = vmax.f32 %v4936_v32, 0.0  ;;  %v4939_v45 = vadd.f32 %v6780_v38, %v6557_v9  ;;  %v4930_v20 = vpop.f32.mrb[147].mxu0 }
 0x56e   : > { %v5010_v27 = vmax.f32 %v4928_v13, 0.0  ;;  %v4931_v3 = vadd.f32 %v6780_v38, %v4930_v20 }
 0x56f   : > { %v5416_v52 = vadd.f32 %v5340_v15, %v5012_v59  ;;  %v5013_v34 = vmax.f32 %v4939_v45, 0.0 }
 0x570   : > { %v5414_v8 = vadd.f32 %v5332_v56, %v5010_v27  ;;  %v5011_v16 = vmax.f32 %v4931_v3, 0.0 }
 0x571   : > { %v6174_v63 = vpack.c.bf16 %v5416_v52, %v5416_v52  ;;  %v5417_v46 = vadd.f32 %v5343_v58, %v5013_v34 }
 0x572   : > { %v6172_v57 = vpack.c.bf16 %v5414_v8, %v5414_v8  ;;  %v5415_v23 = vadd.f32 %v5335_v61, %v5011_v16 }
 0x573   : > { %5777 = vst.msk [vmem:[%s9310_s26 + $0x118] sm:$0xf] %vm5706_vm6, %v6174_v63  ;;  %v6175_v5 = vpack.c.bf16 %v5417_v46, %v5417_v46 }
 0x574   : > { %5775 = vst.msk [vmem:[%s9310_s26 + $0x110] sm:$0xf] %vm5706_vm6, %v6172_v57  ;;  %v6173_v41 = vpack.c.bf16 %v5415_v23, %v5415_v23 }
 0x575   : > { %5778 = vst.msk [vmem:[%s9310_s26 + $0x11c] sm:$0xf] %vm5706_vm6, %v6175_v5 }
 0x576   : > { %5776 = vst.msk [vmem:[%s9310_s26 + $0x114] sm:$0xf] %vm5706_vm6, %v6173_v41 }
 0x577 PF: > { %s19_s30 = sadd.s32 1, %s6788_s30  }
 0x578   : > { %p16_p4 = scmp.ge.s32.totalorder %s19_s30, 4  }
 0x57a   :  { %18 = sbr.rel (!%p16_p4) target bundleno = 1 (0x1), region = 86 }

</bundles_post_ra>
